<compile_context>
chip_gen: v7x
topology: tpu7x:2x2x1
jax: 0.10.0
libtpu: 0.0.40
codegen_flags: <defaults>
</compile_context>

<pallas_src>
import jax
import jax.numpy as jnp
from jax import lax
from jax.experimental import pallas as pl
from jax.experimental.pallas import tpu as pltpu

BN_EPS = 1e-5


def _mish(y):
    # x * tanh(softplus(x)) == x * e(e+2)/(e(e+2)+2) with e = exp(x).
    # Clamp at 20: for x >= 20 the ratio is exactly 1.0 in f32, so mish(x) = x.
    # Uses 2 EUP ops (exp, divide) instead of 3 (exp, log1p, tanh).
    e = jnp.exp(jnp.minimum(y, 20.0))
    n = e * (e + 2.0)
    return y * (n / (n + 2.0))


# ----------------------------- fused Pallas kernel --------------------------

def _residual_block_kernel(x_ref, w1_ref, b1_ref, w2_ref, b2_ref, o_ref, mid_ref):
    """out = x + Mish(BN(conv3x3(Mish(BN(conv1x1(x)))))), intermediates in VMEM.

    x_ref  : (1, H, W, Cin)   input image block
    w1_ref : (Cin, Cmid)      1x1 weights with BN scale folded in
    b1_ref : (1, Cmid)        folded BN bias, layer 1
    w2_ref : (9, Cmid, Cin)   3x3 weights (taps flattened) with BN scale folded
    b2_ref : (1, Cin)         folded BN bias, layer 2
    o_ref  : (1, H, W, Cin)   output block
    mid_ref: VMEM (H+2, W+2, Cmid) scratch: zero-padded intermediate activation
    """
    _, H, W, Cin = x_ref.shape
    Cmid = w1_ref.shape[-1]

    # ---- layer 1: 1x1 conv + folded BN bias + Mish (one MXU dot, all pixels)
    x2d = x_ref[0].reshape(H * W, Cin).astype(jnp.float32)
    y1 = jnp.dot(x2d, w1_ref[...], preferred_element_type=jnp.float32)
    y1 = _mish(y1 + b1_ref[...])

    # ---- stage zero-padded intermediate in VMEM.  The scratch is ~10 KB, so
    #      the full zero-fill (which also establishes the halo ring) is
    #      negligible relative to the matmuls and the HBM read/write.
    #      (Zeroed every step: with "parallel" megacore sharding each core's
    #      scratch starts uninitialized on its own first step.)
    mid_ref[...] = jnp.zeros_like(mid_ref)
    mid_ref[1:H + 1, 1:W + 1, :] = y1.reshape(H, W, Cmid)

    # ---- layer 2: 3x3 conv (stride 1, pad 1) as 9 shifted matmuls over the
    #      VMEM-resident intermediate; accumulator seeded from tap 0.
    acc = jnp.dot(mid_ref[0:H, 0:W, :].reshape(H * W, Cmid), w2_ref[0],
                  preferred_element_type=jnp.float32)
    for tap in range(1, 9):
        dh, dw = divmod(tap, 3)
        patch = mid_ref[dh:dh + H, dw:dw + W, :].reshape(H * W, Cmid)
        acc = acc + jnp.dot(patch, w2_ref[tap],
                            preferred_element_type=jnp.float32)
    y2 = _mish(acc + b2_ref[...])

    # ---- residual add; single HBM writeback of the final tensor only
    o_ref[...] = (x2d + y2).reshape(1, H, W, Cin).astype(o_ref.dtype)


# --------------------------------- wrapper ----------------------------------

def residual_layer(x_nchw, params):
    """x + ConvBNMish_3x3(ConvBNMish_1x1(x)); NCHW in / NCHW out."""
    (w1, g1, be1, m1, v1), (w2, g2, be2, m2, v2) = params
    x = jnp.transpose(x_nchw, (0, 2, 3, 1))  # NCHW -> NHWC
    N, H, W, Cin = x.shape
    Cmid = w1.shape[-1]

    # Fold eval-mode BatchNorm into the conv weights (scale) + a bias.
    s1 = g1 / jnp.sqrt(v1 + BN_EPS)
    b1 = be1 - m1 * s1
    s2 = g2 / jnp.sqrt(v2 + BN_EPS)
    b2 = be2 - m2 * s2
    w1f = w1.reshape(Cin, Cmid) * s1[None, :]                       # (Cin, Cmid)
    w2f = (w2 * s2[None, None, None, :]).reshape(9, Cmid, Cin)      # (9, Cmid, Cin)

    out = pl.pallas_call(
        _residual_block_kernel,
        out_shape=jax.ShapeDtypeStruct((N, H, W, Cin), x.dtype),
        grid=(N,),
        in_specs=[
            pl.BlockSpec((1, H, W, Cin), lambda n: (n, 0, 0, 0)),
            pl.BlockSpec((Cin, Cmid), lambda n: (0, 0)),
            pl.BlockSpec((1, Cmid), lambda n: (0, 0)),
            pl.BlockSpec((9, Cmid, Cin), lambda n: (0, 0, 0)),
            pl.BlockSpec((1, Cin), lambda n: (0, 0)),
        ],
        out_specs=pl.BlockSpec((1, H, W, Cin), lambda n: (n, 0, 0, 0)),
        scratch_shapes=[pltpu.VMEM((H + 2, W + 2, Cmid), jnp.float32)],
        compiler_params=pltpu.CompilerParams(dimension_semantics=("parallel",)),
    )(x, w1f, b1.reshape(1, Cmid), w2f, b2.reshape(1, Cin))

    return jnp.transpose(out, (0, 3, 1, 2))  # NHWC -> NCHW


# ----------------------------- params / reference ---------------------------

def init_params(key, in_channels):
    """Two ConvolutionalLayer param tuples: (weight_hwio, gamma, beta, mean, var)."""
    mid = in_channels // 2
    layer_defs = [(in_channels, mid, 1), (mid, in_channels, 3)]
    params = []
    for cin, cout, k in layer_defs:
        key, kw, kg, kb, km, kv = jax.random.split(key, 6)
        fan_in = cin * k * k
        w = jax.random.normal(kw, (k, k, cin, cout), jnp.float32) / jnp.sqrt(float(fan_in))
        gamma = 1.0 + 0.1 * jax.random.normal(kg, (cout,), jnp.float32)
        beta = 0.1 * jax.random.normal(kb, (cout,), jnp.float32)
        rmean = 0.1 * jax.random.normal(km, (cout,), jnp.float32)
        rvar = jax.random.uniform(kv, (cout,), jnp.float32, minval=0.5, maxval=1.5)
        params.append((w, gamma, beta, rmean, rvar))
    return params


def residual_layer_ref(x_nchw, params):
    """Pure-JAX reference using the canonical mish formulation."""
    x = jnp.transpose(x_nchw, (0, 2, 3, 1))
    y = x
    dn = ("NHWC", "HWIO", "NHWC")
    for (w, g, b, m, v), k in zip(params, (1, 3)):
        pad = (k - 1) // 2
        y = lax.conv_general_dilated(y, w, (1, 1), [(pad, pad), (pad, pad)],
                                     dimension_numbers=dn)
        y = (y - m) / jnp.sqrt(v + BN_EPS) * g + b
        y = y * jnp.tanh(jnp.logaddexp(y, 0.0))   # x * tanh(softplus(x))
    return jnp.transpose(x + y, (0, 3, 1, 2))


# ----------------------------------- main ------------------------------------

if __name__ == "__main__":
    key = jax.random.PRNGKey(0)
    kx, kp = jax.random.split(key)

    in_channels = 16
    x = jax.random.normal(kx, (2, in_channels, 16, 16), jnp.float32)  # NCHW
    params = init_params(kp, in_channels)

    out = jax.block_until_ready(residual_layer(x, params))
    ref = jax.block_until_ready(residual_layer_ref(x, params))

    assert out.shape == x.shape, out.shape
    max_err = float(jnp.max(jnp.abs(out - ref)))
    assert jnp.allclose(out, ref, atol=2e-4, rtol=2e-4), max_err

    print("KERNEL_OK")
</pallas_src>

<mosaic_0001>
module attributes {stable_mosaic.version = 11 : i64} {
  func.func @_residual_block_kernel(%arg0: i32, %arg1: memref<1x16x16x16xf32, #tpu.memory_space<vmem>>, %arg2: memref<16x8xf32, #tpu.memory_space<vmem>>, %arg3: memref<1x8xf32, #tpu.memory_space<vmem>>, %arg4: memref<9x8x16xf32, #tpu.memory_space<vmem>>, %arg5: memref<1x16xf32, #tpu.memory_space<vmem>>, %arg6: memref<1x16x16x16xf32, #tpu.memory_space<vmem>>, %arg7: memref<18x18x8xf32, #tpu.memory_space<vmem>>) attributes {dimension_semantics = [#tpu.dimension_semantics<parallel>], iteration_bounds = array<i64: 2>, scalar_prefetch = 0 : i64, scratch_operands = 1 : i64, tpu.core_type = #tpu.core_type<tc>, window_params = [{transform_indices = @transform_0, window_bounds = array<i64: 1, 16, 16, 16>}, {pipeline_mode = #tpu.pipeline_mode<synchronous>, transform_indices = @transform_1, window_bounds = array<i64: 16, 8>}, {pipeline_mode = #tpu.pipeline_mode<synchronous>, transform_indices = @transform_2, window_bounds = array<i64: 1, 8>}, {pipeline_mode = #tpu.pipeline_mode<synchronous>, transform_indices = @transform_3, window_bounds = array<i64: 9, 8, 16>}, {pipeline_mode = #tpu.pipeline_mode<synchronous>, transform_indices = @transform_4, window_bounds = array<i64: 1, 16>}, {transform_indices = @transform_5, window_bounds = array<i64: 1, 16, 16, 16>}]} {
    %c0 = arith.constant 0 : index
    %c0_0 = arith.constant 0 : index
    %c0_1 = arith.constant 0 : index
    %c0_2 = arith.constant 0 : index
    %0 = vector.load %arg1[%c0, %c0_0, %c0_1, %c0_2] : memref<1x16x16x16xf32, #tpu.memory_space<vmem>>, vector<1x16x16x16xf32>
    %1 = vector.shape_cast %0 : vector<1x16x16x16xf32> to vector<16x16x16xf32>
    %2 = vector.shape_cast %1 : vector<16x16x16xf32> to vector<256x16xf32>
    %c0_3 = arith.constant 0 : index
    %c0_4 = arith.constant 0 : index
    %3 = vector.load %arg2[%c0_3, %c0_4] : memref<16x8xf32, #tpu.memory_space<vmem>>, vector<16x8xf32>
    %cst = arith.constant dense<0.000000e+00> : vector<256x8xf32>
    %4 = tpu.matmul %2, %3, %cst {dimension_numbers = #tpu.dot_dimension_numbers<[1], [0], [0], [1], [0, 0, 1, 1], [], []>} : vector<256x16xf32>, vector<16x8xf32>, vector<256x8xf32> -> vector<256x8xf32>
    %c0_5 = arith.constant 0 : index
    %c0_6 = arith.constant 0 : index
    %5 = vector.load %arg3[%c0_5, %c0_6] : memref<1x8xf32, #tpu.memory_space<vmem>>, vector<1x8xf32>
    %6 = vector.broadcast %5 : vector<1x8xf32> to vector<256x8xf32>
    %7 = arith.addf %4, %6 : vector<256x8xf32>
    %cst_7 = arith.constant 2.000000e+01 : f32
    %8 = vector.broadcast %cst_7 : f32 to vector<256x8xf32>
    %9 = arith.minimumf %7, %8 : vector<256x8xf32>
    %10 = math.exp %9 : vector<256x8xf32>
    %cst_8 = arith.constant 2.000000e+00 : f32
    %11 = vector.broadcast %cst_8 : f32 to vector<256x8xf32>
    %12 = arith.addf %10, %11 : vector<256x8xf32>
    %13 = arith.mulf %10, %12 : vector<256x8xf32>
    %cst_9 = arith.constant 2.000000e+00 : f32
    %14 = vector.broadcast %cst_9 : f32 to vector<256x8xf32>
    %15 = arith.addf %13, %14 : vector<256x8xf32>
    %16 = arith.divf %13, %15 : vector<256x8xf32>
    %17 = arith.mulf %7, %16 : vector<256x8xf32>
    %cst_10 = arith.constant 0.000000e+00 : f32
    %18 = vector.broadcast %cst_10 : f32 to vector<18x18x8xf32>
    %c0_11 = arith.constant 0 : index
    %c0_12 = arith.constant 0 : index
    %c0_13 = arith.constant 0 : index
    %19 = vector.load %arg7[%c0_11, %c0_12, %c0_13] : memref<18x18x8xf32, #tpu.memory_space<vmem>>, vector<18x18x8xf32>
    tpu.vector_store %arg7[%c0_11, %c0_12, %c0_13], %18 {strides = array<i32>} : memref<18x18x8xf32, #tpu.memory_space<vmem>>, vector<18x18x8xf32>,
    %20 = vector.shape_cast %17 : vector<256x8xf32> to vector<16x16x8xf32>
    %c1 = arith.constant 1 : index
    %c1_14 = arith.constant 1 : index
    %c0_15 = arith.constant 0 : index
    %21 = vector.load %arg7[%c1, %c1_14, %c0_15] : memref<18x18x8xf32, #tpu.memory_space<vmem>>, vector<16x16x8xf32>
    tpu.vector_store %arg7[%c1, %c1_14, %c0_15], %20 {strides = array<i32>} : memref<18x18x8xf32, #tpu.memory_space<vmem>>, vector<16x16x8xf32>,
    %c0_16 = arith.constant 0 : index
    %c0_17 = arith.constant 0 : index
    %c0_18 = arith.constant 0 : index
    %22 = vector.load %arg7[%c0_16, %c0_17, %c0_18] : memref<18x18x8xf32, #tpu.memory_space<vmem>>, vector<16x16x8xf32>
    %23 = vector.shape_cast %22 : vector<16x16x8xf32> to vector<256x8xf32>
    %c0_19 = arith.constant 0 : index
    %c0_20 = arith.constant 0 : index
    %c0_21 = arith.constant 0 : index
    %24 = vector.load %arg4[%c0_19, %c0_20, %c0_21] : memref<9x8x16xf32, #tpu.memory_space<vmem>>, vector<1x8x16xf32>
    %25 = vector.shape_cast %24 : vector<1x8x16xf32> to vector<8x16xf32>
    %cst_22 = arith.constant dense<0.000000e+00> : vector<256x16xf32>
    %26 = tpu.matmul %23, %25, %cst_22 {dimension_numbers = #tpu.dot_dimension_numbers<[1], [0], [0], [1], [0, 0, 1, 1], [], []>} : vector<256x8xf32>, vector<8x16xf32>, vector<256x16xf32> -> vector<256x16xf32>
    %c0_23 = arith.constant 0 : index
    %c1_24 = arith.constant 1 : index
    %c0_25 = arith.constant 0 : index
    %27 = vector.load %arg7[%c0_23, %c1_24, %c0_25] : memref<18x18x8xf32, #tpu.memory_space<vmem>>, vector<16x16x8xf32>
    %28 = vector.shape_cast %27 : vector<16x16x8xf32> to vector<256x8xf32>
    %c1_26 = arith.constant 1 : index
    %c0_27 = arith.constant 0 : index
    %c0_28 = arith.constant 0 : index
    %29 = vector.load %arg4[%c1_26, %c0_27, %c0_28] : memref<9x8x16xf32, #tpu.memory_space<vmem>>, vector<1x8x16xf32>
    %30 = vector.shape_cast %29 : vector<1x8x16xf32> to vector<8x16xf32>
    %cst_29 = arith.constant dense<0.000000e+00> : vector<256x16xf32>
    %31 = tpu.matmul %28, %30, %cst_29 {dimension_numbers = #tpu.dot_dimension_numbers<[1], [0], [0], [1], [0, 0, 1, 1], [], []>} : vector<256x8xf32>, vector<8x16xf32>, vector<256x16xf32> -> vector<256x16xf32>
    %32 = arith.addf %26, %31 : vector<256x16xf32>
    %c0_30 = arith.constant 0 : index
    %c2 = arith.constant 2 : index
    %c0_31 = arith.constant 0 : index
    %33 = vector.load %arg7[%c0_30, %c2, %c0_31] : memref<18x18x8xf32, #tpu.memory_space<vmem>>, vector<16x16x8xf32>
    %34 = vector.shape_cast %33 : vector<16x16x8xf32> to vector<256x8xf32>
    %c2_32 = arith.constant 2 : index
    %c0_33 = arith.constant 0 : index
    %c0_34 = arith.constant 0 : index
    %35 = vector.load %arg4[%c2_32, %c0_33, %c0_34] : memref<9x8x16xf32, #tpu.memory_space<vmem>>, vector<1x8x16xf32>
    %36 = vector.shape_cast %35 : vector<1x8x16xf32> to vector<8x16xf32>
    %cst_35 = arith.constant dense<0.000000e+00> : vector<256x16xf32>
    %37 = tpu.matmul %34, %36, %cst_35 {dimension_numbers = #tpu.dot_dimension_numbers<[1], [0], [0], [1], [0, 0, 1, 1], [], []>} : vector<256x8xf32>, vector<8x16xf32>, vector<256x16xf32> -> vector<256x16xf32>
    %38 = arith.addf %32, %37 : vector<256x16xf32>
    %c1_36 = arith.constant 1 : index
    %c0_37 = arith.constant 0 : index
    %c0_38 = arith.constant 0 : index
    %39 = vector.load %arg7[%c1_36, %c0_37, %c0_38] : memref<18x18x8xf32, #tpu.memory_space<vmem>>, vector<16x16x8xf32>
    %40 = vector.shape_cast %39 : vector<16x16x8xf32> to vector<256x8xf32>
    %c3 = arith.constant 3 : index
    %c0_39 = arith.constant 0 : index
    %c0_40 = arith.constant 0 : index
    %41 = vector.load %arg4[%c3, %c0_39, %c0_40] : memref<9x8x16xf32, #tpu.memory_space<vmem>>, vector<1x8x16xf32>
    %42 = vector.shape_cast %41 : vector<1x8x16xf32> to vector<8x16xf32>
    %cst_41 = arith.constant dense<0.000000e+00> : vector<256x16xf32>
    %43 = tpu.matmul %40, %42, %cst_41 {dimension_numbers = #tpu.dot_dimension_numbers<[1], [0], [0], [1], [0, 0, 1, 1], [], []>} : vector<256x8xf32>, vector<8x16xf32>, vector<256x16xf32> -> vector<256x16xf32>
    %44 = arith.addf %38, %43 : vector<256x16xf32>
    %c1_42 = arith.constant 1 : index
    %c1_43 = arith.constant 1 : index
    %c0_44 = arith.constant 0 : index
    %45 = vector.load %arg7[%c1_42, %c1_43, %c0_44] : memref<18x18x8xf32, #tpu.memory_space<vmem>>, vector<16x16x8xf32>
    %46 = vector.shape_cast %45 : vector<16x16x8xf32> to vector<256x8xf32>
    %c4 = arith.constant 4 : index
    %c0_45 = arith.constant 0 : index
    %c0_46 = arith.constant 0 : index
    %47 = vector.load %arg4[%c4, %c0_45, %c0_46] : memref<9x8x16xf32, #tpu.memory_space<vmem>>, vector<1x8x16xf32>
    %48 = vector.shape_cast %47 : vector<1x8x16xf32> to vector<8x16xf32>
    %cst_47 = arith.constant dense<0.000000e+00> : vector<256x16xf32>
    %49 = tpu.matmul %46, %48, %cst_47 {dimension_numbers = #tpu.dot_dimension_numbers<[1], [0], [0], [1], [0, 0, 1, 1], [], []>} : vector<256x8xf32>, vector<8x16xf32>, vector<256x16xf32> -> vector<256x16xf32>
    %50 = arith.addf %44, %49 : vector<256x16xf32>
    %c1_48 = arith.constant 1 : index
    %c2_49 = arith.constant 2 : index
    %c0_50 = arith.constant 0 : index
    %51 = vector.load %arg7[%c1_48, %c2_49, %c0_50] : memref<18x18x8xf32, #tpu.memory_space<vmem>>, vector<16x16x8xf32>
    %52 = vector.shape_cast %51 : vector<16x16x8xf32> to vector<256x8xf32>
    %c5 = arith.constant 5 : index
    %c0_51 = arith.constant 0 : index
    %c0_52 = arith.constant 0 : index
    %53 = vector.load %arg4[%c5, %c0_51, %c0_52] : memref<9x8x16xf32, #tpu.memory_space<vmem>>, vector<1x8x16xf32>
    %54 = vector.shape_cast %53 : vector<1x8x16xf32> to vector<8x16xf32>
    %cst_53 = arith.constant dense<0.000000e+00> : vector<256x16xf32>
    %55 = tpu.matmul %52, %54, %cst_53 {dimension_numbers = #tpu.dot_dimension_numbers<[1], [0], [0], [1], [0, 0, 1, 1], [], []>} : vector<256x8xf32>, vector<8x16xf32>, vector<256x16xf32> -> vector<256x16xf32>
    %56 = arith.addf %50, %55 : vector<256x16xf32>
    %c2_54 = arith.constant 2 : index
    %c0_55 = arith.constant 0 : index
    %c0_56 = arith.constant 0 : index
    %57 = vector.load %arg7[%c2_54, %c0_55, %c0_56] : memref<18x18x8xf32, #tpu.memory_space<vmem>>, vector<16x16x8xf32>
    %58 = vector.shape_cast %57 : vector<16x16x8xf32> to vector<256x8xf32>
    %c6 = arith.constant 6 : index
    %c0_57 = arith.constant 0 : index
    %c0_58 = arith.constant 0 : index
    %59 = vector.load %arg4[%c6, %c0_57, %c0_58] : memref<9x8x16xf32, #tpu.memory_space<vmem>>, vector<1x8x16xf32>
    %60 = vector.shape_cast %59 : vector<1x8x16xf32> to vector<8x16xf32>
    %cst_59 = arith.constant dense<0.000000e+00> : vector<256x16xf32>
    %61 = tpu.matmul %58, %60, %cst_59 {dimension_numbers = #tpu.dot_dimension_numbers<[1], [0], [0], [1], [0, 0, 1, 1], [], []>} : vector<256x8xf32>, vector<8x16xf32>, vector<256x16xf32> -> vector<256x16xf32>
    %62 = arith.addf %56, %61 : vector<256x16xf32>
    %c2_60 = arith.constant 2 : index
    %c1_61 = arith.constant 1 : index
    %c0_62 = arith.constant 0 : index
    %63 = vector.load %arg7[%c2_60, %c1_61, %c0_62] : memref<18x18x8xf32, #tpu.memory_space<vmem>>, vector<16x16x8xf32>
    %64 = vector.shape_cast %63 : vector<16x16x8xf32> to vector<256x8xf32>
    %c7 = arith.constant 7 : index
    %c0_63 = arith.constant 0 : index
    %c0_64 = arith.constant 0 : index
    %65 = vector.load %arg4[%c7, %c0_63, %c0_64] : memref<9x8x16xf32, #tpu.memory_space<vmem>>, vector<1x8x16xf32>
    %66 = vector.shape_cast %65 : vector<1x8x16xf32> to vector<8x16xf32>
    %cst_65 = arith.constant dense<0.000000e+00> : vector<256x16xf32>
    %67 = tpu.matmul %64, %66, %cst_65 {dimension_numbers = #tpu.dot_dimension_numbers<[1], [0], [0], [1], [0, 0, 1, 1], [], []>} : vector<256x8xf32>, vector<8x16xf32>, vector<256x16xf32> -> vector<256x16xf32>
    %68 = arith.addf %62, %67 : vector<256x16xf32>
    %c2_66 = arith.constant 2 : index
    %c2_67 = arith.constant 2 : index
    %c0_68 = arith.constant 0 : index
    %69 = vector.load %arg7[%c2_66, %c2_67, %c0_68] : memref<18x18x8xf32, #tpu.memory_space<vmem>>, vector<16x16x8xf32>
    %70 = vector.shape_cast %69 : vector<16x16x8xf32> to vector<256x8xf32>
    %c8 = arith.constant 8 : index
    %c0_69 = arith.constant 0 : index
    %c0_70 = arith.constant 0 : index
    %71 = vector.load %arg4[%c8, %c0_69, %c0_70] : memref<9x8x16xf32, #tpu.memory_space<vmem>>, vector<1x8x16xf32>
    %72 = vector.shape_cast %71 : vector<1x8x16xf32> to vector<8x16xf32>
    %cst_71 = arith.constant dense<0.000000e+00> : vector<256x16xf32>
    %73 = tpu.matmul %70, %72, %cst_71 {dimension_numbers = #tpu.dot_dimension_numbers<[1], [0], [0], [1], [0, 0, 1, 1], [], []>} : vector<256x8xf32>, vector<8x16xf32>, vector<256x16xf32> -> vector<256x16xf32>
    %74 = arith.addf %68, %73 : vector<256x16xf32>
    %c0_72 = arith.constant 0 : index
    %c0_73 = arith.constant 0 : index
    %75 = vector.load %arg5[%c0_72, %c0_73] : memref<1x16xf32, #tpu.memory_space<vmem>>, vector<1x16xf32>
    %76 = vector.broadcast %75 : vector<1x16xf32> to vector<256x16xf32>
    %77 = arith.addf %74, %76 : vector<256x16xf32>
    %cst_74 = arith.constant 2.000000e+01 : f32
    %78 = vector.broadcast %cst_74 : f32 to vector<256x16xf32>
    %79 = arith.minimumf %77, %78 : vector<256x16xf32>
    %80 = math.exp %79 : vector<256x16xf32>
    %cst_75 = arith.constant 2.000000e+00 : f32
    %81 = vector.broadcast %cst_75 : f32 to vector<256x16xf32>
    %82 = arith.addf %80, %81 : vector<256x16xf32>
    %83 = arith.mulf %80, %82 : vector<256x16xf32>
    %cst_76 = arith.constant 2.000000e+00 : f32
    %84 = vector.broadcast %cst_76 : f32 to vector<256x16xf32>
    %85 = arith.addf %83, %84 : vector<256x16xf32>
    %86 = arith.divf %83, %85 : vector<256x16xf32>
    %87 = arith.mulf %77, %86 : vector<256x16xf32>
    %88 = arith.addf %2, %87 : vector<256x16xf32>
    %89 = vector.shape_cast %88 : vector<256x16xf32> to vector<1x16x16x16xf32>
    %c0_77 = arith.constant 0 : index
    %c0_78 = arith.constant 0 : index
    %c0_79 = arith.constant 0 : index
    %c0_80 = arith.constant 0 : index
    %90 = vector.load %arg6[%c0_77, %c0_78, %c0_79, %c0_80] : memref<1x16x16x16xf32, #tpu.memory_space<vmem>>, vector<1x16x16x16xf32>
    tpu.vector_store %arg6[%c0_77, %c0_78, %c0_79, %c0_80], %89 {strides = array<i32>} : memref<1x16x16x16xf32, #tpu.memory_space<vmem>>, vector<1x16x16x16xf32>,
    return
  }
  func.func @transform_0(%arg0: i32) -> (i32, i32, i32, i32) {
    %c0_i32 = arith.constant 0 : i32
    %c0_i32_0 = arith.constant 0 : i32
    %c0_i32_1 = arith.constant 0 : i32
    %c0_i32_2 = arith.constant 0 : i32
    return %arg0, %c0_i32, %c0_i32_0, %c0_i32_1 : i32, i32, i32, i32
  }
  func.func @transform_1(%arg0: i32) -> (i32, i32) {
    %c0_i32 = arith.constant 0 : i32
    %c0_i32_0 = arith.constant 0 : i32
    %c0_i32_1 = arith.constant 0 : i32
    return %c0_i32, %c0_i32_0 : i32, i32
  }
  func.func @transform_2(%arg0: i32) -> (i32, i32) {
    %c0_i32 = arith.constant 0 : i32
    %c0_i32_0 = arith.constant 0 : i32
    %c0_i32_1 = arith.constant 0 : i32
    return %c0_i32, %c0_i32_0 : i32, i32
  }
  func.func @transform_3(%arg0: i32) -> (i32, i32, i32) {
    %c0_i32 = arith.constant 0 : i32
    %c0_i32_0 = arith.constant 0 : i32
    %c0_i32_1 = arith.constant 0 : i32
    %c0_i32_2 = arith.constant 0 : i32
    return %c0_i32, %c0_i32_0, %c0_i32_1 : i32, i32, i32
  }
  func.func @transform_4(%arg0: i32) -> (i32, i32) {
    %c0_i32 = arith.constant 0 : i32
    %c0_i32_0 = arith.constant 0 : i32
    %c0_i32_1 = arith.constant 0 : i32
    return %c0_i32, %c0_i32_0 : i32, i32
  }
  func.func @transform_5(%arg0: i32) -> (i32, i32, i32, i32) {
    %c0_i32 = arith.constant 0 : i32
    %c0_i32_0 = arith.constant 0 : i32
    %c0_i32_1 = arith.constant 0 : i32
    %c0_i32_2 = arith.constant 0 : i32
    return %arg0, %c0_i32, %c0_i32_0, %c0_i32_1 : i32, i32, i32, i32
  }
}

</mosaic_0001>

<bundles_post_ra>
// kernel: tpu_custom_call.1
= control target key start
LH: loop header
LB: loop body
LE: loop exit
PB: predicated region body
PF: predicated region fallthrough
CT: control target
= control target key end

     0   :  { %10 = vsyncpa [#allocation4], 0  ;;  %s8782_s0 = inlined_call_operand.hbm [shape: f32[2,16,16,16], index: 0, kind: input, shape index: {}]   ;;  %s8783_s1 = inlined_call_operand.vmem [shape: f32[16,8], index: 1, kind: input, shape index: {}]   ;;  %s8784_s2 = inlined_call_operand.vmem [shape: f32[1,8], index: 2, kind: input, shape index: {}]   ;;  %s8785_s3 = inlined_call_operand.hbm [shape: f32[9,8,16], index: 3, kind: input, shape index: {}]   ;;  %s8786_s4 = inlined_call_operand.vmem [shape: f32[1,16], index: 4, kind: input, shape index: {}]   ;;  %s8787_s5 = inlined_call_operand.hbm [shape: f32[2,16,16,16], index: 5, kind: output, shape index: {}]  }
   0x1   :  { %12 = vsyncpa [#allocation4 + $0x1], 0 }
   0x2   :  { %13 = vsyncpa [#allocation7], 0 }
   0x3   :  { %14 = vsyncpa [#allocation5], 0 }
   0x4   :  { %16 = vsyncpa [#allocation5 + $0x1], 0  ;;  %s6858_s18 = smov 0   ;;  %s6860_s19 = smov 0  }
   0x5   :  { %s6862_s20 = smov 0   ;;  %s6864_s21 = smov 0  }
   0x6 LB: > { %s6879_s22 = sadd.s32 4294967295, %s6818_s21   ;;  %s4905_s23 = sadd.s32 4294967294, %s6818_s21   ;;  %s6818_s21 = sphi %s6864_s21, %s8906_s21   ;;  %s6814_s20 = sphi %s6862_s20, %s8905_s20   ;;  %s6810_s19 = sphi %s6860_s19, %s8904_s19   ;;  %s6806_s18 = sphi %s6858_s18, %s8903_s18  }
   0x7   : > { %p42_p0 = scmp.ne.s32.totalorder %s6810_s19, %s6806_s18  ;;  %p8788_p1 = scmp.eq.s32.totalorder %s6879_s22, 0 }
   0x8   : > { %p156_p3 = scmp.eq.s32.totalorder %s4905_s23, 1  ;;  %p4906_p5 = scmp.ge.s32.totalorder %s6818_s21, 1 }
   0x9   : > { %p6888_p4 = por %p8788_p1, %p42_p0  ;;  %p163_p7 = scmp.lt.s32.totalorder %s6818_s21, 3 }
   0xa   : > { %p6893_p6 = por %p156_p3, %p42_p0  ;;  %s6820_s27 = smov [#allocation6]  }
   0xb   : > { %s8824_s24 = scalar_select %p6888_p4, 1, 0 }
   0xc   : > { %s8825_s25 = scalar_select %p6893_p6, 1, 0 }
   0xd   : > { %p6898_p8 = pnand %p4906_p5, %p163_p7  ;;  %s181_s28 = sshll.u32 %s6820_s27, 4  ;;  %s6902_s28 = int_to_ptr.vmem [resolvable:$true] %s181_s28 }
   0xe   : > { %s6914_s30 = sadd.s32 1, %s6818_s21   ;;  %s29_s6 = sadd.s32 1, %s6814_s20 }
   0xf   : > { %s8826_s26 = scalar_select %p6898_p8, 1, 0 }
  0x10   : > { %p6346_p9 = pneg %p6898_p8  ;;  %s26_s7 = ssub.s32 %s6818_s21, %s6914_s30 }
  0x11   : > { %s6690_s10 = scalar_lea.hbm %s8785_s3, 1152 }
  0x12   : > { %p6909_p11 = pnand %p6346_p9, %p8788_p1  ;;  %p6691_p12 = scmp.ne.s32.totalorder %s8785_s3, %s6690_s10 }
  0x13   : > { %p6697_p5 = scmp.lt.u32.totalorder %s6690_s10, %s8785_s3 }
  0x14   : > { %p6692_p13 = pneg %p6909_p11 }
  0x16   : > { %p6693_p0 = pnand %p6692_p13, %p6691_p12 }
  0x18   : > { %p6694_p3 = pneg %p6693_p0 }
  0x1a   : > { %p6699_p7 = pnand %p6697_p5, %p6694_p3 }
  0x1c   : > { %6702 = shalt.err (!%p6699_p7)
}
  0x1d   : > { %s6703_s15 = scalar_lea.vmem %s6902_s28, 1152  ;;  %p6711_p2 = scmp.lt.s32.totalorder %s6902_s28, %s6902_s28 }
  0x1e   : > { %p6704_p9 = scmp.ne.s32.totalorder %s6902_s28, %s6703_s15  ;;  %p6712_p6 = scmp.lt.s32.totalorder %s6703_s15, %s6703_s15 }
  0x20   : > { %p6706_p10 = pnand %p6704_p9, %p6692_p13  ;;  %p6713_p4 = por %p6712_p6, %p6711_p2 }
  0x22   : > { %p6707_p1 = pneg %p6706_p10 }
  0x24   : > { %p6714_p8 = pnand %p6713_p4, %p6707_p1 }
  0x26   : > { %6717 = shalt.err (!%p6714_p8)
}
  0x27   : > { %s6821_s16 = smov 128   ;;  %s6822_s17 = smov 8  }
  0x28   : > { %6349 = dma.hbm_to_vmem [thread:$0]  (!%p6909_p11), %s8785_s3, 1152, %s6902_s28, [#allocation7], %s6821_s16, %s6821_s16, %s6822_s17  }
  0x29   : > { %p27_p1 = scmp.eq.s32.totalorder %s26_s7, 0  ;;  %p36_p2 = scmp.ne.s32.totalorder %s6814_s20, %s6810_s19 }
  0x2a   : > { %p37_p4 = scmp.eq.s32.totalorder %s6818_s21, 0  ;;  %p6359_p6 = scmp.lt.s32.totalorder %s6818_s21, 2 }
  0x2b   : > { %s6948_s8 = scalar_select %p27_p1, %s6814_s20, %s29_s6  }
  0x2c   : > { %p38_p8 = por %p37_p4, %p36_p2  ;;  %p8828_p10 = scmp.eq.s32.totalorder %s6879_s22, 1 }
  0x2d   : > { %s198_s29 = sand.u32 1, %s6814_s20   ;;  %s5243_s10 = sshll.u32 %s6818_s21, 12 }
  0x2e   : > { %p6952_p12 = por %p8828_p10, %p36_p2  ;;  %s4909_s11 = sshll.u32 %s198_s29, 8 }
  0x2f   : > { %s6961_s14 = scalar_lea.hbm %s8782_s0, %s5243_s10  ;;  %s202_s28 = scalar_lea.vmem [#allocation3], %s4909_s11 }
  0x30   : > { %s209_s6 = sshll.u32 %s202_s28, 4  ;;  %p6963_p11 = pnand %p6359_p6, %p38_p8  ;;  %s6967_s6 = int_to_ptr.vmem [resolvable:$true] %s209_s6 }
  0x31   : > { %s6969_s15 = scalar_lea.sflag [#allocation4], %s198_s29  ;;  %s6718_s23 = scalar_lea.hbm %s6961_s14, 4096 }
  0x32   : > { %p6719_p13 = scmp.ne.s32.totalorder %s6961_s14, %s6718_s23  ;;  %p6720_p0 = pneg %p6963_p11 }
  0x33   : > { %s6723_s11 = scalar_lea.hbm %s8782_s0, 8192  ;;  %p6724_p7 = scmp.lt.u32.totalorder %s6961_s14, %s8782_s0 }
  0x34   : > { %p6721_p3 = pnand %p6720_p0, %p6719_p13  ;;  %p6725_p9 = scmp.lt.u32.totalorder %s6723_s11, %s6718_s23 }
  0x35   : > { %p6727_p2 = scmp.lt.u32.totalorder %s6718_s23, %s6961_s14 }
  0x36   : > { %p6722_p5 = pneg %p6721_p3  ;;  %p6726_p1 = por %p6725_p9, %p6724_p7 }
  0x38   : > { %p6728_p4 = por %p6727_p2, %p6726_p1 }
  0x3a   : > { %p6729_p6 = pnand %p6728_p4, %p6722_p5 }
  0x3c   : > { %6732 = shalt.err (!%p6729_p6)
}
  0x3d   : > { %s6733_s29 = scalar_lea.vmem %s6967_s6, 4096  ;;  %s6823_s28 = smov [#allocation3]  }
  0x3e   : > { %p6734_p8 = scmp.ne.s32.totalorder %s6967_s6, %s6733_s29  ;;  %s6738_s27 = sshll.u32 %s6823_s28, 4  ;;  %s6739_s27 = int_to_ptr.vmem [resolvable:$false] %s6738_s27 }
  0x3f   : > { %s6740_s10 = scalar_lea.vmem %s6739_s27, 8192  ;;  %p6741_p3 = scmp.lt.s32.totalorder %s6967_s6, %s6739_s27 }
  0x40   : > { %p6736_p10 = pnand %p6734_p8, %p6720_p0  ;;  %p6742_p7 = scmp.lt.s32.totalorder %s6740_s10, %s6733_s29 }
  0x42   : > { %p6737_p13 = pneg %p6736_p10  ;;  %p6743_p9 = por %p6742_p7, %p6741_p3 }
  0x44   : > { %p6744_p1 = pnand %p6743_p9, %p6737_p13 }
  0x46   : > { %6747 = shalt.err (!%p6744_p1)
}
  0x47   : > { %6353 = dma.hbm_to_vmem [thread:$0]  (!%p6963_p11), %s6961_s14, 4096, %s6967_s6, %s6969_s15, %s6821_s16, %s6821_s16, %s6822_s17  }
  0x48   : > { %p8831_p0 = scmp.ne.s32.totalorder %s8826_s26, 0 }
  0x4a   : > { %221 = sbr.rel (%p8831_p0) target bundleno = 975 (0x3cf), region = 40 }
  0x51   : > { %s7003_s23 = sand.u32 1, %s6810_s19   ;;  %p8832_p5 = scmp.ne.s32.totalorder %s8824_s24, 0 }
  0x52   : > { %s4913_s11 = sshll.u32 %s7003_s23, 8  ;;  %s224_s12 = scalar_lea.sflag [#allocation4], %s7003_s23 }
  0x53   : > { %s7009_s7 = scalar_lea.vmem [#allocation3], %s4913_s11 }
  0x54   : > { %6793 = dma.done.wait (%p8832_p5), %s224_s12, 4096  }
  0x55   : > { %6795 = vsyncadd (%p8832_p5), %s224_s12, 4294963200  ;;  %p8833_p11 = scmp.eq.s32.totalorder %s6879_s22, 0 }
  0x57   : > { %6797 = dma.done.wait (%p8833_p11), [#allocation7], 1152   ;;  %p8834_p2 = pmov %p8833_p11 }
  0x58   : > { %vm299_vm0 = vcmask 130048   ;;  %v290_v0 = vld [vmem:[%s8783_s1] sm:$0xff]  ;;  %v291_v1 = vld [vmem:[%s8783_s1 + $0x8] sm:$0xff]  ;;  %v258_v2 = vld [vmem:[%s7009_s7] sm:$0xff]  ;;  %vm909_vm1 = vcmask 64512   ;;  %vm912_vm2 = vcmask 58368  }
  0x59   : > { %6799 = vsyncadd (%p8834_p2), [#allocation7], 4294966144  ;;  %v6078_v3 = vpack.c.bf16 %v291_v1, %v290_v0  ;;  %5580 = vmatprep.mubr.msk.f32.mxu0 %vm299_vm0, %v258_v2  ;;  %v259_v4 = vld [vmem:[%s7009_s7 + $0x8] sm:$0xff]  ;;  %v260_v5 = vld [vmem:[%s7009_s7 + $0x10] sm:$0xff]  ;;  %v6824_v35 = vmov 0.0   ;;  %s8427_s29 = scalar_lea.vmem [#allocation8], %s4913_s11 }
  0x5a   : > { %v261_v6 = vld [vmem:[%s7009_s7 + $0x18] sm:$0xff]  ;;  %v262_v7 = vld [vmem:[%s7009_s7 + $0x20] sm:$0xff]  ;;  %v263_v8 = vld [vmem:[%s7009_s7 + $0x28] sm:$0xff]  ;;  %915 = vst.msk [vmem:[#allocation2 + $0x20] sm:$0xff] %vm909_vm1, %v6824_v35  ;;  %s5244_s28 = sshll.u32 %s6879_s22, 12  ;;  %s4822_s27 = sshll.u32 %s8427_s29, 4  ;;  %s8733_s27 = int_to_ptr.vmem [resolvable:$true] %s4822_s27 }
  0x5b   : > { %6079 = vmatprep.subr.bf16.mxu0 %v6078_v3  ;;  %v264_v9 = vld [vmem:[%s7009_s7 + $0x30] sm:$0xff]  ;;  %v265_v10 = vld [vmem:[%s7009_s7 + $0x38] sm:$0xff]  ;;  %v266_v11 = vld [vmem:[%s7009_s7 + $0x40] sm:$0xff]  ;;  %910 = vst.msk [vmem:[#allocation2] sm:$0xff] %vm909_vm1, %v6824_v35  ;;  %s8731_s12 = scalar_lea.hbm %s8787_s5, %s5244_s28  ;;  %s4809_s22 = scalar_lea.sflag [#allocation5], %s7003_s23 }
  0x5c   : > { %6081 = vmatpush3.bf16.msra.mxu0 %v6078_v3  ;;  %v267_v12 = vld [vmem:[%s7009_s7 + $0x48] sm:$0xff]  ;;  %v268_v13 = vld [vmem:[%s7009_s7 + $0x50] sm:$0xff]  ;;  %v269_v14 = vld [vmem:[%s7009_s7 + $0x58] sm:$0xff]  ;;  %911 = vst.msk [vmem:[#allocation2 + $0x8] sm:$0xff] %vm909_vm1, %v6824_v35  ;;  %s6748_s26 = scalar_lea.vmem %s8733_s27, 4096  ;;  %s6825_s16 = smov [#allocation8]  }
  0x5d   : > { %v270_v15 = vld [vmem:[%s7009_s7 + $0x60] sm:$0xff]  ;;  %v271_v16 = vld [vmem:[%s7009_s7 + $0x68] sm:$0xff]  ;;  %v272_v17 = vld [vmem:[%s7009_s7 + $0x70] sm:$0xff]  ;;  %914 = vst.msk [vmem:[#allocation2 + $0x18] sm:$0xff] %vm909_vm1, %v6824_v35  ;;  %p6749_p4 = scmp.ne.s32.totalorder %s8733_s27, %s6748_s26  ;;  %s6752_s17 = sshll.u32 %s6825_s16, 4  ;;  %s6753_s17 = int_to_ptr.vmem [resolvable:$false] %s6752_s17 }
  0x5e   : > { %v273_v18 = vld [vmem:[%s7009_s7 + $0x78] sm:$0xff]  ;;  %v274_v19 = vld [vmem:[%s7009_s7 + $0x80] sm:$0xff]  ;;  %v275_v20 = vld [vmem:[%s7009_s7 + $0x88] sm:$0xff]  ;;  %917 = vst.msk [vmem:[#allocation2 + $0x30] sm:$0xff] %vm909_vm1, %v6824_v35  ;;  %s6754_s24 = scalar_lea.vmem %s6753_s17, 8192  ;;  %p6755_p10 = scmp.lt.s32.totalorder %s8733_s27, %s6753_s17 }
  0x5f   : > { %5581 = vmatmul.mubr.msk.f32.vlgmr.msra.gmra.mrb[0].mxu0 %vm299_vm0, %v259_v4  ;;  %v276_v21 = vld [vmem:[%s7009_s7 + $0x90] sm:$0xff]  ;;  %v277_v22 = vld [vmem:[%s7009_s7 + $0x98] sm:$0xff]  ;;  %v278_v23 = vld [vmem:[%s7009_s7 + $0xa0] sm:$0xff]  ;;  %918 = vst.msk [vmem:[#allocation2 + $0x38] sm:$0xff] %vm909_vm1, %v6824_v35  ;;  %p6750_p6 = pnand %p6749_p4, %p6952_p12  ;;  %p6756_p13 = scmp.lt.s32.totalorder %s6754_s24, %s6748_s26 }
  0x60   : > { %5583 = vmatprep.mubr.msk.f32.mxu0 %vm299_vm0, %v260_v5  ;;  %v279_v24 = vld [vmem:[%s7009_s7 + $0xa8] sm:$0xff]  ;;  %v280_v25 = vld [vmem:[%s7009_s7 + $0xb0] sm:$0xff]  ;;  %v281_v26 = vld [vmem:[%s7009_s7 + $0xb8] sm:$0xff]  ;;  %920 = vst.msk [vmem:[#allocation2 + $0x48] sm:$0xff] %vm909_vm1, %v6824_v35 }
  0x61   : > { %v282_v27 = vld [vmem:[%s7009_s7 + $0xc0] sm:$0xff]  ;;  %v283_v28 = vld [vmem:[%s7009_s7 + $0xc8] sm:$0xff]  ;;  %v284_v29 = vld [vmem:[%s7009_s7 + $0xd0] sm:$0xff]  ;;  %921 = vst.msk [vmem:[#allocation2 + $0x50] sm:$0xff] %vm909_vm1, %v6824_v35  ;;  %p6751_p8 = pneg %p6750_p6  ;;  %p6757_p3 = por %p6756_p13, %p6755_p10 }
  0x62   : > { %v285_v30 = vld [vmem:[%s7009_s7 + $0xd8] sm:$0xff]  ;;  %v286_v31 = vld [vmem:[%s7009_s7 + $0xe0] sm:$0xff]  ;;  %v287_v32 = vld [vmem:[%s7009_s7 + $0xe8] sm:$0xff]  ;;  %923 = vst.msk [vmem:[#allocation2 + $0x60] sm:$0xff] %vm909_vm1, %v6824_v35 }
  0x63   : > { %5584 = vmatmul.mubr.msk.f32.gmra.mrb[2].mxu0 %vm299_vm0, %v261_v6  ;;  %v288_v33 = vld [vmem:[%s7009_s7 + $0xf0] sm:$0xff]  ;;  %v289_v34 = vld [vmem:[%s7009_s7 + $0xf8] sm:$0xff]  ;;  %924 = vst.msk [vmem:[#allocation2 + $0x68] sm:$0xff] %vm909_vm1, %v6824_v35  ;;  %926 = vst.msk [vmem:[#allocation2 + $0x78] sm:$0xff] %vm909_vm1, %v6824_v35  ;;  %p6758_p7 = pnand %p6757_p3, %p6751_p8 }
  0x64   : > { %5586 = vmatprep.mubr.msk.f32.mxu0 %vm299_vm0, %v262_v7  ;;  %927 = vst.msk [vmem:[#allocation2 + $0x80] sm:$0xff] %vm909_vm1, %v6824_v35  ;;  %929 = vst.msk [vmem:[#allocation2 + $0x90] sm:$0xff] %vm909_vm1, %v6824_v35  ;;  %v1064_v36 = vld [vmem:[#allocation6 + $0x8] sm:$0xff]  ;;  %v1031_v37 = vld [vmem:[#allocation2 + $0x1] sm:$0xff] }
  0x65   : > { %930 = vst.msk [vmem:[#allocation2 + $0x98] sm:$0xff] %vm909_vm1, %v6824_v35  ;;  %932 = vst.msk [vmem:[#allocation2 + $0xa8] sm:$0xff] %vm909_vm1, %v6824_v35  ;;  %5628 = vmatprep.subr.mxu0 %v1064_v36  ;;  %v2514_v39 = vld [vmem:[#allocation6 + $0x20] sm:$0xff]  ;;  %v7145_v40 = vld [vmem:[#allocation6 + $0x28] sm:$0xff] }
  0x66   : > { %933 = vst.msk [vmem:[#allocation2 + $0xb0] sm:$0xff] %vm909_vm1, %v6824_v35  ;;  %935 = vst.msk [vmem:[#allocation2 + $0xc0] sm:$0xff] %vm909_vm1, %v6824_v35  ;;  %5629 = vmatpush3.msra.mxu0 %v1064_v36  ;;  %5828 = vmatprep.subr.mxu1 %v2514_v39  ;;  %v1030_v41 = vld [vmem:[#allocation6] sm:$0xff]  ;;  %v7151_v42 = vld [vmem:[%s8784_s2] ss:$0 sm:$0xff] }
  0x67   : > { %5587 = vmatmul.mubr.msk.f32.gmra.mrb[4].mxu0 %vm299_vm0, %v263_v8  ;;  %936 = vst.msk [vmem:[#allocation2 + $0xc8] sm:$0xff] %vm909_vm1, %v6824_v35  ;;  %938 = vst.msk [vmem:[#allocation2 + $0xd8] sm:$0xff] %vm909_vm1, %v6824_v35  ;;  %5829 = vmatpush3.msra.mxu1 %v2514_v39 }
  0x68   : > { %5589 = vmatprep.mubr.msk.f32.mxu0 %vm299_vm0, %v264_v9  ;;  %939 = vst.msk [vmem:[#allocation2 + $0xe0] sm:$0xff] %vm909_vm1, %v6824_v35  ;;  %941 = vst.msk [vmem:[#allocation2 + $0xf0] sm:$0xff] %vm909_vm1, %v6824_v35  ;;  %5878 = vmatprep.subr.mxu1 %v7145_v40 }
  0x69   : > { %942 = vst.msk [vmem:[#allocation2 + $0xf8] sm:$0xff] %vm909_vm1, %v6824_v35  ;;  %944 = vst.msk [vmem:[#allocation2 + $0x108] sm:$0xff] %vm909_vm1, %v6824_v35  ;;  %5678 = vmatprep.subr.mxu0 %v1030_v41 }
  0x6a   : > { %945 = vst.msk [vmem:[#allocation2 + $0x110] sm:$0xff] %vm909_vm1, %v6824_v35  ;;  %947 = vst.msk [vmem:[#allocation2 + $0x120] sm:$0xff] %vm909_vm1, %v6824_v35 }
  0x6b   : > { %5590 = vmatmul.mubr.msk.f32.gmra.mrb[6].mxu0 %vm299_vm0, %v265_v10  ;;  %948 = vst.msk [vmem:[#allocation2 + $0x128] sm:$0xff] %vm909_vm1, %v6824_v35  ;;  %950 = vst.msk [vmem:[#allocation2 + $0x138] sm:$0xff] %vm909_vm1, %v6824_v35 }
  0x6c   : > { %5592 = vmatprep.mubr.msk.f32.mxu0 %vm299_vm0, %v266_v11  ;;  %951 = vst.msk [vmem:[#allocation2 + $0x140] sm:$0xff] %vm909_vm1, %v6824_v35  ;;  %953 = vst.msk [vmem:[#allocation2 + $0x150] sm:$0xff] %vm909_vm1, %v6824_v35 }
  0x6d   : > { %954 = vst.msk [vmem:[#allocation2 + $0x158] sm:$0xff] %vm909_vm1, %v6824_v35  ;;  %956 = vst.msk [vmem:[#allocation2 + $0x168] sm:$0xff] %vm909_vm1, %v6824_v35 }
  0x6e   : > { %957 = vst.msk [vmem:[#allocation2 + $0x170] sm:$0xff] %vm909_vm1, %v6824_v35  ;;  %959 = vst.msk [vmem:[#allocation2 + $0x180] sm:$0xff] %vm909_vm1, %v6824_v35 }
  0x6f   : > { %5593 = vmatmul.mubr.msk.f32.gmra.mrb[8].mxu0 %vm299_vm0, %v267_v12  ;;  %960 = vst.msk [vmem:[#allocation2 + $0x188] sm:$0xff] %vm909_vm1, %v6824_v35  ;;  %962 = vst.msk [vmem:[#allocation2 + $0x198] sm:$0xff] %vm909_vm1, %v6824_v35 }
  0x70   : > { %5595 = vmatprep.mubr.msk.f32.mxu0 %vm299_vm0, %v268_v13  ;;  %963 = vst.msk [vmem:[#allocation2 + $0x1a0] sm:$0xff] %vm909_vm1, %v6824_v35 }
  0x71   : > { %916 = vst.msk [vmem:[#allocation2 + $0x28] sm:$0x3] %vm912_vm2, %v6824_v35  ;;  %913 = vst.msk [vmem:[#allocation2 + $0x10] sm:$0x3] %vm912_vm2, %v6824_v35 }
  0x72   : > { %919 = vst.msk [vmem:[#allocation2 + $0x40] sm:$0x3] %vm912_vm2, %v6824_v35  ;;  %922 = vst.msk [vmem:[#allocation2 + $0x58] sm:$0x3] %vm912_vm2, %v6824_v35 }
  0x73   : > { %5596 = vmatmul.mubr.msk.f32.gmra.mrb[10].mxu0 %vm299_vm0, %v269_v14  ;;  %925 = vst.msk [vmem:[#allocation2 + $0x70] sm:$0x3] %vm912_vm2, %v6824_v35  ;;  %928 = vst.msk [vmem:[#allocation2 + $0x88] sm:$0x3] %vm912_vm2, %v6824_v35 }
  0x74   : > { %5598 = vmatprep.mubr.msk.f32.mxu0 %vm299_vm0, %v270_v15  ;;  %931 = vst.msk [vmem:[#allocation2 + $0xa0] sm:$0x3] %vm912_vm2, %v6824_v35  ;;  %934 = vst.msk [vmem:[#allocation2 + $0xb8] sm:$0x3] %vm912_vm2, %v6824_v35 }
  0x75   : > { %937 = vst.msk [vmem:[#allocation2 + $0xd0] sm:$0x3] %vm912_vm2, %v6824_v35  ;;  %940 = vst.msk [vmem:[#allocation2 + $0xe8] sm:$0x3] %vm912_vm2, %v6824_v35 }
  0x76   : > { %943 = vst.msk [vmem:[#allocation2 + $0x100] sm:$0x3] %vm912_vm2, %v6824_v35  ;;  %946 = vst.msk [vmem:[#allocation2 + $0x118] sm:$0x3] %vm912_vm2, %v6824_v35 }
  0x77   : > { %5599 = vmatmul.mubr.msk.f32.gmra.mrb[12].mxu0 %vm299_vm0, %v271_v16  ;;  %949 = vst.msk [vmem:[#allocation2 + $0x130] sm:$0x3] %vm912_vm2, %v6824_v35  ;;  %952 = vst.msk [vmem:[#allocation2 + $0x148] sm:$0x3] %vm912_vm2, %v6824_v35 }
  0x78   : > { %5601 = vmatprep.mubr.msk.f32.mxu0 %vm299_vm0, %v272_v17  ;;  %955 = vst.msk [vmem:[#allocation2 + $0x160] sm:$0x3] %vm912_vm2, %v6824_v35  ;;  %958 = vst.msk [vmem:[#allocation2 + $0x178] sm:$0x3] %vm912_vm2, %v6824_v35  ;;  %v1032_v38 = vld [vmem:[#allocation2 + $0x9] sm:$0xff] }
  0x79   : > { %961 = vst.msk [vmem:[#allocation2 + $0x190] sm:$0x3] %vm912_vm2, %v6824_v35  ;;  %964 = vst.msk [vmem:[#allocation2 + $0x1a8] sm:$0x3] %vm912_vm2, %v6824_v35 }
  0x7b   : > { %5602 = vmatmul.mubr.msk.f32.gmra.mrb[14].mxu0 %vm299_vm0, %v273_v18 }
  0x7c   : > { %5604 = vmatprep.mubr.msk.f32.mxu0 %vm299_vm0, %v274_v19 }
  0x7f   : > { %5605 = vmatmul.mubr.msk.f32.gmra.mrb[16].mxu0 %vm299_vm0, %v275_v20 }
  0x80   : > { %5607 = vmatprep.mubr.msk.f32.mxu0 %vm299_vm0, %v276_v21 }
  0x83   : > { %5608 = vmatmul.mubr.msk.f32.gmra.mrb[18].mxu0 %vm299_vm0, %v277_v22 }
  0x84   : > { %5610 = vmatprep.mubr.msk.f32.mxu0 %vm299_vm0, %v278_v23 }
  0x87   : > { %5611 = vmatmul.mubr.msk.f32.gmra.mrb[20].mxu0 %vm299_vm0, %v279_v24 }
  0x88   : > { %5613 = vmatprep.mubr.msk.f32.mxu0 %vm299_vm0, %v280_v25 }
  0x8b   : > { %5614 = vmatmul.mubr.msk.f32.gmra.mrb[22].mxu0 %vm299_vm0, %v281_v26 }
  0x8c   : > { %5616 = vmatprep.mubr.msk.f32.mxu0 %vm299_vm0, %v282_v27 }
  0x8f   : > { %5617 = vmatmul.mubr.msk.f32.gmra.mrb[24].mxu0 %vm299_vm0, %v283_v28 }
  0x90   : > { %5619 = vmatprep.mubr.msk.f32.mxu0 %vm299_vm0, %v284_v29 }
  0x93   : > { %5620 = vmatmul.mubr.msk.f32.gmra.mrb[26].mxu0 %vm299_vm0, %v285_v30 }
  0x94   : > { %5622 = vmatprep.mubr.msk.f32.mxu0 %vm299_vm0, %v286_v31 }
  0x97   : > { %5623 = vmatmul.mubr.msk.f32.gmra.mrb[28].mxu0 %vm299_vm0, %v287_v32 }
  0x98   : > { %5625 = vmatprep.mubr.msk.f32.mxu0 %vm299_vm0, %v288_v33 }
  0x9b   : > { %5626 = vmatmul.mubr.msk.f32.gmra.mrb[30].mxu0 %vm299_vm0, %v289_v34 }
  0x9c   : > { %5630 = vmatprep.mubr.msk.f32.mxu0 %vm909_vm1, %v1031_v37 }
  0x9f   : > { %5631 = vmatmul.mubr.msk.f32.vlgmr.msra.gmra.mrb[32].mxu0 %vm909_vm1, %v1032_v38 }
  0xa0   : > { %5679 = vmatpush3.msra.mxu0 %v1030_v41 }
 0x132   : > { %v5582_v43 = vpop.f32.mrb[0].mxu0 }
 0x133   : > { %v7154_v44 = vadd.f32 %v5582_v43, %v7151_v42  ;;  %v462_v45 = vpop.f32.mrb[1].mxu0 }
 0x134   : > { %v7157_v46 = vadd.f32 %v7151_v42, %v462_v45 }
 0x135   : > { %v622_v47 = vmin.f32 %v7154_v44, 20.0 }
 0x136   : > { %v621_v48 = vmin.f32 %v7157_v46, 20.0  ;;  %v5585_v49 = vpop.f32.mrb[2].mxu0 }
 0x137   : > { %v655_v50 = vmul.f32 1.442695, %v622_v47  ;;  %v7162_v51 = vadd.f32 %v5585_v49, %v7151_v42  ;;  %v472_v52 = vpop.f32.mrb[3].mxu0 }
 0x138   : > { %v653_v53 = vmul.f32 1.442695, %v621_v48  ;;  %v7165_v54 = vadd.f32 %v7151_v42, %v472_v52 }
 0x139   : > { %6400 = vpow2.f32 %v655_v50  ;;  %v624_v55 = vmin.f32 %v7162_v51, 20.0 }
 0x13a   : > { %6402 = vpow2.f32 %v653_v53  ;;  %v623_v56 = vmin.f32 %v7165_v54, 20.0  ;;  %v5588_v57 = vpop.f32.mrb[4].mxu0 }
 0x13b   : > { %v659_v58 = vmul.f32 1.442695, %v624_v55  ;;  %v7170_v59 = vadd.f32 %v5588_v57, %v7151_v42  ;;  %v482_v60 = vpop.f32.mrb[5].mxu0 }
 0x13c   : > { %v657_v61 = vmul.f32 1.442695, %v623_v56  ;;  %v7173_v62 = vadd.f32 %v7151_v42, %v482_v60 }
 0x13d   : > { %6404 = vpow2.f32 %v659_v58  ;;  %v626_v63 = vmin.f32 %v7170_v59, 20.0 }
 0x13e   : > { %6406 = vpow2.f32 %v657_v61  ;;  %v625_v0 = vmin.f32 %v7173_v62, 20.0  ;;  %v5591_v1 = vpop.f32.mrb[6].mxu0 }
 0x13f   : > { %v663_v2 = vmul.f32 1.442695, %v626_v63  ;;  %v7178_v3 = vadd.f32 %v5591_v1, %v7151_v42  ;;  %v492_v4 = vpop.f32.mrb[7].mxu0 }
 0x140   : > { %v661_v5 = vmul.f32 1.442695, %v625_v0  ;;  %v7181_v6 = vadd.f32 %v7151_v42, %v492_v4 }
 0x141   : > { %6408 = vpow2.f32 %v663_v2  ;;  %v628_v7 = vmin.f32 %v7178_v3, 20.0 }
 0x142   : > { %6410 = vpow2.f32 %v661_v5  ;;  %v627_v8 = vmin.f32 %v7181_v6, 20.0  ;;  %v5594_v9 = vpop.f32.mrb[8].mxu0 }
 0x143   : > { %v6401_v10 = vpop.eup %6400  ;;  %v667_v11 = vmul.f32 1.442695, %v628_v7  ;;  %v7186_v12 = vadd.f32 %v5594_v9, %v7151_v42  ;;  %v502_v13 = vpop.f32.mrb[9].mxu0 }
 0x144   : > { %v6403_v14 = vpop.eup %6402  ;;  %v718_v15 = vadd.f32 2.0, %v6401_v10  ;;  %v665_v16 = vmul.f32 1.442695, %v627_v8  ;;  %v7189_v17 = vadd.f32 %v7151_v42, %v502_v13 }
 0x145   : > { %v717_v18 = vadd.f32 2.0, %v6403_v14  ;;  %6412 = vpow2.f32 %v667_v11  ;;  %v630_v19 = vmin.f32 %v7186_v12, 20.0 }
 0x146   : > { %v7192_v20 = vmul.f32 %v6401_v10, %v718_v15  ;;  %6414 = vpow2.f32 %v665_v16  ;;  %v629_v21 = vmin.f32 %v7189_v17, 20.0  ;;  %v5597_v22 = vpop.f32.mrb[10].mxu0 }
 0x147   : > { %v6405_v23 = vpop.eup %6404  ;;  %v7195_v24 = vmul.f32 %v6403_v14, %v717_v18  ;;  %v671_v25 = vmul.f32 1.442695, %v630_v19  ;;  %v7198_v26 = vadd.f32 %v5597_v22, %v7151_v42  ;;  %v512_v27 = vpop.f32.mrb[11].mxu0 }
 0x148   : > { %v6407_v28 = vpop.eup %6406  ;;  %v782_v29 = vadd.f32 2.0, %v7192_v20  ;;  %v720_v30 = vadd.f32 2.0, %v6405_v23  ;;  %v669_v31 = vmul.f32 1.442695, %v629_v21  ;;  %v7202_v32 = vadd.f32 %v7151_v42, %v512_v27 }
 0x149   : > { %v781_v33 = vadd.f32 2.0, %v7195_v24  ;;  %v719_v34 = vadd.f32 2.0, %v6407_v28  ;;  %6416 = vpow2.f32 %v671_v25  ;;  %v632_v35 = vmin.f32 %v7198_v26, 20.0 }
 0x14a   : > { %6418 = vrcp.f32 %v782_v29  ;;  %v7206_v36 = vmul.f32 %v6405_v23, %v720_v30  ;;  %v631_v37 = vmin.f32 %v7202_v32, 20.0  ;;  %v5600_v38 = vpop.f32.mrb[12].mxu0 }
 0x14b   : > { %v6409_v39 = vpop.eup %6408  ;;  %6420 = vrcp.f32 %v781_v33  ;;  %v7209_v41 = vmul.f32 %v6407_v28, %v719_v34  ;;  %v675_v43 = vmul.f32 1.442695, %v632_v35  ;;  %v7212_v45 = vadd.f32 %v5600_v38, %v7151_v42  ;;  %v522_v47 = vpop.f32.mrb[13].mxu0 }
 0x14c   : > { %v6411_v48 = vpop.eup %6410  ;;  %v784_v49 = vadd.f32 2.0, %v7206_v36  ;;  %v722_v50 = vadd.f32 2.0, %v6409_v39  ;;  %6422 = vpow2.f32 %v669_v31  ;;  %v673_v52 = vmul.f32 1.442695, %v631_v37 }
 0x14d   : > { %v783_v53 = vadd.f32 2.0, %v7209_v41  ;;  %v721_v55 = vadd.f32 2.0, %v6411_v48  ;;  %6424 = vpow2.f32 %v675_v43  ;;  %v634_v56 = vmin.f32 %v7212_v45, 20.0 }
 0x14e   : > { %6426 = vrcp.f32 %v784_v49  ;;  %v7217_v57 = vmul.f32 %v6409_v39, %v722_v50  ;;  %v7220_v58 = vadd.f32 %v7151_v42, %v522_v47  ;;  %v5603_v60 = vpop.f32.mrb[14].mxu0 }
 0x14f   : > { %v6413_v61 = vpop.eup %6412  ;;  %6428 = vrcp.f32 %v783_v53  ;;  %v7222_v63 = vmul.f32 %v6411_v48, %v721_v55  ;;  %v679_v0 = vmul.f32 1.442695, %v634_v56  ;;  %v7225_v1 = vadd.f32 %v5603_v60, %v7151_v42  ;;  %v532_v2 = vpop.f32.mrb[15].mxu0 }
 0x150   : > { %v6415_v4 = vpop.eup %6414  ;;  %v786_v5 = vadd.f32 2.0, %v7217_v57  ;;  %v724_v7 = vadd.f32 2.0, %v6413_v61  ;;  %6430 = vpow2.f32 %v673_v52  ;;  %v633_v8 = vmin.f32 %v7220_v58, 20.0 }
 0x151   : > { %v785_v9 = vadd.f32 2.0, %v7222_v63  ;;  %v723_v10 = vadd.f32 2.0, %v6415_v4  ;;  %6432 = vpow2.f32 %v679_v0  ;;  %v636_v11 = vmin.f32 %v7225_v1, 20.0 }
 0x152   : > { %6434 = vrcp.f32 %v786_v5  ;;  %v7231_v13 = vmul.f32 %v6413_v61, %v724_v7  ;;  %v677_v14 = vmul.f32 1.442695, %v633_v8  ;;  %v7234_v15 = vadd.f32 %v7151_v42, %v532_v2  ;;  %v5606_v16 = vpop.f32.mrb[16].mxu0 }
 0x153   : > { %v6417_v18 = vpop.eup %6416  ;;  %6436 = vrcp.f32 %v785_v9  ;;  %v7236_v19 = vmul.f32 %v6415_v4, %v723_v10  ;;  %v683_v21 = vmul.f32 1.442695, %v636_v11  ;;  %v7239_v22 = vadd.f32 %v5606_v16, %v7151_v42  ;;  %v542_v23 = vpop.f32.mrb[17].mxu0 }
 0x154   : > { %v6419_v25 = vpop.eup %6418  ;;  %v788_v27 = vadd.f32 2.0, %v7231_v13  ;;  %v726_v28 = vadd.f32 2.0, %v6417_v18  ;;  %6438 = vpow2.f32 %v677_v14  ;;  %v635_v29 = vmin.f32 %v7234_v15, 20.0 }
 0x155   : > { %v6421_v30 = vpop.eup %6420  ;;  %v816_v31 = vmul.f32 %v6419_v25, %v7192_v20  ;;  %v787_v33 = vadd.f32 2.0, %v7236_v19  ;;  %6440 = vpow2.f32 %v683_v21  ;;  %v638_v34 = vmin.f32 %v7239_v22, 20.0 }
 0x156   : > { %v6423_v35 = vpop.eup %6422  ;;  %v814_v37 = vmul.f32 %v6421_v30, %v7195_v24  ;;  %6442 = vrcp.f32 %v788_v27  ;;  %v7247_v38 = vmul.f32 %v6417_v18, %v726_v28  ;;  %v681_v39 = vmul.f32 1.442695, %v635_v29  ;;  %v5609_v43 = vpop.f32.mrb[18].mxu0 }
 0x157   : > { %v6425_v47 = vpop.eup %6424  ;;  %v878_v48 = vmul.f32 %v816_v31, %v7154_v44  ;;  %6444 = vrcp.f32 %v787_v33  ;;  %v725_v49 = vadd.f32 2.0, %v6423_v35  ;;  %v687_v50 = vmul.f32 1.442695, %v638_v34  ;;  %v552_v20 = vpop.f32.mrb[19].mxu0 }
 0x158   : > { %v6427_v52 = vpop.eup %6426  ;;  %v877_v53 = vmul.f32 %v814_v37, %v7157_v46  ;;  %v790_v55 = vadd.f32 2.0, %v7247_v38  ;;  %v728_v56 = vadd.f32 2.0, %v6425_v47  ;;  %6446 = vpow2.f32 %v681_v39 }
 0x159   : > { %v6429_v24 = vpop.eup %6428  ;;  %967 = vst.msk [vmem:[#allocation2 + $0x21] sm:$0xff] %vm909_vm1, %v878_v48  ;;  %v820_v60 = vmul.f32 %v6427_v52, %v7206_v36  ;;  %v7254_v61 = vmul.f32 %v6423_v35, %v725_v49  ;;  %6448 = vpow2.f32 %v687_v50  ;;  %v7257_v44 = vadd.f32 %v7151_v42, %v542_v23 }
 0x15a   : > { %v6431_v0 = vpop.eup %6430  ;;  %966 = vst.msk [vmem:[#allocation2 + $0x19] sm:$0xff] %vm909_vm1, %v877_v53  ;;  %v818_v46 = vmul.f32 %v6429_v24, %v7209_v41  ;;  %6450 = vrcp.f32 %v790_v55  ;;  %v7261_v2 = vmul.f32 %v6425_v47, %v728_v56  ;;  %v7264_v4 = vadd.f32 %v5609_v43, %v7151_v42  ;;  %v5612_v5 = vpop.f32.mrb[20].mxu0 }
 0x15b   : > { %v6433_v7 = vpop.eup %6432  ;;  %v880_v36 = vmul.f32 %v820_v60, %v7162_v51  ;;  %v789_v8 = vadd.f32 2.0, %v7254_v61  ;;  %v727_v9 = vadd.f32 2.0, %v6431_v0  ;;  %v637_v10 = vmin.f32 %v7257_v44, 20.0  ;;  %v7269_v11 = vpop.f32.mrb[21].mxu0 }
 0x15c   : > { %v6435_v14 = vpop.eup %6434  ;;  %v879_v41 = vmul.f32 %v818_v46, %v7165_v54  ;;  %v792_v16 = vadd.f32 2.0, %v7261_v2  ;;  %v730_v18 = vadd.f32 2.0, %v6433_v7  ;;  %v640_v21 = vmin.f32 %v7264_v4, 20.0 }
 0x15d   : > { %v6437_v23 = vpop.eup %6436  ;;  %969 = vst.msk [vmem:[#allocation2 + $0x39] sm:$0xff] %vm909_vm1, %v880_v36  ;;  %v824_v51 = vmul.f32 %v6435_v14, %v7217_v57  ;;  %6452 = vrcp.f32 %v789_v8  ;;  %v7276_v25 = vmul.f32 %v6431_v0, %v727_v9  ;;  %v685_v27 = vmul.f32 1.442695, %v637_v10 }
 0x15e   : > { %v6439_v28 = vpop.eup %6438  ;;  %968 = vst.msk [vmem:[#allocation2 + $0x31] sm:$0xff] %vm909_vm1, %v879_v41  ;;  %v822_v29 = vmul.f32 %v6437_v23, %v7222_v63  ;;  %6454 = vrcp.f32 %v792_v16  ;;  %v7280_v54 = vmul.f32 %v6433_v7, %v730_v18  ;;  %v691_v30 = vmul.f32 1.442695, %v640_v21  ;;  %v7282_v31 = vpop.f32.mrb[22].mxu0 }
 0x15f   : > { %v6441_v33 = vpop.eup %6440  ;;  %v882_v34 = vmul.f32 %v824_v51, %v7170_v59  ;;  %v791_v57 = vadd.f32 2.0, %v7276_v25  ;;  %v729_v35 = vadd.f32 2.0, %v6439_v28  ;;  %6456 = vpow2.f32 %v685_v27  ;;  %v7286_v37 = vpop.f32.mrb[23].mxu0 }
 0x160   : > { %v6443_v39 = vpop.eup %6442  ;;  %v881_v43 = vmul.f32 %v822_v29, %v7173_v62  ;;  %v794_v63 = vadd.f32 2.0, %v7280_v54  ;;  %v732_v47 = vadd.f32 2.0, %v6441_v33  ;;  %6458 = vpow2.f32 %v691_v30 }
 0x161   : > { %v6445_v48 = vpop.eup %6444  ;;  %971 = vst.msk [vmem:[#allocation2 + $0x51] sm:$0xff] %vm909_vm1, %v882_v34  ;;  %v828_v49 = vmul.f32 %v6443_v39, %v7231_v13  ;;  %6460 = vrcp.f32 %v791_v57  ;;  %v7292_v59 = vmul.f32 %v6439_v28, %v729_v35  ;;  %v7295_v50 = vadd.f32 %v7151_v42, %v552_v20  ;;  %v1033_v52 = vld [vmem:[#allocation2 + $0x19] sm:$0xff]  ;;  %v1034_v13 = vld [vmem:[#allocation2 + $0x21] sm:$0xff] }
 0x162   : > { %v6447_v53 = vpop.eup %6446  ;;  %970 = vst.msk [vmem:[#allocation2 + $0x49] sm:$0xff] %vm909_vm1, %v881_v43  ;;  %v826_v62 = vmul.f32 %v6445_v48, %v7236_v19  ;;  %6462 = vrcp.f32 %v794_v63  ;;  %v7299_v55 = vmul.f32 %v6441_v33, %v732_v47  ;;  %v7302_v56 = vadd.f32 %v5612_v5, %v7151_v42  ;;  %v7304_v24 = vpop.f32.mrb[24].mxu0  ;;  %5633 = vmatprep.mubr.msk.f32.mxu0 %vm909_vm1, %v1033_v52  ;;  %v7308_v20 = vld [vmem:[#allocation6 + $0x30] sm:$0xff] }
 0x163   : > { %5830 = vmatprep.mubr.msk.f32.mxu1 %vm909_vm1, %v1033_v52  ;;  %v6449_v60 = vpop.eup %6448  ;;  %v884_v0 = vmul.f32 %v828_v49, %v7178_v3  ;;  %v793_v19 = vadd.f32 2.0, %v7292_v59  ;;  %v731_v46 = vadd.f32 2.0, %v6447_v53  ;;  %v639_v7 = vmin.f32 %v7295_v50, 20.0  ;;  %v7313_v36 = vpop.f32.mrb[25].mxu0  ;;  %5634 = vmatmul.mubr.msk.f32.gmra.mrb[34].mxu0 %vm909_vm1, %v1034_v13 }
 0x164   : > { %5831 = vmatmul.mubr.msk.f32.vlgmr.msra.gmra.mrb[0].mxu1 %vm909_vm1, %v1034_v13  ;;  %v6451_v5 = vpop.eup %6450  ;;  %v883_v8 = vmul.f32 %v826_v62, %v7181_v6  ;;  %v796_v9 = vadd.f32 2.0, %v7299_v55  ;;  %v734_v10 = vadd.f32 2.0, %v6449_v60  ;;  %v642_v14 = vmin.f32 %v7302_v56, 20.0 }
 0x165   : > { %5879 = vmatpush3.msra.mxu1 %v7145_v40  ;;  %973 = vst.msk [vmem:[#allocation2 + $0x69] sm:$0xff] %vm909_vm1, %v884_v0  ;;  %v832_v3 = vmul.f32 %v6451_v5, %v7247_v38  ;;  %6464 = vrcp.f32 %v793_v19  ;;  %v7323_v41 = vmul.f32 %v6447_v53, %v731_v46  ;;  %v689_v16 = vmul.f32 1.442695, %v639_v7  ;;  %v1035_v18 = vld [vmem:[#allocation2 + $0x31] sm:$0xff]  ;;  %v1036_v38 = vld [vmem:[#allocation2 + $0x39] sm:$0xff] }
 0x166   : > { %5928 = vmatprep.subr.mxu1 %v7308_v20  ;;  %972 = vst.msk [vmem:[#allocation2 + $0x61] sm:$0xff] %vm909_vm1, %v883_v8  ;;  %6466 = vrcp.f32 %v796_v9  ;;  %v7327_v6 = vmul.f32 %v6449_v60, %v734_v10  ;;  %v695_v21 = vmul.f32 1.442695, %v642_v14  ;;  %v7331_v40 = vadd.f32 %v7151_v42, %v7269_v11  ;;  %v7333_v23 = vpop.f32.mrb[26].mxu0  ;;  %5636 = vmatprep.mubr.msk.f32.mxu0 %vm909_vm1, %v1035_v18  ;;  %v7347_v11 = vld [vmem:[#allocation6 + $0x10] sm:$0xff] }
 0x167   : > { %5833 = vmatprep.mubr.msk.f32.mxu1 %vm909_vm1, %v1035_v18  ;;  %v6453_v51 = vpop.eup %6452  ;;  %v886_v27 = vmul.f32 %v832_v3, %v7186_v12  ;;  %v795_v28 = vadd.f32 2.0, %v7323_v41  ;;  %6468 = vpow2.f32 %v689_v16  ;;  %v7341_v29 = vadd.f32 %v7282_v31, %v7151_v42  ;;  %v7343_v30 = vpop.f32.mrb[27].mxu0  ;;  %5637 = vmatmul.mubr.msk.f32.gmra.mrb[36].mxu0 %vm909_vm1, %v1036_v38 }
 0x168   : > { %5834 = vmatmul.mubr.msk.f32.gmra.mrb[2].mxu1 %vm909_vm1, %v1036_v38  ;;  %v6455_v33 = vpop.eup %6454  ;;  %v830_v34 = vmul.f32 %v6453_v51, %v7254_v61  ;;  %v798_v12 = vadd.f32 2.0, %v7327_v6  ;;  %6470 = vpow2.f32 %v695_v21  ;;  %v641_v57 = vmin.f32 %v7331_v40, 20.0  ;;  %5728 = vmatprep.subr.mxu0 %v7347_v11 }
 0x169   : > { %v6457_v31 = vpop.eup %6456  ;;  %975 = vst.msk [vmem:[#allocation2 + $0x81] sm:$0xff] %vm909_vm1, %v886_v27  ;;  %v836_v35 = vmul.f32 %v6455_v33, %v7261_v2  ;;  %6472 = vrcp.f32 %v795_v28  ;;  %v644_v39 = vmin.f32 %v7341_v29, 20.0  ;;  %v7358_v43 = vadd.f32 %v7151_v42, %v7286_v37  ;;  %v7360_v61 = vld [vmem:[#allocation2 + $0x49] sm:$0xff]  ;;  %v7369_v2 = vld [vmem:[#allocation2 + $0x51] sm:$0xff] }
 0x16a   : > { %8835 = vst [vmem:[#allocation12_spill] sm:$0xff] %v7360_v61  ;;  %v6459_v63 = vpop.eup %6458  ;;  %v885_v47 = vmul.f32 %v830_v34, %v7189_v17  ;;  %6474 = vrcp.f32 %v798_v12  ;;  %v733_v48 = vadd.f32 2.0, %v6457_v31  ;;  %v693_v49 = vmul.f32 1.442695, %v641_v57  ;;  %v7363_v52 = vpop.f32.mrb[28].mxu0  ;;  %5639 = vmatprep.mubr.msk.f32.mxu0 %vm909_vm1, %v7360_v61  ;;  %5836 = vmatprep.mubr.msk.f32.mxu1 %vm909_vm1, %v7360_v61  ;;  %8836 = vst [vmem:[#allocation13_spill] sm:$0xff] %v7369_v2 }
 0x16b   : > { %v6461_v37 = vpop.eup %6460  ;;  %v888_v53 = vmul.f32 %v836_v35, %v7198_v26  ;;  %v736_v62 = vadd.f32 2.0, %v6459_v63  ;;  %v699_v13 = vmul.f32 1.442695, %v644_v39  ;;  %v643_v17 = vmin.f32 %v7358_v43, 20.0  ;;  %v7373_v60 = vpop.f32.mrb[29].mxu0  ;;  %5640 = vmatmul.mubr.msk.f32.gmra.mrb[38].mxu0 %vm909_vm1, %v7369_v2 }
 0x16c   : > { %5837 = vmatmul.mubr.msk.f32.gmra.mrb[4].mxu1 %vm909_vm1, %v7369_v2  ;;  %v6463_v0 = vpop.eup %6462  ;;  %974 = vst.msk [vmem:[#allocation2 + $0x79] sm:$0xff] %vm909_vm1, %v885_v47  ;;  %v834_v19 = vmul.f32 %v6461_v37, %v7276_v25  ;;  %v7381_v46 = vmul.f32 %v6457_v31, %v733_v48  ;;  %6476 = vpow2.f32 %v693_v49  ;;  %v7385_v26 = vadd.f32 %v7304_v24, %v7151_v42 }
 0x16d   : > { %977 = vst.msk [vmem:[#allocation2 + $0x99] sm:$0xff] %vm909_vm1, %v888_v53  ;;  %v840_v7 = vmul.f32 %v6463_v0, %v7280_v54  ;;  %v7389_v5 = vmul.f32 %v6459_v63, %v736_v62  ;;  %6478 = vpow2.f32 %v699_v13  ;;  %v697_v8 = vmul.f32 1.442695, %v643_v17  ;;  %v7391_v9 = vld [vmem:[#allocation2 + $0x61] sm:$0xff]  ;;  %v7406_v54 = vld [vmem:[#allocation2 + $0x69] sm:$0xff] }
 0x16e   : > { %8837 = vst [vmem:[#allocation14_spill] sm:$0xff] %v7391_v9  ;;  %v887_v10 = vmul.f32 %v834_v19, %v7202_v32  ;;  %v797_v25 = vadd.f32 2.0, %v7381_v46  ;;  %v646_v14 = vmin.f32 %v7385_v26, 20.0  ;;  %v7398_v24 = vadd.f32 %v7151_v42, %v7313_v36  ;;  %v7400_v3 = vpop.f32.mrb[30].mxu0  ;;  %5642 = vmatprep.mubr.msk.f32.mxu0 %vm909_vm1, %v7391_v9  ;;  %5839 = vmatprep.mubr.msk.f32.mxu1 %vm909_vm1, %v7391_v9 }
 0x16f   : > { %8838 = vst [vmem:[#allocation15_spill] sm:$0xff] %v7406_v54  ;;  %v6465_v16 = vpop.eup %6464  ;;  %v890_v32 = vmul.f32 %v840_v7, %v7212_v45  ;;  %v800_v18 = vadd.f32 2.0, %v7389_v5  ;;  %6480 = vpow2.f32 %v697_v8  ;;  %v7412_v36 = vadd.f32 %v7333_v23, %v7151_v42  ;;  %v7414_v21 = vpop.f32.mrb[31].mxu0  ;;  %5643 = vmatmul.mubr.msk.f32.gmra.mrb[40].mxu0 %vm909_vm1, %v7406_v54 }
 0x170   : > { %5840 = vmatmul.mubr.msk.f32.gmra.mrb[6].mxu1 %vm909_vm1, %v7406_v54  ;;  %v6467_v38 = vpop.eup %6466  ;;  %976 = vst.msk [vmem:[#allocation2 + $0x91] sm:$0xff] %vm909_vm1, %v887_v10  ;;  %v838_v45 = vmul.f32 %v6465_v16, %v7292_v59  ;;  %6482 = vrcp.f32 %v797_v25  ;;  %v703_v51 = vmul.f32 1.442695, %v646_v14  ;;  %v645_v27 = vmin.f32 %v7398_v24, 20.0  ;;  %v1707_v54 = vld [vmem:[#allocation2 + $0x2] sm:$0xff] }
 0x171   : > { %v6469_v28 = vpop.eup %6468  ;;  %979 = vst.msk [vmem:[#allocation2 + $0xb1] sm:$0xff] %vm909_vm1, %v890_v32  ;;  %v844_v23 = vmul.f32 %v6467_v38, %v7299_v55  ;;  %6484 = vrcp.f32 %v800_v18  ;;  %v648_v33 = vmin.f32 %v7412_v36, 20.0  ;;  %v7428_v34 = vadd.f32 %v7151_v42, %v7343_v30 }
 0x172   : > { %v6471_v12 = vpop.eup %6470  ;;  %v889_v57 = vmul.f32 %v838_v45, %v7220_v58  ;;  %v735_v59 = vadd.f32 2.0, %v6469_v28  ;;  %6486 = vpow2.f32 %v703_v51  ;;  %v701_v31 = vmul.f32 1.442695, %v645_v27 }
 0x173   : > { %v6473_v35 = vpop.eup %6472  ;;  %v892_v39 = vmul.f32 %v844_v23, %v7225_v1  ;;  %v738_v63 = vadd.f32 2.0, %v6471_v12  ;;  %v707_v47 = vmul.f32 1.442695, %v648_v33  ;;  %v647_v55 = vmin.f32 %v7428_v34, 20.0  ;;  %v7433_v48 = vld [vmem:[#allocation2 + $0x79] sm:$0xff]  ;;  %v7447_v1 = vld [vmem:[#allocation2 + $0x81] sm:$0xff] }
 0x174   : > { %8839 = vst [vmem:[#allocation16_spill] sm:$0xff] %v7433_v48  ;;  %v6475_v49 = vpop.eup %6474  ;;  %978 = vst.msk [vmem:[#allocation2 + $0xa9] sm:$0xff] %vm909_vm1, %v889_v57  ;;  %v842_v30 = vmul.f32 %v6473_v35, %v7323_v41  ;;  %v7437_v37 = vmul.f32 %v6469_v28, %v735_v59  ;;  %6488 = vpow2.f32 %v701_v31  ;;  %v7441_v58 = vadd.f32 %v7363_v52, %v7151_v42 }
 0x175   : > { %5645 = vmatprep.mubr.msk.f32.mxu0 %vm909_vm1, %v7433_v48  ;;  %5842 = vmatprep.mubr.msk.f32.mxu1 %vm909_vm1, %v7433_v48  ;;  %8840 = vst [vmem:[#allocation17_spill] sm:$0xff] %v7447_v1  ;;  %981 = vst.msk [vmem:[#allocation2 + $0xc9] sm:$0xff] %vm909_vm1, %v892_v39  ;;  %v848_v53 = vmul.f32 %v6475_v49, %v7327_v6  ;;  %v7451_v41 = vmul.f32 %v6471_v12, %v738_v63  ;;  %6490 = vpow2.f32 %v707_v47 }
 0x176   : > { %v705_v62 = vmul.f32 1.442695, %v647_v55  ;;  %5646 = vmatmul.mubr.msk.f32.gmra.mrb[42].mxu0 %vm909_vm1, %v7447_v1  ;;  %5843 = vmatmul.mubr.msk.f32.gmra.mrb[8].mxu1 %vm909_vm1, %v7447_v1  ;;  %v6477_v52 = vpop.eup %6476  ;;  %v891_v13 = vmul.f32 %v842_v30, %v7234_v15  ;;  %v799_v17 = vadd.f32 2.0, %v7437_v37  ;;  %v650_v0 = vmin.f32 %v7441_v58, 20.0 }
 0x177   : > { %v7462_v6 = vadd.f32 %v7151_v42, %v7373_v60  ;;  %v6479_v19 = vpop.eup %6478  ;;  %v894_v7 = vmul.f32 %v848_v53, %v7239_v22  ;;  %v802_v8 = vadd.f32 2.0, %v7451_v41  ;;  %v737_v10 = vadd.f32 2.0, %v6477_v52  ;;  %v7466_v25 = vld [vmem:[#allocation2 + $0x91] sm:$0xff]  ;;  %v7474_v22 = vld [vmem:[#allocation2 + $0x99] sm:$0xff] }
 0x178   : > { %6492 = vpow2.f32 %v705_v62  ;;  %8841 = vst [vmem:[#allocation18_spill] sm:$0xff] %v7466_v25  ;;  %980 = vst.msk [vmem:[#allocation2 + $0xc1] sm:$0xff] %vm909_vm1, %v891_v13  ;;  %v740_v15 = vadd.f32 2.0, %v6479_v19  ;;  %v711_v14 = vmul.f32 1.442695, %v650_v0  ;;  %5648 = vmatprep.mubr.msk.f32.mxu0 %vm909_vm1, %v7466_v25  ;;  %5845 = vmatprep.mubr.msk.f32.mxu1 %vm909_vm1, %v7466_v25  ;;  %v7481_v18 = vadd.f32 %v7400_v3, %v7151_v42 }
 0x179   : > { %6494 = vrcp.f32 %v799_v17  ;;  %v649_v16 = vmin.f32 %v7462_v6, 20.0  ;;  %8842 = vst [vmem:[#allocation19_spill] sm:$0xff] %v7474_v22  ;;  %v6481_v60 = vpop.eup %6480  ;;  %983 = vst.msk [vmem:[#allocation2 + $0xe1] sm:$0xff] %vm909_vm1, %v894_v7  ;;  %v7477_v32 = vmul.f32 %v6477_v52, %v737_v10  ;;  %v7485_v38 = vadd.f32 %v7151_v42, %v7414_v21 }
 0x17a   : > { %6496 = vrcp.f32 %v802_v8  ;;  %5649 = vmatmul.mubr.msk.f32.gmra.mrb[44].mxu0 %vm909_vm1, %v7474_v22  ;;  %5846 = vmatmul.mubr.msk.f32.gmra.mrb[10].mxu1 %vm909_vm1, %v7474_v22  ;;  %v6483_v45 = vpop.eup %6482  ;;  %v7491_v51 = vmul.f32 %v6479_v19, %v740_v15  ;;  %v739_v27 = vadd.f32 2.0, %v6481_v60  ;;  %v652_v42 = vmin.f32 %v7481_v18, 20.0 }
 0x17b   : > { %6498 = vpow2.f32 %v711_v14  ;;  %v709_v28 = vmul.f32 1.442695, %v649_v16  ;;  %v6485_v23 = vpop.eup %6484  ;;  %v846_v3 = vmul.f32 %v6483_v45, %v7381_v46  ;;  %v801_v33 = vadd.f32 2.0, %v7477_v32  ;;  %v7497_v12 = vld [vmem:[#allocation2 + $0xa9] sm:$0xff]  ;;  %v7507_v46 = vld [vmem:[#allocation2 + $0xb1] sm:$0xff] }
 0x17c   : > { %v651_v21 = vmin.f32 %v7485_v38, 20.0  ;;  %8843 = vst [vmem:[#allocation20_spill] sm:$0xff] %v7497_v12  ;;  %v6487_v57 = vpop.eup %6486  ;;  %v852_v59 = vmul.f32 %v6485_v23, %v7389_v5  ;;  %v804_v31 = vadd.f32 2.0, %v7491_v51  ;;  %v7501_v35 = vmul.f32 %v6481_v60, %v739_v27  ;;  %5651 = vmatprep.mubr.msk.f32.mxu0 %vm909_vm1, %v7497_v12  ;;  %5848 = vmatprep.mubr.msk.f32.mxu1 %vm909_vm1, %v7497_v12 }
 0x17d   : > { %6500 = vpow2.f32 %v709_v28  ;;  %8844 = vst [vmem:[#allocation21_spill] sm:$0xff] %v7507_v46  ;;  %v893_v39 = vmul.f32 %v846_v3, %v7257_v44  ;;  %v742_v63 = vadd.f32 2.0, %v6487_v57  ;;  %v715_v47 = vmul.f32 1.442695, %v652_v42 }
 0x17e   : > { %6502 = vrcp.f32 %v801_v33  ;;  %5652 = vmatmul.mubr.msk.f32.gmra.mrb[46].mxu0 %vm909_vm1, %v7507_v46  ;;  %5849 = vmatmul.mubr.msk.f32.gmra.mrb[12].mxu1 %vm909_vm1, %v7507_v46  ;;  %v6489_v5 = vpop.eup %6488  ;;  %v896_v55 = vmul.f32 %v852_v59, %v7264_v4  ;;  %v803_v49 = vadd.f32 2.0, %v7501_v35  ;;  %v713_v30 = vmul.f32 1.442695, %v651_v21  ;;  %v7526_v4 = vld [vmem:[#allocation2 + $0xc9] sm:$0xff] }
 0x17f   : > { %6504 = vrcp.f32 %v804_v31  ;;  %v6491_v53 = vpop.eup %6490  ;;  %982 = vst.msk [vmem:[#allocation2 + $0xd9] sm:$0xff] %vm909_vm1, %v893_v39  ;;  %v7517_v44 = vmul.f32 %v6487_v57, %v742_v63  ;;  %v741_v62 = vadd.f32 2.0, %v6489_v5  ;;  %v7519_v52 = vld [vmem:[#allocation2 + $0xc1] sm:$0xff]  ;;  %8846 = vst [vmem:[#allocation23_spill] sm:$0xff] %v7526_v4 }
 0x180   : > { %6506 = vpow2.f32 %v715_v47  ;;  %8845 = vst [vmem:[#allocation22_spill] sm:$0xff] %v7519_v52  ;;  %985 = vst.msk [vmem:[#allocation2 + $0xf9] sm:$0xff] %vm909_vm1, %v896_v55  ;;  %v744_v13 = vadd.f32 2.0, %v6491_v53  ;;  %5654 = vmatprep.mubr.msk.f32.mxu0 %vm909_vm1, %v7519_v52  ;;  %5851 = vmatprep.mubr.msk.f32.mxu1 %vm909_vm1, %v7519_v52 }
 0x181   : > { %6508 = vrcp.f32 %v803_v49  ;;  %v806_v0 = vadd.f32 2.0, %v7517_v44  ;;  %v7529_v19 = vmul.f32 %v6489_v5, %v741_v62 }
 0x182   : > { %v6493_v17 = vpop.eup %6492  ;;  %6510 = vpow2.f32 %v713_v30  ;;  %5655 = vmatmul.mubr.msk.f32.gmra.mrb[48].mxu0 %vm909_vm1, %v7526_v4  ;;  %5852 = vmatmul.mubr.msk.f32.gmra.mrb[14].mxu1 %vm909_vm1, %v7526_v4  ;;  %v7535_v8 = vmul.f32 %v6491_v53, %v744_v13 }
 0x183   : > { %v6495_v7 = vpop.eup %6494  ;;  %v743_v10 = vadd.f32 2.0, %v6493_v17  ;;  %6512 = vrcp.f32 %v806_v0  ;;  %v805_v16 = vadd.f32 2.0, %v7529_v19 }
 0x184   : > { %v6497_v15 = vpop.eup %6496  ;;  %v850_v14 = vmul.f32 %v6495_v7, %v7437_v37  ;;  %v808_v27 = vadd.f32 2.0, %v7535_v8 }
 0x185   : > { %v6499_v60 = vpop.eup %6498  ;;  %v856_v45 = vmul.f32 %v6497_v15, %v7451_v41  ;;  %v7541_v28 = vmul.f32 %v6493_v17, %v743_v10  ;;  %6514 = vrcp.f32 %v805_v16 }
 0x186   : > { %v895_v23 = vmul.f32 %v850_v14, %v7295_v50  ;;  %v746_v3 = vadd.f32 2.0, %v6499_v60  ;;  %6516 = vrcp.f32 %v808_v27  ;;  %v7546_v21 = vld [vmem:[#allocation2 + $0xd9] sm:$0xff]  ;;  %v7555_v50 = vld [vmem:[#allocation2 + $0xe1] sm:$0xff] }
 0x187   : > { %v6501_v33 = vpop.eup %6500  ;;  %v898_v42 = vmul.f32 %v856_v45, %v7302_v56  ;;  %v807_v37 = vadd.f32 2.0, %v7541_v28  ;;  %8847 = vst [vmem:[#allocation24_spill] sm:$0xff] %v7546_v21  ;;  %5657 = vmatprep.mubr.msk.f32.mxu0 %vm909_vm1, %v7546_v21  ;;  %5854 = vmatprep.mubr.msk.f32.mxu1 %vm909_vm1, %v7546_v21  ;;  %8848 = vst [vmem:[#allocation25_spill] sm:$0xff] %v7555_v50 }
 0x188   : > { %v6503_v57 = vpop.eup %6502  ;;  %984 = vst.msk [vmem:[#allocation2 + $0xf1] sm:$0xff] %vm909_vm1, %v895_v23  ;;  %v7549_v41 = vmul.f32 %v6499_v60, %v746_v3  ;;  %v745_v59 = vadd.f32 2.0, %v6501_v33  ;;  %5658 = vmatmul.mubr.msk.f32.gmra.mrb[50].mxu0 %vm909_vm1, %v7555_v50  ;;  %5855 = vmatmul.mubr.msk.f32.gmra.mrb[16].mxu1 %vm909_vm1, %v7555_v50 }
 0x189   : > { %v6505_v56 = vpop.eup %6504  ;;  %987 = vst.msk [vmem:[#allocation2 + $0x111] sm:$0xff] %vm909_vm1, %v898_v42  ;;  %v854_v31 = vmul.f32 %v6503_v57, %v7477_v32  ;;  %6518 = vrcp.f32 %v807_v37 }
 0x18a   : > { %v6507_v39 = vpop.eup %6506  ;;  %v860_v63 = vmul.f32 %v6505_v56, %v7491_v51  ;;  %v810_v47 = vadd.f32 2.0, %v7549_v41  ;;  %v777_v5 = vmul.f32 %v6501_v33, %v745_v59 }
 0x18b   : > { %v6509_v55 = vpop.eup %6508  ;;  %v897_v49 = vmul.f32 %v854_v31, %v7331_v40  ;;  %v748_v30 = vadd.f32 2.0, %v6507_v39 }
 0x18c   : > { %v6511_v53 = vpop.eup %6510  ;;  %v900_v32 = vmul.f32 %v860_v63, %v7341_v29  ;;  %v858_v62 = vmul.f32 %v6509_v55, %v7501_v35  ;;  %6520 = vrcp.f32 %v810_v47  ;;  %v809_v13 = vadd.f32 2.0, %v777_v5  ;;  %v7579_v35 = vld [vmem:[#allocation2 + $0xf9] sm:$0xff] }
 0x18d   : > { %986 = vst.msk [vmem:[#allocation2 + $0x109] sm:$0xff] %vm909_vm1, %v897_v49  ;;  %v780_v17 = vmul.f32 %v6507_v39, %v748_v30  ;;  %v747_v0 = vadd.f32 2.0, %v6511_v53  ;;  %v6513_v7 = vpop.eup %6512  ;;  %8850 = vst [vmem:[#allocation27_spill] sm:$0xff] %v7579_v35  ;;  %v998_v49 = vld [vmem:[#allocation2] sm:$0xff]  ;;  %v999_v30 = vld [vmem:[#allocation2 + $0x8] sm:$0xff] }
 0x18e   : > { %989 = vst.msk [vmem:[#allocation2 + $0x129] sm:$0xff] %vm909_vm1, %v900_v32  ;;  %v899_v51 = vmul.f32 %v858_v62, %v7358_v43  ;;  %6522 = vrcp.f32 %v809_v13  ;;  %v864_v40 = vmul.f32 %v6513_v7, %v7517_v44  ;;  %v7673_v62 = vld [vmem:[#allocation2 + $0x18] sm:$0xff]  ;;  %v7675_v13 = vld [vmem:[#allocation6 + $0x18] sm:$0xff] }
 0x18f   : > { %v812_v10 = vadd.f32 2.0, %v780_v17  ;;  %v779_v15 = vmul.f32 %v6511_v53, %v747_v0  ;;  %v7572_v14 = vld [vmem:[#allocation2 + $0xf1] sm:$0xff]  ;;  %v6515_v29 = vpop.eup %6514  ;;  %8863 = vst [vmem:[#allocation40_spill] sm:$0xff] %v7673_v62  ;;  %v7686_v0 = vld [vmem:[#allocation2 + $0x20] sm:$0xff] }
 0x190   : > { %8849 = vst [vmem:[#allocation26_spill] sm:$0xff] %v7572_v14  ;;  %988 = vst.msk [vmem:[#allocation2 + $0x121] sm:$0xff] %vm909_vm1, %v899_v51  ;;  %5660 = vmatprep.mubr.msk.f32.mxu0 %vm909_vm1, %v7572_v14  ;;  %5857 = vmatprep.mubr.msk.f32.mxu1 %vm909_vm1, %v7572_v14  ;;  %v6517_v16 = vpop.eup %6516  ;;  %v902_v43 = vmul.f32 %v864_v40, %v7385_v26  ;;  %v862_v44 = vmul.f32 %v6515_v29, %v7529_v19  ;;  %v7691_v7 = vld [vmem:[#allocation2 + $0x22] sm:$0xff]  ;;  %v7693_v51 = vld [vmem:[#allocation2 + $0x30] sm:$0xff] }
 0x191   : > { %6524 = vrcp.f32 %v812_v10  ;;  %v811_v60 = vadd.f32 2.0, %v779_v15  ;;  %5661 = vmatmul.mubr.msk.f32.gmra.mrb[52].mxu0 %vm909_vm1, %v7579_v35  ;;  %5858 = vmatmul.mubr.msk.f32.gmra.mrb[18].mxu1 %vm909_vm1, %v7579_v35  ;;  %v868_v45 = vmul.f32 %v6517_v16, %v7535_v8  ;;  %v7599_v8 = vld [vmem:[#allocation2 + $0x111] sm:$0xff]  ;;  %8864 = vst [vmem:[#allocation41_spill] sm:$0xff] %v7686_v0  ;;  %v7695_v40 = vld [vmem:[#allocation6 + $0x38] sm:$0xff] }
 0x192   : > { %991 = vst.msk [vmem:[#allocation2 + $0x141] sm:$0xff] %vm909_vm1, %v902_v43  ;;  %v901_v23 = vmul.f32 %v862_v44, %v7398_v24  ;;  %8852 = vst [vmem:[#allocation29_spill] sm:$0xff] %v7599_v8  ;;  %v7706_v10 = vld [vmem:[#allocation2 + $0x38] sm:$0xff]  ;;  %v7713_v29 = vld [vmem:[#allocation2 + $0x48] sm:$0xff] }
 0x193   : > { %v6519_v27 = vpop.eup %6518  ;;  %6526 = vrcp.f32 %v811_v60  ;;  %v904_v26 = vmul.f32 %v868_v45, %v7412_v36  ;;  %v7723_v16 = vld [vmem:[#allocation2 + $0x50] sm:$0xff]  ;;  %v7729_v44 = vld [vmem:[#allocation2 + $0x60] sm:$0xff]  ;;  %v7739_v45 = vld [vmem:[#allocation2 + $0x68] sm:$0xff] }
 0x194   : > { %v866_v19 = vmul.f32 %v6519_v27, %v7541_v28  ;;  %v7592_v3 = vld [vmem:[#allocation2 + $0x109] sm:$0xff]  ;;  %990 = vst.msk [vmem:[#allocation2 + $0x139] sm:$0xff] %vm909_vm1, %v901_v23  ;;  %v7727_v43 = vld [vmem:[#allocation2 + $0x52] sm:$0xff] }
 0x195   : > { %8851 = vst [vmem:[#allocation28_spill] sm:$0xff] %v7592_v3  ;;  %5663 = vmatprep.mubr.msk.f32.mxu0 %vm909_vm1, %v7592_v3  ;;  %5860 = vmatprep.mubr.msk.f32.mxu1 %vm909_vm1, %v7592_v3  ;;  %993 = vst.msk [vmem:[#allocation2 + $0x159] sm:$0xff] %vm909_vm1, %v904_v26  ;;  %v7616_v57 = vld [vmem:[#allocation2 + $0x129] sm:$0xff]  ;;  %v7745_v23 = vld [vmem:[#allocation2 + $0x78] sm:$0xff] }
 0x196   : > { %v6521_v33 = vpop.eup %6520  ;;  %v903_v24 = vmul.f32 %v866_v19, %v7428_v34  ;;  %5664 = vmatmul.mubr.msk.f32.gmra.mrb[54].mxu0 %vm909_vm1, %v7599_v8  ;;  %5861 = vmatmul.mubr.msk.f32.gmra.mrb[20].mxu1 %vm909_vm1, %v7599_v8  ;;  %8854 = vst [vmem:[#allocation31_spill] sm:$0xff] %v7616_v57  ;;  %v7735_v60 = vld [vmem:[#allocation2 + $0x62] sm:$0xff]  ;;  %v7743_v27 = vld [vmem:[#allocation2 + $0x6a] sm:$0xff]  ;;  %v7751_v26 = vld [vmem:[#allocation2 + $0x7a] sm:$0xff] }
 0x197   : > { %v872_v36 = vmul.f32 %v6521_v33, %v7549_v41  ;;  %v7608_v28 = vld [vmem:[#allocation2 + $0x121] sm:$0xff]  ;;  %v7871_v14 = vld [vmem:[#allocation2 + $0x12a] sm:$0xff] }
 0x198   : > { %8853 = vst [vmem:[#allocation30_spill] sm:$0xff] %v7608_v28  ;;  %v6523_v42 = vpop.eup %6522  ;;  %992 = vst.msk [vmem:[#allocation2 + $0x151] sm:$0xff] %vm909_vm1, %v903_v24  ;;  %5666 = vmatprep.mubr.msk.f32.mxu0 %vm909_vm1, %v7608_v28  ;;  %5863 = vmatprep.mubr.msk.f32.mxu1 %vm909_vm1, %v7608_v28  ;;  %v7755_v19 = vld [vmem:[#allocation2 + $0x80] sm:$0xff]  ;;  %v7761_v24 = vld [vmem:[#allocation2 + $0x90] sm:$0xff] }
 0x199   : > { %v906_v34 = vmul.f32 %v872_v36, %v7441_v58  ;;  %v870_v37 = vmul.f32 %v6523_v42, %v777_v5  ;;  %v7631_v58 = vld [vmem:[#allocation2 + $0x141] sm:$0xff]  ;;  %v7767_v36 = vld [vmem:[#allocation2 + $0x92] sm:$0xff] }
 0x19a   : > { %5667 = vmatmul.mubr.msk.f32.gmra.mrb[56].mxu0 %vm909_vm1, %v7616_v57  ;;  %5864 = vmatmul.mubr.msk.f32.gmra.mrb[22].mxu1 %vm909_vm1, %v7616_v57  ;;  %8856 = vst [vmem:[#allocation33_spill] sm:$0xff] %v7631_v58  ;;  %v7759_v33 = vld [vmem:[#allocation2 + $0x82] sm:$0xff]  ;;  %v7771_v42 = vld [vmem:[#allocation2 + $0x98] sm:$0xff]  ;;  %v7851_v57 = vld [vmem:[#allocation2 + $0x110] sm:$0xff] }
 0x19b   : > { %v6525_v41 = vpop.eup %6524  ;;  %995 = vst.msk [vmem:[#allocation2 + $0x171] sm:$0xff] %vm909_vm1, %v906_v34  ;;  %v905_v59 = vmul.f32 %v870_v37, %v7462_v6  ;;  %v7624_v31 = vld [vmem:[#allocation2 + $0x139] sm:$0xff]  ;;  %v7777_v37 = vld [vmem:[#allocation2 + $0xa8] sm:$0xff] }
 0x19c   : > { %v876_v56 = vmul.f32 %v6525_v41, %v780_v17  ;;  %8855 = vst [vmem:[#allocation32_spill] sm:$0xff] %v7624_v31  ;;  %5669 = vmatprep.mubr.msk.f32.mxu0 %vm909_vm1, %v7624_v31  ;;  %5866 = vmatprep.mubr.msk.f32.mxu1 %vm909_vm1, %v7624_v31  ;;  %v7681_v17 = vld [vmem:[#allocation2 + $0x1a] sm:$0xff]  ;;  %v7783_v41 = vld [vmem:[#allocation2 + $0xaa] sm:$0xff]  ;;  %v7855_v28 = vld [vmem:[#allocation2 + $0x112] sm:$0xff] }
 0x19d   : > { %v6527_v39 = vpop.eup %6526  ;;  %994 = vst.msk [vmem:[#allocation2 + $0x169] sm:$0xff] %vm909_vm1, %v905_v59  ;;  %v7775_v34 = vld [vmem:[#allocation2 + $0x9a] sm:$0xff]  ;;  %v7787_v59 = vld [vmem:[#allocation2 + $0xb0] sm:$0xff]  ;;  %v7863_v3 = vld [vmem:[#allocation2 + $0x122] sm:$0xff] }
 0x19e   : > { %v908_v63 = vmul.f32 %v876_v56, %v7481_v18  ;;  %v874_v47 = vmul.f32 %v6527_v39, %v779_v15  ;;  %5670 = vmatmul.mubr.msk.f32.gmra.mrb[58].mxu0 %vm909_vm1, %v7631_v58  ;;  %5867 = vmatmul.mubr.msk.f32.gmra.mrb[24].mxu1 %vm909_vm1, %v7631_v58  ;;  %v7646_v18 = vld [vmem:[#allocation2 + $0x159] sm:$0xff]  ;;  %v7841_v58 = vld [vmem:[#allocation2 + $0x108] sm:$0xff] }
 0x19f   : > { %v7638_v6 = vld [vmem:[#allocation2 + $0x151] sm:$0xff]  ;;  %8858 = vst [vmem:[#allocation35_spill] sm:$0xff] %v7646_v18  ;;  %v7711_v15 = vld [vmem:[#allocation2 + $0x3a] sm:$0xff]  ;;  %v7867_v35 = vld [vmem:[#allocation2 + $0x128] sm:$0xff] }
 0x1a0   : > { %8857 = vst [vmem:[#allocation34_spill] sm:$0xff] %v7638_v6  ;;  %997 = vst.msk [vmem:[#allocation2 + $0x189] sm:$0xff] %vm909_vm1, %v908_v63  ;;  %v907_v5 = vmul.f32 %v874_v47, %v7485_v38  ;;  %5672 = vmatprep.mubr.msk.f32.mxu0 %vm909_vm1, %v7638_v6  ;;  %5869 = vmatprep.mubr.msk.f32.mxu1 %vm909_vm1, %v7638_v6  ;;  %v7791_v56 = vld [vmem:[#allocation2 + $0xb2] sm:$0xff]  ;;  %v7793_v39 = vld [vmem:[#allocation2 + $0xc0] sm:$0xff] }
 0x1a1   : > { %v7799_v63 = vld [vmem:[#allocation2 + $0xc2] sm:$0xff]  ;;  %v7839_v6 = vld [vmem:[#allocation2 + $0xfa] sm:$0xff]  ;;  %v7847_v31 = vld [vmem:[#allocation2 + $0x10a] sm:$0xff] }
 0x1a2   : > { %996 = vst.msk [vmem:[#allocation2 + $0x181] sm:$0xff] %vm909_vm1, %v907_v5  ;;  %5673 = vmatmul.mubr.msk.f32.gmra.mrb[60].mxu0 %vm909_vm1, %v7646_v18  ;;  %5870 = vmatmul.mubr.msk.f32.gmra.mrb[26].mxu1 %vm909_vm1, %v7646_v18  ;;  %v7659_v38 = vld [vmem:[#allocation2 + $0x171] sm:$0xff]  ;;  %v7803_v47 = vld [vmem:[#allocation2 + $0xc8] sm:$0xff]  ;;  %v7857_v8 = vld [vmem:[#allocation2 + $0x120] sm:$0xff] }
 0x1a3   : > { %8860 = vst [vmem:[#allocation37_spill] sm:$0xff] %v7659_v38  ;;  %v7807_v5 = vld [vmem:[#allocation2 + $0xca] sm:$0xff]  ;;  %v7835_v18 = vld [vmem:[#allocation2 + $0xf8] sm:$0xff]  ;;  %v7883_v4 = vld [vmem:[#allocation2 + $0x140] sm:$0xff] }
 0x1a4   : > { %v7653_v55 = vld [vmem:[#allocation2 + $0x169] sm:$0xff]  ;;  %v7873_v50 = vld [vmem:[#allocation2 + $0x138] sm:$0xff] }
 0x1a5   : > { %8859 = vst [vmem:[#allocation36_spill] sm:$0xff] %v7653_v55  ;;  %5675 = vmatprep.mubr.msk.f32.mxu0 %vm909_vm1, %v7653_v55  ;;  %5872 = vmatprep.mubr.msk.f32.mxu1 %vm909_vm1, %v7653_v55  ;;  %v7831_v55 = vld [vmem:[#allocation2 + $0xf2] sm:$0xff]  ;;  %v7879_v21 = vld [vmem:[#allocation2 + $0x13a] sm:$0xff]  ;;  %v7887_v52 = vld [vmem:[#allocation2 + $0x142] sm:$0xff] }
 0x1a6   : > { %5676 = vmatmul.mubr.msk.f32.gmra.mrb[62].mxu0 %vm909_vm1, %v7659_v38  ;;  %5873 = vmatmul.mubr.msk.f32.gmra.mrb[28].mxu1 %vm909_vm1, %v7659_v38  ;;  %v7825_v38 = vld [vmem:[#allocation2 + $0xf0] sm:$0xff]  ;;  %v7899_v22 = vld [vmem:[#allocation2 + $0x158] sm:$0xff]  ;;  %v7905_v1 = vld [vmem:[#allocation2 + $0x168] sm:$0xff] }
 0x1a7   : > { %5680 = vmatprep.mubr.msk.f32.mxu0 %vm909_vm1, %v998_v49  ;;  %v7671_v32 = vld [vmem:[#allocation2 + $0x189] sm:$0xff]  ;;  %v7809_v49 = vld [vmem:[#allocation2 + $0xd8] sm:$0xff] }
 0x1a8   : > { %8862 = vst [vmem:[#allocation39_spill] sm:$0xff] %v7671_v32  ;;  %v7889_v46 = vld [vmem:[#allocation2 + $0x150] sm:$0xff]  ;;  %v7903_v25 = vld [vmem:[#allocation2 + $0x15a] sm:$0xff] }
 0x1a9   : > { %v7666_v53 = vld [vmem:[#allocation2 + $0x181] sm:$0xff]  ;;  %v7895_v12 = vld [vmem:[#allocation2 + $0x152] sm:$0xff]  ;;  %v7911_v48 = vld [vmem:[#allocation2 + $0x16a] sm:$0xff] }
 0x1aa   : > { %8861 = vst [vmem:[#allocation38_spill] sm:$0xff] %v7666_v53  ;;  %5875 = vmatprep.mubr.msk.f32.mxu1 %vm909_vm1, %v7666_v53  ;;  %5681 = vmatmul.mubr.msk.f32.vlgmr.msra.gmra.mrb[32].mxu0 %vm909_vm1, %v999_v30  ;;  %v7815_v30 = vld [vmem:[#allocation2 + $0xda] sm:$0xff]  ;;  %v7823_v53 = vld [vmem:[#allocation2 + $0xe2] sm:$0xff]  ;;  %v7915_v9 = vld [vmem:[#allocation2 + $0x170] sm:$0xff] }
 0x1ab   : > { %5876 = vmatmul.mubr.msk.f32.gmra.mrb[30].mxu1 %vm909_vm1, %v7671_v32  ;;  %5683 = vmatprep.mubr.msk.f32.mxu0 %vm909_vm1, %v7673_v62  ;;  %v7819_v32 = vld [vmem:[#allocation2 + $0xe0] sm:$0xff]  ;;  %v7919_v2 = vld [vmem:[#allocation2 + $0x172] sm:$0xff]  ;;  %v7929_v62 = vld [vmem:[#allocation2 + $0x18a] sm:$0xff] }
 0x1ac   : > { %5880 = vmatprep.mubr.msk.f32.mxu1 %vm909_vm1, %v7681_v17  ;;  %5729 = vmatpush3.msra.mxu0 %v7347_v11  ;;  %v7701_v11 = vld [vmem:[#allocation2 + $0x32] sm:$0xff]  ;;  %8865 = vst [vmem:[#allocation42_spill] sm:$0xff] %v7919_v2  ;;  %v7923_v61 = vld [vmem:[#allocation2 + $0x182] sm:$0xff]  ;;  %8867 = vst [vmem:[#allocation44_spill] sm:$0xff] %v7929_v62 }
 0x1ad   : > { %5778 = vmatprep.subr.mxu0 %v7675_v13  ;;  %8866 = vst [vmem:[#allocation43_spill] sm:$0xff] %v7923_v61 }
 0x1ae   : > { %5684 = vmatmul.mubr.msk.f32.gmra.mrb[34].mxu0 %vm909_vm1, %v7686_v0  ;;  %v1708_v0 = vld [vmem:[#allocation2 + $0xa] sm:$0xff] }
 0x1af   : > { %5881 = vmatmul.mubr.msk.f32.vlgmr.msra.gmra.mrb[0].mxu1 %vm909_vm1, %v7691_v7  ;;  %5686 = vmatprep.mubr.msk.f32.mxu0 %vm909_vm1, %v7693_v51 }
 0x1b0   : > { %5929 = vmatpush3.msra.mxu1 %v7308_v20  ;;  %5883 = vmatprep.mubr.msk.f32.mxu1 %vm909_vm1, %v7701_v11  ;;  %v7719_v20 = vld [vmem:[#allocation2 + $0x4a] sm:$0xff] }
 0x1b1   : > { %5978 = vmatprep.subr.mxu1 %v7695_v40 }
 0x1b2   : > { %5687 = vmatmul.mubr.msk.f32.gmra.mrb[36].mxu0 %vm909_vm1, %v7706_v10 }
 0x1b3   : > { %5884 = vmatmul.mubr.msk.f32.gmra.mrb[2].mxu1 %vm909_vm1, %v7711_v15  ;;  %5689 = vmatprep.mubr.msk.f32.mxu0 %vm909_vm1, %v7713_v29 }
 0x1b4   : > { %5886 = vmatprep.mubr.msk.f32.mxu1 %vm909_vm1, %v7719_v20 }
 0x1b6   : > { %5690 = vmatmul.mubr.msk.f32.gmra.mrb[38].mxu0 %vm909_vm1, %v7723_v16 }
 0x1b7   : > { %5887 = vmatmul.mubr.msk.f32.gmra.mrb[4].mxu1 %vm909_vm1, %v7727_v43  ;;  %5692 = vmatprep.mubr.msk.f32.mxu0 %vm909_vm1, %v7729_v44 }
 0x1b8   : > { %5889 = vmatprep.mubr.msk.f32.mxu1 %vm909_vm1, %v7735_v60 }
 0x1ba   : > { %5693 = vmatmul.mubr.msk.f32.gmra.mrb[40].mxu0 %vm909_vm1, %v7739_v45 }
 0x1bb   : > { %5890 = vmatmul.mubr.msk.f32.gmra.mrb[6].mxu1 %vm909_vm1, %v7743_v27  ;;  %5695 = vmatprep.mubr.msk.f32.mxu0 %vm909_vm1, %v7745_v23 }
 0x1bc   : > { %5892 = vmatprep.mubr.msk.f32.mxu1 %vm909_vm1, %v7751_v26 }
 0x1be   : > { %5696 = vmatmul.mubr.msk.f32.gmra.mrb[42].mxu0 %vm909_vm1, %v7755_v19 }
 0x1bf   : > { %5893 = vmatmul.mubr.msk.f32.gmra.mrb[8].mxu1 %vm909_vm1, %v7759_v33  ;;  %5698 = vmatprep.mubr.msk.f32.mxu0 %vm909_vm1, %v7761_v24 }
 0x1c0   : > { %5895 = vmatprep.mubr.msk.f32.mxu1 %vm909_vm1, %v7767_v36 }
 0x1c2   : > { %5699 = vmatmul.mubr.msk.f32.gmra.mrb[44].mxu0 %vm909_vm1, %v7771_v42 }
 0x1c3   : > { %5896 = vmatmul.mubr.msk.f32.gmra.mrb[10].mxu1 %vm909_vm1, %v7775_v34  ;;  %5701 = vmatprep.mubr.msk.f32.mxu0 %vm909_vm1, %v7777_v37 }
 0x1c4   : > { %5898 = vmatprep.mubr.msk.f32.mxu1 %vm909_vm1, %v7783_v41 }
 0x1c6   : > { %5702 = vmatmul.mubr.msk.f32.gmra.mrb[46].mxu0 %vm909_vm1, %v7787_v59 }
 0x1c7   : > { %5899 = vmatmul.mubr.msk.f32.gmra.mrb[12].mxu1 %vm909_vm1, %v7791_v56  ;;  %5704 = vmatprep.mubr.msk.f32.mxu0 %vm909_vm1, %v7793_v39 }
 0x1c8   : > { %5901 = vmatprep.mubr.msk.f32.mxu1 %vm909_vm1, %v7799_v63 }
 0x1ca   : > { %5705 = vmatmul.mubr.msk.f32.gmra.mrb[48].mxu0 %vm909_vm1, %v7803_v47 }
 0x1cb   : > { %5902 = vmatmul.mubr.msk.f32.gmra.mrb[14].mxu1 %vm909_vm1, %v7807_v5  ;;  %5707 = vmatprep.mubr.msk.f32.mxu0 %vm909_vm1, %v7809_v49 }
 0x1cc   : > { %5904 = vmatprep.mubr.msk.f32.mxu1 %vm909_vm1, %v7815_v30 }
 0x1ce   : > { %5708 = vmatmul.mubr.msk.f32.gmra.mrb[50].mxu0 %vm909_vm1, %v7819_v32 }
 0x1cf   : > { %5905 = vmatmul.mubr.msk.f32.gmra.mrb[16].mxu1 %vm909_vm1, %v7823_v53  ;;  %5710 = vmatprep.mubr.msk.f32.mxu0 %vm909_vm1, %v7825_v38 }
 0x1d0   : > { %5907 = vmatprep.mubr.msk.f32.mxu1 %vm909_vm1, %v7831_v55 }
 0x1d2   : > { %5711 = vmatmul.mubr.msk.f32.gmra.mrb[52].mxu0 %vm909_vm1, %v7835_v18 }
 0x1d3   : > { %5908 = vmatmul.mubr.msk.f32.gmra.mrb[18].mxu1 %vm909_vm1, %v7839_v6  ;;  %5713 = vmatprep.mubr.msk.f32.mxu0 %vm909_vm1, %v7841_v58 }
 0x1d4   : > { %5910 = vmatprep.mubr.msk.f32.mxu1 %vm909_vm1, %v7847_v31 }
 0x1d6   : > { %5714 = vmatmul.mubr.msk.f32.gmra.mrb[54].mxu0 %vm909_vm1, %v7851_v57 }
 0x1d7   : > { %5911 = vmatmul.mubr.msk.f32.gmra.mrb[20].mxu1 %vm909_vm1, %v7855_v28  ;;  %5716 = vmatprep.mubr.msk.f32.mxu0 %vm909_vm1, %v7857_v8 }
 0x1d8   : > { %5913 = vmatprep.mubr.msk.f32.mxu1 %vm909_vm1, %v7863_v3 }
 0x1da   : > { %5717 = vmatmul.mubr.msk.f32.gmra.mrb[56].mxu0 %vm909_vm1, %v7867_v35 }
 0x1db   : > { %5914 = vmatmul.mubr.msk.f32.gmra.mrb[22].mxu1 %vm909_vm1, %v7871_v14  ;;  %5719 = vmatprep.mubr.msk.f32.mxu0 %vm909_vm1, %v7873_v50 }
 0x1dc   : > { %5916 = vmatprep.mubr.msk.f32.mxu1 %vm909_vm1, %v7879_v21 }
 0x1de   : > { %5720 = vmatmul.mubr.msk.f32.gmra.mrb[58].mxu0 %vm909_vm1, %v7883_v4 }
 0x1df   : > { %5917 = vmatmul.mubr.msk.f32.gmra.mrb[24].mxu1 %vm909_vm1, %v7887_v52  ;;  %5722 = vmatprep.mubr.msk.f32.mxu0 %vm909_vm1, %v7889_v46 }
 0x1e0   : > { %5919 = vmatprep.mubr.msk.f32.mxu1 %vm909_vm1, %v7895_v12 }
 0x1e2   : > { %5723 = vmatmul.mubr.msk.f32.gmra.mrb[60].mxu0 %vm909_vm1, %v7899_v22 }
 0x1e3   : > { %5920 = vmatmul.mubr.msk.f32.gmra.mrb[26].mxu1 %vm909_vm1, %v7903_v25  ;;  %5725 = vmatprep.mubr.msk.f32.mxu0 %vm909_vm1, %v7905_v1 }
 0x1e4   : > { %5922 = vmatprep.mubr.msk.f32.mxu1 %vm909_vm1, %v7911_v48 }
 0x1e6   : > { %5726 = vmatmul.mubr.msk.f32.gmra.mrb[62].mxu0 %vm909_vm1, %v7915_v9 }
 0x1e7   : > { %5923 = vmatmul.mubr.msk.f32.gmra.mrb[28].mxu1 %vm909_vm1, %v7919_v2  ;;  %5730 = vmatprep.mubr.msk.f32.mxu0 %vm909_vm1, %v1707_v54  ;;  %v7940_v54 = vld [vmem:[#allocation6 + $0x40] sm:$0xff] }
 0x1e8   : > { %5925 = vmatprep.mubr.msk.f32.mxu1 %vm909_vm1, %v7923_v61  ;;  %v6656_v61 = vld [vmem:[#allocation2 + $0x31] sm:$0xff] }
 0x1ea   : > { %5731 = vmatmul.mubr.msk.f32.vlgmr.msra.gmra.mrb[32].mxu0 %vm909_vm1, %v1708_v0  ;;  %v8058_v0 = vld [vmem:[#allocation2 + $0x188] sm:$0xff] }
 0x1eb   : > { %5926 = vmatmul.mubr.msk.f32.gmra.mrb[30].mxu1 %vm909_vm1, %v7929_v62  ;;  %5733 = vmatprep.mubr.msk.f32.mxu0 %vm909_vm1, %v7681_v17  ;;  %v3286_v17 = vld [vmem:[#allocation2 + $0x198] sm:$0xff]  ;;  %v8869_v62 = vld [vmem:[#allocation41_spill] sm:$0xff] }
 0x1ec   : > { %5930 = vmatprep.mubr.msk.f32.mxu1 %vm909_vm1, %v7693_v51  ;;  %5779 = vmatpush3.msra.mxu0 %v7675_v13  ;;  %v8052_v13 = vld [vmem:[#allocation2 + $0x180] sm:$0xff] }
 0x1ee   : > { %5734 = vmatmul.mubr.msk.f32.gmra.mrb[34].mxu0 %vm909_vm1, %v7691_v7  ;;  %v8868_v7 = vld [vmem:[#allocation40_spill] sm:$0xff] }
 0x1ef   : > { %5931 = vmatmul.mubr.msk.f32.vlgmr.msra.gmra.mrb[0].mxu1 %vm909_vm1, %v7706_v10  ;;  %5736 = vmatprep.mubr.msk.f32.mxu0 %vm909_vm1, %v7701_v11 }
 0x1f0   : > { %5979 = vmatpush3.msra.mxu1 %v7695_v40  ;;  %5933 = vmatprep.mubr.msk.f32.mxu1 %vm909_vm1, %v7713_v29  ;;  %v3287_v40 = vld [vmem:[#allocation2 + $0x1a0] sm:$0xff] }
 0x1f1   : > { %6028 = vmatprep.subr.mxu1 %v7940_v54 }
 0x1f2   : > { %5737 = vmatmul.mubr.msk.f32.gmra.mrb[36].mxu0 %vm909_vm1, %v7711_v15 }
 0x1f3   : > { %5934 = vmatmul.mubr.msk.f32.gmra.mrb[2].mxu1 %vm909_vm1, %v7723_v16  ;;  %5739 = vmatprep.mubr.msk.f32.mxu0 %vm909_vm1, %v7719_v20 }
 0x1f4   : > { %5936 = vmatprep.mubr.msk.f32.mxu1 %vm909_vm1, %v7729_v44 }
 0x1f6   : > { %5740 = vmatmul.mubr.msk.f32.gmra.mrb[38].mxu0 %vm909_vm1, %v7727_v43 }
 0x1f7   : > { %5937 = vmatmul.mubr.msk.f32.gmra.mrb[4].mxu1 %vm909_vm1, %v7739_v45  ;;  %5742 = vmatprep.mubr.msk.f32.mxu0 %vm909_vm1, %v7735_v60 }
 0x1f8   : > { %5939 = vmatprep.mubr.msk.f32.mxu1 %vm909_vm1, %v7745_v23 }
 0x1fa   : > { %5743 = vmatmul.mubr.msk.f32.gmra.mrb[40].mxu0 %vm909_vm1, %v7743_v27 }
 0x1fb   : > { %5940 = vmatmul.mubr.msk.f32.gmra.mrb[6].mxu1 %vm909_vm1, %v7755_v19  ;;  %5745 = vmatprep.mubr.msk.f32.mxu0 %vm909_vm1, %v7751_v26 }
 0x1fc   : > { %5942 = vmatprep.mubr.msk.f32.mxu1 %vm909_vm1, %v7761_v24 }
 0x1fe   : > { %5746 = vmatmul.mubr.msk.f32.gmra.mrb[42].mxu0 %vm909_vm1, %v7759_v33 }
 0x1ff   : > { %5943 = vmatmul.mubr.msk.f32.gmra.mrb[8].mxu1 %vm909_vm1, %v7771_v42  ;;  %5748 = vmatprep.mubr.msk.f32.mxu0 %vm909_vm1, %v7767_v36 }
 0x200   : > { %5945 = vmatprep.mubr.msk.f32.mxu1 %vm909_vm1, %v7777_v37 }
 0x202   : > { %5749 = vmatmul.mubr.msk.f32.gmra.mrb[44].mxu0 %vm909_vm1, %v7775_v34 }
 0x203   : > { %5946 = vmatmul.mubr.msk.f32.gmra.mrb[10].mxu1 %vm909_vm1, %v7787_v59  ;;  %5751 = vmatprep.mubr.msk.f32.mxu0 %vm909_vm1, %v7783_v41 }
 0x204   : > { %5948 = vmatprep.mubr.msk.f32.mxu1 %vm909_vm1, %v7793_v39 }
 0x206   : > { %5752 = vmatmul.mubr.msk.f32.gmra.mrb[46].mxu0 %vm909_vm1, %v7791_v56 }
 0x207   : > { %5949 = vmatmul.mubr.msk.f32.gmra.mrb[12].mxu1 %vm909_vm1, %v7803_v47  ;;  %5754 = vmatprep.mubr.msk.f32.mxu0 %vm909_vm1, %v7799_v63 }
 0x208   : > { %5951 = vmatprep.mubr.msk.f32.mxu1 %vm909_vm1, %v7809_v49 }
 0x20a   : > { %5755 = vmatmul.mubr.msk.f32.gmra.mrb[48].mxu0 %vm909_vm1, %v7807_v5 }
 0x20b   : > { %5952 = vmatmul.mubr.msk.f32.gmra.mrb[14].mxu1 %vm909_vm1, %v7819_v32  ;;  %5757 = vmatprep.mubr.msk.f32.mxu0 %vm909_vm1, %v7815_v30 }
 0x20c   : > { %5954 = vmatprep.mubr.msk.f32.mxu1 %vm909_vm1, %v7825_v38 }
 0x20e   : > { %5758 = vmatmul.mubr.msk.f32.gmra.mrb[50].mxu0 %vm909_vm1, %v7823_v53 }
 0x20f   : > { %5955 = vmatmul.mubr.msk.f32.gmra.mrb[16].mxu1 %vm909_vm1, %v7835_v18  ;;  %5760 = vmatprep.mubr.msk.f32.mxu0 %vm909_vm1, %v7831_v55 }
 0x210   : > { %5957 = vmatprep.mubr.msk.f32.mxu1 %vm909_vm1, %v7841_v58 }
 0x212   : > { %5761 = vmatmul.mubr.msk.f32.gmra.mrb[52].mxu0 %vm909_vm1, %v7839_v6 }
 0x213   : > { %5958 = vmatmul.mubr.msk.f32.gmra.mrb[18].mxu1 %vm909_vm1, %v7851_v57  ;;  %5763 = vmatprep.mubr.msk.f32.mxu0 %vm909_vm1, %v7847_v31 }
 0x214   : > { %5960 = vmatprep.mubr.msk.f32.mxu1 %vm909_vm1, %v7857_v8 }
 0x216   : > { %5764 = vmatmul.mubr.msk.f32.gmra.mrb[54].mxu0 %vm909_vm1, %v7855_v28 }
 0x217   : > { %5961 = vmatmul.mubr.msk.f32.gmra.mrb[20].mxu1 %vm909_vm1, %v7867_v35  ;;  %5766 = vmatprep.mubr.msk.f32.mxu0 %vm909_vm1, %v7863_v3 }
 0x218   : > { %5963 = vmatprep.mubr.msk.f32.mxu1 %vm909_vm1, %v7873_v50 }
 0x21a   : > { %5767 = vmatmul.mubr.msk.f32.gmra.mrb[56].mxu0 %vm909_vm1, %v7871_v14 }
 0x21b   : > { %5964 = vmatmul.mubr.msk.f32.gmra.mrb[22].mxu1 %vm909_vm1, %v7883_v4  ;;  %5769 = vmatprep.mubr.msk.f32.mxu0 %vm909_vm1, %v7879_v21 }
 0x21c   : > { %5966 = vmatprep.mubr.msk.f32.mxu1 %vm909_vm1, %v7889_v46 }
 0x21e   : > { %5770 = vmatmul.mubr.msk.f32.gmra.mrb[58].mxu0 %vm909_vm1, %v7887_v52 }
 0x21f   : > { %5967 = vmatmul.mubr.msk.f32.gmra.mrb[24].mxu1 %vm909_vm1, %v7899_v22  ;;  %5772 = vmatprep.mubr.msk.f32.mxu0 %vm909_vm1, %v7895_v12 }
 0x220   : > { %5969 = vmatprep.mubr.msk.f32.mxu1 %vm909_vm1, %v7905_v1 }
 0x222   : > { %5773 = vmatmul.mubr.msk.f32.gmra.mrb[60].mxu0 %vm909_vm1, %v7903_v25 }
 0x223   : > { %5970 = vmatmul.mubr.msk.f32.gmra.mrb[26].mxu1 %vm909_vm1, %v7915_v9  ;;  %5775 = vmatprep.mubr.msk.f32.mxu0 %vm909_vm1, %v7911_v48 }
 0x224   : > { %5972 = vmatprep.mubr.msk.f32.mxu1 %vm909_vm1, %v8052_v13 }
 0x226   : > { %5776 = vmatmul.mubr.msk.f32.gmra.mrb[62].mxu0 %vm909_vm1, %v7919_v2  ;;  %v6657_v2 = vld [vmem:[#allocation2 + $0x39] sm:$0xff] }
 0x227   : > { %5973 = vmatmul.mubr.msk.f32.gmra.mrb[28].mxu1 %vm909_vm1, %v8058_v0  ;;  %5780 = vmatprep.mubr.msk.f32.mxu0 %vm909_vm1, %v8868_v7 }
 0x228   : > { %5975 = vmatprep.mubr.msk.f32.mxu1 %vm909_vm1, %v3286_v17 }
 0x22a   : > { %5781 = vmatmul.mubr.msk.f32.vlgmr.msra.gmra.mrb[32].mxu0 %vm909_vm1, %v8869_v62  ;;  %v8870_v62 = vld [vmem:[#allocation12_spill] sm:$0xff] }
 0x22b   : > { %5976 = vmatmul.mubr.msk.f32.gmra.mrb[30].mxu1 %vm909_vm1, %v3287_v40  ;;  %5783 = vmatprep.mubr.msk.f32.mxu0 %vm909_vm1, %v7693_v51  ;;  %v8871_v51 = vld [vmem:[#allocation13_spill] sm:$0xff] }
 0x22c   : > { %5980 = vmatprep.mubr.msk.f32.mxu1 %vm909_vm1, %v6656_v61  ;;  %v8872_v61 = vld [vmem:[#allocation14_spill] sm:$0xff] }
 0x22e   : > { %5784 = vmatmul.mubr.msk.f32.gmra.mrb[34].mxu0 %vm909_vm1, %v7706_v10  ;;  %v8874_v10 = vld [vmem:[#allocation16_spill] sm:$0xff] }
 0x22f   : > { %5981 = vmatmul.mubr.msk.f32.vlgmr.msra.gmra.mrb[0].mxu1 %vm909_vm1, %v6657_v2  ;;  %5786 = vmatprep.mubr.msk.f32.mxu0 %vm909_vm1, %v7713_v29  ;;  %v8873_v2 = vld [vmem:[#allocation15_spill] sm:$0xff]  ;;  %v8875_v29 = vld [vmem:[#allocation17_spill] sm:$0xff] }
 0x230   : > { %6029 = vmatpush3.msra.mxu1 %v7940_v54  ;;  %5983 = vmatprep.mubr.msk.f32.mxu1 %vm909_vm1, %v8870_v62 }
 0x232   : > { %5787 = vmatmul.mubr.msk.f32.gmra.mrb[36].mxu0 %vm909_vm1, %v7723_v16  ;;  %v8876_v16 = vld [vmem:[#allocation18_spill] sm:$0xff] }
 0x233   : > { %5984 = vmatmul.mubr.msk.f32.gmra.mrb[2].mxu1 %vm909_vm1, %v8871_v51  ;;  %5789 = vmatprep.mubr.msk.f32.mxu0 %vm909_vm1, %v7729_v44  ;;  %v8877_v44 = vld [vmem:[#allocation19_spill] sm:$0xff] }
 0x234   : > { %5986 = vmatprep.mubr.msk.f32.mxu1 %vm909_vm1, %v8872_v61 }
 0x236   : > { %5790 = vmatmul.mubr.msk.f32.gmra.mrb[38].mxu0 %vm909_vm1, %v7739_v45  ;;  %v8878_v45 = vld [vmem:[#allocation20_spill] sm:$0xff] }
 0x237   : > { %5987 = vmatmul.mubr.msk.f32.gmra.mrb[4].mxu1 %vm909_vm1, %v8873_v2  ;;  %5792 = vmatprep.mubr.msk.f32.mxu0 %vm909_vm1, %v7745_v23  ;;  %v8879_v23 = vld [vmem:[#allocation21_spill] sm:$0xff] }
 0x238   : > { %5989 = vmatprep.mubr.msk.f32.mxu1 %vm909_vm1, %v8874_v10  ;;  %v8302_v10 = vld [vmem:[%s8786_s4] ss:$0 sm:$0xff] }
 0x23a   : > { %5793 = vmatmul.mubr.msk.f32.gmra.mrb[40].mxu0 %vm909_vm1, %v7755_v19  ;;  %v8880_v19 = vld [vmem:[#allocation22_spill] sm:$0xff] }
 0x23b   : > { %5990 = vmatmul.mubr.msk.f32.gmra.mrb[6].mxu1 %vm909_vm1, %v8875_v29  ;;  %5795 = vmatprep.mubr.msk.f32.mxu0 %vm909_vm1, %v7761_v24  ;;  %v8881_v24 = vld [vmem:[#allocation23_spill] sm:$0xff] }
 0x23c   : > { %5992 = vmatprep.mubr.msk.f32.mxu1 %vm909_vm1, %v8876_v16 }
 0x23e   : > { %5796 = vmatmul.mubr.msk.f32.gmra.mrb[42].mxu0 %vm909_vm1, %v7771_v42  ;;  %v8882_v42 = vld [vmem:[#allocation24_spill] sm:$0xff] }
 0x23f   : > { %5993 = vmatmul.mubr.msk.f32.gmra.mrb[8].mxu1 %vm909_vm1, %v8877_v44  ;;  %5798 = vmatprep.mubr.msk.f32.mxu0 %vm909_vm1, %v7777_v37  ;;  %v8883_v37 = vld [vmem:[#allocation25_spill] sm:$0xff] }
 0x240   : > { %5995 = vmatprep.mubr.msk.f32.mxu1 %vm909_vm1, %v8878_v45 }
 0x242   : > { %5799 = vmatmul.mubr.msk.f32.gmra.mrb[44].mxu0 %vm909_vm1, %v7787_v59  ;;  %v8884_v59 = vld [vmem:[#allocation26_spill] sm:$0xff] }
 0x243   : > { %5996 = vmatmul.mubr.msk.f32.gmra.mrb[10].mxu1 %vm909_vm1, %v8879_v23  ;;  %5801 = vmatprep.mubr.msk.f32.mxu0 %vm909_vm1, %v7793_v39  ;;  %v8885_v39 = vld [vmem:[#allocation27_spill] sm:$0xff] }
 0x244   : > { %5998 = vmatprep.mubr.msk.f32.mxu1 %vm909_vm1, %v8880_v19 }
 0x246   : > { %5802 = vmatmul.mubr.msk.f32.gmra.mrb[46].mxu0 %vm909_vm1, %v7803_v47  ;;  %v8886_v47 = vld [vmem:[#allocation28_spill] sm:$0xff] }
 0x247   : > { %5999 = vmatmul.mubr.msk.f32.gmra.mrb[12].mxu1 %vm909_vm1, %v8881_v24  ;;  %5804 = vmatprep.mubr.msk.f32.mxu0 %vm909_vm1, %v7809_v49  ;;  %v3674_v49 = vld [vmem:[#allocation2 + $0x1a1] sm:$0xff] }
 0x248   : > { %6001 = vmatprep.mubr.msk.f32.mxu1 %vm909_vm1, %v8882_v42 }
 0x24a   : > { %5805 = vmatmul.mubr.msk.f32.gmra.mrb[48].mxu0 %vm909_vm1, %v7819_v32  ;;  %v8887_v32 = vld [vmem:[#allocation29_spill] sm:$0xff] }
 0x24b   : > { %6002 = vmatmul.mubr.msk.f32.gmra.mrb[14].mxu1 %vm909_vm1, %v8883_v37  ;;  %5807 = vmatprep.mubr.msk.f32.mxu0 %vm909_vm1, %v7825_v38  ;;  %v8888_v38 = vld [vmem:[#allocation30_spill] sm:$0xff] }
 0x24c   : > { %6004 = vmatprep.mubr.msk.f32.mxu1 %vm909_vm1, %v8884_v59 }
 0x24e   : > { %5808 = vmatmul.mubr.msk.f32.gmra.mrb[50].mxu0 %vm909_vm1, %v7835_v18  ;;  %v8889_v18 = vld [vmem:[#allocation31_spill] sm:$0xff] }
 0x24f   : > { %6005 = vmatmul.mubr.msk.f32.gmra.mrb[16].mxu1 %vm909_vm1, %v8885_v39  ;;  %5810 = vmatprep.mubr.msk.f32.mxu0 %vm909_vm1, %v7841_v58  ;;  %v8890_v58 = vld [vmem:[#allocation32_spill] sm:$0xff] }
 0x250   : > { %6007 = vmatprep.mubr.msk.f32.mxu1 %vm909_vm1, %v8886_v47 }
 0x252   : > { %5811 = vmatmul.mubr.msk.f32.gmra.mrb[52].mxu0 %vm909_vm1, %v7851_v57  ;;  %v8891_v57 = vld [vmem:[#allocation33_spill] sm:$0xff] }
 0x253   : > { %6008 = vmatmul.mubr.msk.f32.gmra.mrb[18].mxu1 %vm909_vm1, %v8887_v32  ;;  %5813 = vmatprep.mubr.msk.f32.mxu0 %vm909_vm1, %v7857_v8  ;;  %v8892_v8 = vld [vmem:[#allocation34_spill] sm:$0xff] }
 0x254   : > { %6010 = vmatprep.mubr.msk.f32.mxu1 %vm909_vm1, %v8888_v38 }
 0x256   : > { %5814 = vmatmul.mubr.msk.f32.gmra.mrb[54].mxu0 %vm909_vm1, %v7867_v35  ;;  %v8893_v35 = vld [vmem:[#allocation35_spill] sm:$0xff] }
 0x257   : > { %6011 = vmatmul.mubr.msk.f32.gmra.mrb[20].mxu1 %vm909_vm1, %v8889_v18  ;;  %5816 = vmatprep.mubr.msk.f32.mxu0 %vm909_vm1, %v7873_v50  ;;  %v8894_v50 = vld [vmem:[#allocation36_spill] sm:$0xff] }
 0x258   : > { %6013 = vmatprep.mubr.msk.f32.mxu1 %vm909_vm1, %v8890_v58 }
 0x25a   : > { %5817 = vmatmul.mubr.msk.f32.gmra.mrb[56].mxu0 %vm909_vm1, %v7883_v4  ;;  %v8895_v4 = vld [vmem:[#allocation37_spill] sm:$0xff] }
 0x25b   : > { %6014 = vmatmul.mubr.msk.f32.gmra.mrb[22].mxu1 %vm909_vm1, %v8891_v57  ;;  %5819 = vmatprep.mubr.msk.f32.mxu0 %vm909_vm1, %v7889_v46  ;;  %v8896_v46 = vld [vmem:[#allocation38_spill] sm:$0xff] }
 0x25c   : > { %6016 = vmatprep.mubr.msk.f32.mxu1 %vm909_vm1, %v8892_v8 }
 0x25e   : > { %5820 = vmatmul.mubr.msk.f32.gmra.mrb[58].mxu0 %vm909_vm1, %v7899_v22  ;;  %v3673_v22 = vld [vmem:[#allocation2 + $0x199] sm:$0xff] }
 0x25f   : > { %6017 = vmatmul.mubr.msk.f32.gmra.mrb[24].mxu1 %vm909_vm1, %v8893_v35  ;;  %5822 = vmatprep.mubr.msk.f32.mxu0 %vm909_vm1, %v7905_v1  ;;  %v8897_v1 = vld [vmem:[#allocation39_spill] sm:$0xff] }
 0x260   : > { %6019 = vmatprep.mubr.msk.f32.mxu1 %vm909_vm1, %v8894_v50 }
 0x262   : > { %5823 = vmatmul.mubr.msk.f32.gmra.mrb[60].mxu0 %vm909_vm1, %v7915_v9  ;;  %v8898_v9 = vld [vmem:[#allocation42_spill] sm:$0xff] }
 0x263   : > { %6020 = vmatmul.mubr.msk.f32.gmra.mrb[26].mxu1 %vm909_vm1, %v8895_v4  ;;  %5825 = vmatprep.mubr.msk.f32.mxu0 %vm909_vm1, %v8052_v13 }
 0x264   : > { %6022 = vmatprep.mubr.msk.f32.mxu1 %vm909_vm1, %v8896_v46 }
 0x266   : > { %5826 = vmatmul.mubr.msk.f32.gmra.mrb[62].mxu0 %vm909_vm1, %v8058_v0 }
 0x267   : > { %6023 = vmatmul.mubr.msk.f32.gmra.mrb[28].mxu1 %vm909_vm1, %v8897_v1 }
 0x268   : > { %6025 = vmatprep.mubr.msk.f32.mxu1 %vm909_vm1, %v3673_v22 }
 0x26b   : > { %6026 = vmatmul.mubr.msk.f32.gmra.mrb[30].mxu1 %vm909_vm1, %v3674_v49 }
 0x26c   : > { %6030 = vmatprep.mubr.msk.f32.mxu1 %vm909_vm1, %v7701_v11 }
 0x26f   : > { %6031 = vmatmul.mubr.msk.f32.vlgmr.msra.gmra.mrb[0].mxu1 %vm909_vm1, %v7711_v15 }
 0x270   : > { %6033 = vmatprep.mubr.msk.f32.mxu1 %vm909_vm1, %v7719_v20 }
 0x273   : > { %6034 = vmatmul.mubr.msk.f32.gmra.mrb[2].mxu1 %vm909_vm1, %v7727_v43 }
 0x274   : > { %6036 = vmatprep.mubr.msk.f32.mxu1 %vm909_vm1, %v7735_v60 }
 0x277   : > { %6037 = vmatmul.mubr.msk.f32.gmra.mrb[4].mxu1 %vm909_vm1, %v7743_v27 }
 0x278   : > { %6039 = vmatprep.mubr.msk.f32.mxu1 %vm909_vm1, %v7751_v26 }
 0x27b   : > { %6040 = vmatmul.mubr.msk.f32.gmra.mrb[6].mxu1 %vm909_vm1, %v7759_v33 }
 0x27c   : > { %6042 = vmatprep.mubr.msk.f32.mxu1 %vm909_vm1, %v7767_v36 }
 0x27f   : > { %6043 = vmatmul.mubr.msk.f32.gmra.mrb[8].mxu1 %vm909_vm1, %v7775_v34 }
 0x280   : > { %6045 = vmatprep.mubr.msk.f32.mxu1 %vm909_vm1, %v7783_v41 }
 0x283   : > { %6046 = vmatmul.mubr.msk.f32.gmra.mrb[10].mxu1 %vm909_vm1, %v7791_v56 }
 0x284   : > { %6048 = vmatprep.mubr.msk.f32.mxu1 %vm909_vm1, %v7799_v63 }
 0x287   : > { %6049 = vmatmul.mubr.msk.f32.gmra.mrb[12].mxu1 %vm909_vm1, %v7807_v5 }
 0x288   : > { %6051 = vmatprep.mubr.msk.f32.mxu1 %vm909_vm1, %v7815_v30 }
 0x28b   : > { %6052 = vmatmul.mubr.msk.f32.gmra.mrb[14].mxu1 %vm909_vm1, %v7823_v53 }
 0x28c   : > { %6054 = vmatprep.mubr.msk.f32.mxu1 %vm909_vm1, %v7831_v55 }
 0x28f   : > { %6055 = vmatmul.mubr.msk.f32.gmra.mrb[16].mxu1 %vm909_vm1, %v7839_v6 }
 0x290   : > { %6057 = vmatprep.mubr.msk.f32.mxu1 %vm909_vm1, %v7847_v31 }
 0x293   : > { %6058 = vmatmul.mubr.msk.f32.gmra.mrb[18].mxu1 %vm909_vm1, %v7855_v28 }
 0x294   : > { %6060 = vmatprep.mubr.msk.f32.mxu1 %vm909_vm1, %v7863_v3  ;;  %v8899_v3 = vld [vmem:[#allocation43_spill] sm:$0xff] }
 0x297   : > { %6061 = vmatmul.mubr.msk.f32.gmra.mrb[20].mxu1 %vm909_vm1, %v7871_v14  ;;  %v4060_v14 = vld [vmem:[#allocation2 + $0x19a] sm:$0xff] }
 0x298   : > { %6063 = vmatprep.mubr.msk.f32.mxu1 %vm909_vm1, %v7879_v21  ;;  %v8900_v21 = vld [vmem:[#allocation44_spill] sm:$0xff] }
 0x29b   : > { %6064 = vmatmul.mubr.msk.f32.gmra.mrb[22].mxu1 %vm909_vm1, %v7887_v52  ;;  %v4061_v52 = vld [vmem:[#allocation2 + $0x1a2] sm:$0xff] }
 0x29c   : > { %6066 = vmatprep.mubr.msk.f32.mxu1 %vm909_vm1, %v7895_v12 }
 0x29f   : > { %6067 = vmatmul.mubr.msk.f32.gmra.mrb[24].mxu1 %vm909_vm1, %v7903_v25 }
 0x2a0   : > { %6069 = vmatprep.mubr.msk.f32.mxu1 %vm909_vm1, %v7911_v48 }
 0x2a3   : > { %6070 = vmatmul.mubr.msk.f32.gmra.mrb[26].mxu1 %vm909_vm1, %v8898_v9 }
 0x2a4   : > { %6072 = vmatprep.mubr.msk.f32.mxu1 %vm909_vm1, %v8899_v3 }
 0x2a7   : > { %6073 = vmatmul.mubr.msk.f32.gmra.mrb[28].mxu1 %vm909_vm1, %v8900_v21 }
 0x2a8   : > { %6075 = vmatprep.mubr.msk.f32.mxu1 %vm909_vm1, %v4060_v14 }
 0x2ab   : > { %6076 = vmatmul.mubr.msk.f32.gmra.mrb[30].mxu1 %vm909_vm1, %v4061_v52 }
 0x2fd   : > { %v5782_v12 = vpop.f32.mrb[32].mxu0 }
 0x2fe   : > { %v2290_v25 = vpop.f32.mrb[33].mxu0 }
 0x301   : > { %v5785_v28 = vpop.f32.mrb[34].mxu0 }
 0x302   : > { %v2300_v31 = vpop.f32.mrb[35].mxu0 }
 0x305   : > { %v5788_v48 = vpop.f32.mrb[36].mxu0 }
 0x306   : > { %v2310_v6 = vpop.f32.mrb[37].mxu0 }
 0x309   : > { %v5791_v55 = vpop.f32.mrb[38].mxu0 }
 0x30a   : > { %v2320_v53 = vpop.f32.mrb[39].mxu0 }
 0x30d   : > { %v8251_v11 = vpop.f32.mrb[40].mxu0 }
 0x30e   : > { %v8253_v15 = vpop.f32.mrb[41].mxu0 }
 0x311   : > { %v8255_v20 = vpop.f32.mrb[42].mxu0 }
 0x312   : > { %v8257_v43 = vpop.f32.mrb[43].mxu0 }
 0x315   : > { %v8259_v60 = vpop.f32.mrb[44].mxu0 }
 0x316   : > { %v8261_v27 = vpop.f32.mrb[45].mxu0 }
 0x319   : > { %v8263_v26 = vpop.f32.mrb[46].mxu0 }
 0x31a   : > { %v8265_v33 = vpop.f32.mrb[47].mxu0 }
 0x31d   : > { %v8267_v36 = vpop.f32.mrb[48].mxu0 }
 0x31e   : > { %v8269_v34 = vpop.f32.mrb[49].mxu0 }
 0x321   : > { %v8271_v41 = vpop.f32.mrb[50].mxu0 }
 0x322   : > { %v8273_v56 = vpop.f32.mrb[51].mxu0 }
 0x325   : > { %v8275_v63 = vpop.f32.mrb[52].mxu0 }
 0x326   : > { %v8277_v5 = vpop.f32.mrb[53].mxu0 }
 0x329   : > { %v8279_v30 = vpop.f32.mrb[54].mxu0 }
 0x32a   : > { %v8281_v54 = vpop.f32.mrb[55].mxu0 }
 0x32d   : > { %v8283_v13 = vpop.f32.mrb[56].mxu0 }
 0x32e   : > { %v8285_v17 = vpop.f32.mrb[57].mxu0 }
 0x331   : > { %v8287_v0 = vpop.f32.mrb[58].mxu0 }
 0x332   : > { %v8289_v7 = vpop.f32.mrb[59].mxu0 }
 0x335   : > { %v8291_v40 = vpop.f32.mrb[60].mxu0 }
 0x336   : > { %v8293_v62 = vpop.f32.mrb[61].mxu0 }
 0x339   : > { %v8295_v51 = vpop.f32.mrb[62].mxu0 }
 0x33a   : > { %v8297_v61 = vpop.f32.mrb[63].mxu0 }
 0x342   : > { %v6032_v2 = vpop.f32.mrb[0].mxu1 }
 0x343   : > { %v6082_v29 = vadd.f32 %v6032_v2, %v5782_v12  ;;  %v4226_v16 = vpop.f32.mrb[1].mxu1 }
 0x344   : > { %v6083_v44 = vadd.f32 %v4226_v16, %v2290_v25 }
 0x345   : > { %v8305_v45 = vadd.f32 %v6082_v29, %v8302_v10 }
 0x346   : > { %v8308_v23 = vadd.f32 %v6083_v44, %v8302_v10  ;;  %v6035_v19 = vpop.f32.mrb[2].mxu1 }
 0x347   : > { %v4457_v24 = vmin.f32 %v8305_v45, 20.0  ;;  %v6084_v42 = vadd.f32 %v6035_v19, %v5785_v28  ;;  %v4236_v37 = vpop.f32.mrb[3].mxu1 }
 0x348   : > { %v4456_v59 = vmin.f32 %v8308_v23, 20.0  ;;  %v6085_v39 = vadd.f32 %v4236_v37, %v2300_v31 }
 0x349   : > { %v4490_v47 = vmul.f32 1.442695, %v4457_v24  ;;  %v8313_v32 = vadd.f32 %v6084_v42, %v8302_v10 }
 0x34a   : > { %v4488_v38 = vmul.f32 1.442695, %v4456_v59  ;;  %v8316_v18 = vadd.f32 %v6085_v39, %v8302_v10  ;;  %v6038_v58 = vpop.f32.mrb[4].mxu1 }
 0x34b   : > { %6528 = vpow2.f32 %v4490_v47  ;;  %v4459_v57 = vmin.f32 %v8313_v32, 20.0  ;;  %v6086_v8 = vadd.f32 %v6038_v58, %v5788_v48  ;;  %v4246_v35 = vpop.f32.mrb[5].mxu1 }
 0x34c   : > { %6530 = vpow2.f32 %v4488_v38  ;;  %v4458_v50 = vmin.f32 %v8316_v18, 20.0  ;;  %v6087_v4 = vadd.f32 %v4246_v35, %v2310_v6 }
 0x34d   : > { %v4494_v46 = vmul.f32 1.442695, %v4459_v57  ;;  %v8321_v22 = vadd.f32 %v6086_v8, %v8302_v10 }
 0x34e   : > { %v4492_v1 = vmul.f32 1.442695, %v4458_v50  ;;  %v8324_v49 = vadd.f32 %v6087_v4, %v8302_v10  ;;  %v6041_v9 = vpop.f32.mrb[6].mxu1 }
 0x34f   : > { %6532 = vpow2.f32 %v4494_v46  ;;  %v4461_v3 = vmin.f32 %v8321_v22, 20.0  ;;  %v6088_v14 = vadd.f32 %v6041_v9, %v5791_v55  ;;  %v4256_v21 = vpop.f32.mrb[7].mxu1 }
 0x350   : > { %6534 = vpow2.f32 %v4492_v1  ;;  %v4460_v52 = vmin.f32 %v8324_v49, 20.0  ;;  %v6089_v12 = vadd.f32 %v4256_v21, %v2320_v53 }
 0x351   : > { %v4498_v25 = vmul.f32 1.442695, %v4461_v3  ;;  %v8329_v28 = vadd.f32 %v6088_v14, %v8302_v10 }
 0x352   : > { %v4496_v31 = vmul.f32 1.442695, %v4460_v52  ;;  %v8332_v48 = vadd.f32 %v6089_v12, %v8302_v10  ;;  %v6044_v6 = vpop.f32.mrb[8].mxu1 }
 0x353   : > { %6536 = vpow2.f32 %v4498_v25  ;;  %v4463_v2 = vmin.f32 %v8329_v28, 20.0  ;;  %v6090_v29 = vadd.f32 %v6044_v6, %v8251_v11  ;;  %v4266_v55 = vpop.f32.mrb[9].mxu1 }
 0x354   : > { %6538 = vpow2.f32 %v4496_v31  ;;  %v4462_v16 = vmin.f32 %v8332_v48, 20.0  ;;  %v6091_v53 = vadd.f32 %v4266_v55, %v8253_v15 }
 0x355   : > { %v6529_v44 = vpop.eup %6528  ;;  %v4502_v19 = vmul.f32 1.442695, %v4463_v2  ;;  %v8339_v24 = vadd.f32 %v6090_v29, %v8302_v10 }
 0x356   : > { %v6531_v42 = vpop.eup %6530  ;;  %v4553_v37 = vadd.f32 2.0, %v6529_v44  ;;  %v4500_v59 = vmul.f32 1.442695, %v4462_v16  ;;  %v8342_v39 = vadd.f32 %v6091_v53, %v8302_v10  ;;  %v6047_v47 = vpop.f32.mrb[10].mxu1 }
 0x357   : > { %v4552_v38 = vadd.f32 2.0, %v6531_v42  ;;  %6540 = vpow2.f32 %v4502_v19  ;;  %v4465_v11 = vmin.f32 %v8339_v24, 20.0  ;;  %v6092_v58 = vadd.f32 %v6047_v47, %v8255_v20  ;;  %v4276_v57 = vpop.f32.mrb[11].mxu1 }
 0x358   : > { %v8346_v15 = vmul.f32 %v6529_v44, %v4553_v37  ;;  %6542 = vpow2.f32 %v4500_v59  ;;  %v4464_v8 = vmin.f32 %v8342_v39, 20.0  ;;  %v6093_v35 = vadd.f32 %v4276_v57, %v8257_v43 }
 0x359   : > { %v6533_v50 = vpop.eup %6532  ;;  %v8350_v4 = vmul.f32 %v6531_v42, %v4552_v38  ;;  %v4506_v46 = vmul.f32 1.442695, %v4465_v11  ;;  %v8353_v1 = vadd.f32 %v6092_v58, %v8302_v10 }
 0x35a   : > { %v6535_v9 = vpop.eup %6534  ;;  %v4617_v3 = vadd.f32 2.0, %v8346_v15  ;;  %v4555_v14 = vadd.f32 2.0, %v6533_v50  ;;  %v4504_v20 = vmul.f32 1.442695, %v4464_v8  ;;  %v8357_v21 = vadd.f32 %v6093_v35, %v8302_v10  ;;  %v6050_v52 = vpop.f32.mrb[12].mxu1 }
 0x35b   : > { %v4616_v12 = vadd.f32 2.0, %v8350_v4  ;;  %v4554_v25 = vadd.f32 2.0, %v6535_v9  ;;  %6544 = vpow2.f32 %v4506_v46  ;;  %v4467_v43 = vmin.f32 %v8353_v1, 20.0  ;;  %v4286_v31 = vpop.f32.mrb[13].mxu1 }
 0x35c   : > { %6546 = vrcp.f32 %v4617_v3  ;;  %v8361_v6 = vmul.f32 %v6533_v50, %v4555_v14  ;;  %v4466_v2 = vmin.f32 %v8357_v21, 20.0  ;;  %v6094_v29 = vadd.f32 %v6050_v52, %v8259_v60 }
 0x35d   : > { %v6537_v55 = vpop.eup %6536  ;;  %6548 = vrcp.f32 %v4616_v12  ;;  %v8365_v16 = vmul.f32 %v6535_v9, %v4554_v25  ;;  %v4510_v53 = vmul.f32 1.442695, %v4467_v43  ;;  %v6095_v44 = vadd.f32 %v4286_v31, %v8261_v27 }
 0x35e   : > { %v6539_v19 = vpop.eup %6538  ;;  %v4619_v42 = vadd.f32 2.0, %v8361_v6  ;;  %v4557_v37 = vadd.f32 2.0, %v6537_v55  ;;  %6550 = vpow2.f32 %v4504_v20  ;;  %v4508_v59 = vmul.f32 1.442695, %v4466_v2  ;;  %v6053_v47 = vpop.f32.mrb[14].mxu1 }
 0x35f   : > { %v4618_v38 = vadd.f32 2.0, %v8365_v16  ;;  %v4556_v11 = vadd.f32 2.0, %v6539_v19  ;;  %6552 = vpow2.f32 %v4510_v53  ;;  %v8371_v60 = vadd.f32 %v6094_v29, %v8302_v10  ;;  %v4296_v58 = vpop.f32.mrb[15].mxu1 }
 0x360   : > { %6554 = vrcp.f32 %v4619_v42  ;;  %v8373_v57 = vmul.f32 %v6537_v55, %v4557_v37  ;;  %v8376_v27 = vadd.f32 %v6095_v44, %v8302_v10  ;;  %v6096_v8 = vadd.f32 %v6053_v47, %v8263_v26 }
 0x361   : > { %v6541_v35 = vpop.eup %6540  ;;  %6556 = vrcp.f32 %v4618_v38  ;;  %v8379_v50 = vmul.f32 %v6539_v19, %v4556_v11  ;;  %v4469_v46 = vmin.f32 %v8371_v60, 20.0  ;;  %v6097_v9 = vadd.f32 %v4296_v58, %v8265_v33 }
 0x362   : > { %v6543_v3 = vpop.eup %6542  ;;  %v4621_v14 = vadd.f32 2.0, %v8373_v57  ;;  %v4559_v20 = vadd.f32 2.0, %v6541_v35  ;;  %6558 = vpow2.f32 %v4508_v59  ;;  %v4468_v52 = vmin.f32 %v8376_v27, 20.0  ;;  %v6056_v12 = vpop.f32.mrb[16].mxu1 }
 0x363   : > { %v4620_v25 = vadd.f32 2.0, %v8379_v50  ;;  %v4558_v43 = vadd.f32 2.0, %v6543_v3  ;;  %v4514_v26 = vmul.f32 1.442695, %v4469_v46  ;;  %v8387_v31 = vadd.f32 %v6096_v8, %v8302_v10  ;;  %v4306_v2 = vpop.f32.mrb[17].mxu1 }
 0x364   : > { %6560 = vrcp.f32 %v4621_v14  ;;  %v8389_v29 = vmul.f32 %v6541_v35, %v4559_v20  ;;  %v4512_v33 = vmul.f32 1.442695, %v4468_v52  ;;  %v8392_v55 = vadd.f32 %v6097_v9, %v8302_v10 }
 0x365   : > { %v6545_v53 = vpop.eup %6544  ;;  %6562 = vrcp.f32 %v4620_v25  ;;  %v8394_v44 = vmul.f32 %v6543_v3, %v4558_v43  ;;  %v4471_v19 = vmin.f32 %v8387_v31, 20.0  ;;  %v6098_v42 = vadd.f32 %v6056_v12, %v8267_v36 }
 0x366   : > { %v6547_v37 = vpop.eup %6546  ;;  %v4623_v59 = vadd.f32 2.0, %v8389_v29  ;;  %v4561_v47 = vadd.f32 2.0, %v6545_v53  ;;  %6564 = vpow2.f32 %v4514_v26  ;;  %v4470_v38 = vmin.f32 %v8392_v55, 20.0  ;;  %v6059_v11 = vpop.f32.mrb[18].mxu1 }
 0x367   : > { %v6549_v58 = vpop.eup %6548  ;;  %v4651_v8 = vmul.f32 %v6547_v37, %v8346_v15  ;;  %v4622_v35 = vadd.f32 2.0, %v8394_v44  ;;  %6566 = vpow2.f32 %v4512_v33  ;;  %v4518_v46 = vmul.f32 1.442695, %v4471_v19  ;;  %v8402_v9 = vpop.f32.mrb[19].mxu1  ;;  %v6658_v37 = vld [vmem:[%s7009_s7 + $0x8] sm:$0xff] }
 0x368   : > { %v6551_v3 = vpop.eup %6550  ;;  %v4649_v36 = vmul.f32 %v6549_v58, %v8350_v4  ;;  %6568 = vrcp.f32 %v4623_v59  ;;  %v8405_v14 = vmul.f32 %v6545_v53, %v4561_v47  ;;  %v4516_v20 = vmul.f32 1.442695, %v4470_v38  ;;  %v6659_v58 = vld [vmem:[%s7009_s7] sm:$0xff] }
 0x369   : > { %v6553_v52 = vpop.eup %6552  ;;  %v4713_v12 = vmul.f32 %v4651_v8, %v8305_v45  ;;  %6570 = vrcp.f32 %v4622_v35  ;;  %v4560_v25 = vadd.f32 2.0, %v6551_v3  ;;  %v8409_v15 = vadd.f32 %v6098_v42, %v8302_v10 }
 0x36a   : > { %v6555_v43 = vpop.eup %6554  ;;  %v4712_v26 = vmul.f32 %v4649_v36, %v8308_v23  ;;  %v4625_v33 = vadd.f32 2.0, %v8405_v14  ;;  %v4563_v4 = vadd.f32 2.0, %v6553_v52  ;;  %6572 = vpow2.f32 %v4518_v46  ;;  %v8413_v53 = vpop.f32.mrb[20].mxu1 }
 0x36b   : > { %v6557_v19 = vpop.eup %6556  ;;  %v4745_v59 = vadd.f32 %v6658_v37, %v4713_v12  ;;  %v4655_v45 = vmul.f32 %v6555_v43, %v8361_v6  ;;  %v8417_v47 = vmul.f32 %v6551_v3, %v4560_v25  ;;  %6574 = vpow2.f32 %v4516_v20  ;;  %v8419_v42 = vpop.f32.mrb[21].mxu1 }
 0x36c   : > { %v6559_v38 = vpop.eup %6558  ;;  %v4744_v23 = vadd.f32 %v6659_v58, %v4712_v26  ;;  %v4653_v8 = vmul.f32 %v6557_v19, %v8365_v16  ;;  %6576 = vrcp.f32 %v4625_v33  ;;  %v8423_v35 = vmul.f32 %v6553_v52, %v4563_v4  ;;  %v6660_v26 = vld [vmem:[%s7009_s7 + $0x18] sm:$0xff] }
 0x36d   : > { %4777 = vst.msk [vmem:[%s8427_s29 + $0x8] sm:$0xff] %vm299_vm0, %v4745_v59  ;;  %v4715_v6 = vmul.f32 %v4655_v45, %v8313_v32  ;;  %v4624_v46 = vadd.f32 2.0, %v8417_v47  ;;  %v4562_v3 = vadd.f32 2.0, %v6559_v38  ;;  %v4473_v36 = vmin.f32 %v8409_v15, 20.0  ;;  %v6661_v59 = vld [vmem:[%s7009_s7 + $0x10] sm:$0xff] }
 0x36e   : > { %v6561_v16 = vpop.eup %6560  ;;  %4776 = vst.msk [vmem:[%s8427_s29] sm:$0xff] %vm299_vm0, %v4744_v23  ;;  %v4714_v20 = vmul.f32 %v4653_v8, %v8316_v18  ;;  %v4627_v52 = vadd.f32 2.0, %v8423_v35  ;;  %v6099_v12 = vadd.f32 %v4306_v2, %v8269_v34  ;;  %v6100_v25 = vadd.f32 %v6059_v11, %v8271_v41  ;;  %v8440_v43 = vpop.f32.mrb[22].mxu1 }
 0x36f   : > { %v6563_v32 = vpop.eup %6562  ;;  %v4747_v33 = vadd.f32 %v6660_v26, %v4715_v6  ;;  %v4659_v4 = vmul.f32 %v6561_v16, %v8373_v57  ;;  %6578 = vrcp.f32 %v4624_v46  ;;  %v8444_v19 = vmul.f32 %v6559_v38, %v4562_v3  ;;  %v8446_v37 = vpop.f32.mrb[23].mxu1  ;;  %v6662_v3 = vld [vmem:[%s7009_s7 + $0x28] sm:$0xff] }
 0x370   : > { %v6565_v18 = vpop.eup %6564  ;;  %v4746_v45 = vadd.f32 %v6661_v59, %v4714_v20  ;;  %v4657_v34 = vmul.f32 %v6563_v32, %v8379_v50  ;;  %6580 = vrcp.f32 %v4627_v52  ;;  %v4522_v41 = vmul.f32 1.442695, %v4473_v36 }
 0x371   : > { %v6567_v2 = vpop.eup %6566  ;;  %4779 = vst.msk [vmem:[%s8427_s29 + $0x18] sm:$0xff] %vm299_vm0, %v4747_v33  ;;  %v4717_v11 = vmul.f32 %v4659_v4, %v8321_v22  ;;  %v4626_v57 = vadd.f32 2.0, %v8444_v19  ;;  %v4565_v58 = vadd.f32 2.0, %v6565_v18  ;;  %v8455_v38 = vadd.f32 %v6099_v12, %v8302_v10  ;;  %v6663_v12 = vld [vmem:[%s7009_s7 + $0x20] sm:$0xff] }
 0x372   : > { %v6569_v23 = vpop.eup %6568  ;;  %4778 = vst.msk [vmem:[%s8427_s29 + $0x10] sm:$0xff] %vm299_vm0, %v4746_v45  ;;  %v4716_v50 = vmul.f32 %v4657_v34, %v8324_v49  ;;  %v4564_v8 = vadd.f32 2.0, %v6567_v2  ;;  %6582 = vpow2.f32 %v4522_v41  ;;  %v8461_v6 = vadd.f32 %v6100_v25, %v8302_v10  ;;  %v8463_v46 = vpop.f32.mrb[24].mxu1 }
 0x373   : > { %v6571_v22 = vpop.eup %6570  ;;  %v4749_v36 = vadd.f32 %v6662_v3, %v4717_v11  ;;  %v4663_v16 = vmul.f32 %v6569_v23, %v8389_v29  ;;  %6584 = vrcp.f32 %v4626_v57  ;;  %v8467_v20 = vmul.f32 %v6565_v18, %v4565_v58  ;;  %v8469_v52 = vpop.f32.mrb[25].mxu1  ;;  %v6664_v58 = vld [vmem:[%s7009_s7 + $0x38] sm:$0xff] }
 0x374   : > { %v6573_v49 = vpop.eup %6572  ;;  %v4748_v32 = vadd.f32 %v6663_v12, %v4716_v50  ;;  %v4661_v25 = vmul.f32 %v6571_v22, %v8394_v44  ;;  %v8473_v26 = vmul.f32 %v6567_v2, %v4564_v8  ;;  %v4472_v33 = vmin.f32 %v8455_v38, 20.0  ;;  %v6665_v22 = vld [vmem:[%s7009_s7 + $0x30] sm:$0xff] }
 0x375   : > { %v6575_v4 = vpop.eup %6574  ;;  %4781 = vst.msk [vmem:[%s8427_s29 + $0x28] sm:$0xff] %vm299_vm0, %v4749_v36  ;;  %v4719_v29 = vmul.f32 %v4663_v16, %v8329_v28  ;;  %v4629_v18 = vadd.f32 2.0, %v8467_v20  ;;  %v4567_v59 = vadd.f32 2.0, %v6573_v49  ;;  %v4475_v45 = vmin.f32 %v8461_v6, 20.0 }
 0x376   : > { %v6577_v34 = vpop.eup %6576  ;;  %4780 = vst.msk [vmem:[%s8427_s29 + $0x20] sm:$0xff] %vm299_vm0, %v4748_v32  ;;  %v4718_v44 = vmul.f32 %v4661_v25, %v8332_v48  ;;  %v4628_v41 = vadd.f32 2.0, %v8473_v26  ;;  %v4566_v2 = vadd.f32 2.0, %v6575_v4  ;;  %v4520_v11 = vmul.f32 1.442695, %v4472_v33  ;;  %v8485_v57 = vpop.f32.mrb[26].mxu1 }
 0x377   : > { %v4751_v28 = vadd.f32 %v6664_v58, %v4719_v29  ;;  %v4667_v23 = vmul.f32 %v6577_v34, %v8405_v14  ;;  %6586 = vrcp.f32 %v4629_v18  ;;  %v8489_v50 = vmul.f32 %v6573_v49, %v4567_v59  ;;  %v8491_v8 = vpop.f32.mrb[27].mxu1 }
 0x378   : > { %v4750_v3 = vadd.f32 %v6665_v22, %v4718_v44  ;;  %6588 = vrcp.f32 %v4628_v41  ;;  %v8494_v48 = vmul.f32 %v6575_v4, %v4566_v2  ;;  %v4526_v36 = vmul.f32 1.442695, %v4475_v45  ;;  %v6667_v2 = vld [vmem:[%s7009_s7 + $0x40] sm:$0xff] }
 0x379   : > { %v6579_v16 = vpop.eup %6578  ;;  %4783 = vst.msk [vmem:[%s8427_s29 + $0x38] sm:$0xff] %vm299_vm0, %v4751_v28  ;;  %v4721_v12 = vmul.f32 %v4667_v23, %v8339_v24  ;;  %v4631_v14 = vadd.f32 2.0, %v8489_v50  ;;  %6590 = vpow2.f32 %v4520_v11  ;;  %v6101_v49 = vadd.f32 %v8402_v9, %v8273_v56  ;;  %v6666_v24 = vld [vmem:[%s7009_s7 + $0x48] sm:$0xff] }
 0x37a   : > { %v6581_v32 = vpop.eup %6580  ;;  %4782 = vst.msk [vmem:[%s8427_s29 + $0x30] sm:$0xff] %vm299_vm0, %v4750_v3  ;;  %v4665_v25 = vmul.f32 %v6579_v16, %v8417_v47  ;;  %v4630_v33 = vadd.f32 2.0, %v8494_v48  ;;  %6592 = vpow2.f32 %v4526_v36  ;;  %v6102_v4 = vadd.f32 %v8413_v53, %v8275_v63  ;;  %v8508_v29 = vpop.f32.mrb[28].mxu1 }
 0x37b   : > { %v4753_v18 = vadd.f32 %v6666_v24, %v4721_v12  ;;  %v4671_v59 = vmul.f32 %v6581_v32, %v8423_v35  ;;  %6594 = vrcp.f32 %v4631_v14  ;;  %v8513_v56 = vadd.f32 %v6101_v49, %v8302_v10  ;;  %v8515_v9 = vpop.f32.mrb[29].mxu1 }
 0x37c   : > { %v6583_v47 = vpop.eup %6582  ;;  %v4720_v45 = vmul.f32 %v4665_v25, %v8342_v39  ;;  %6596 = vrcp.f32 %v4630_v33  ;;  %v8519_v63 = vadd.f32 %v6102_v4, %v8302_v10  ;;  %v6103_v53 = vadd.f32 %v8419_v42, %v8277_v5 }
 0x37d   : > { %v6585_v34 = vpop.eup %6584  ;;  %4785 = vst.msk [vmem:[%s8427_s29 + $0x48] sm:$0xff] %vm299_vm0, %v4753_v18  ;;  %v4723_v35 = vmul.f32 %v4671_v59, %v8353_v1  ;;  %v4569_v44 = vadd.f32 2.0, %v6583_v47  ;;  %v4474_v41 = vmin.f32 %v8513_v56, 20.0  ;;  %v6104_v39 = vadd.f32 %v8440_v43, %v8279_v30  ;;  %v6668_v1 = vld [vmem:[%s7009_s7 + $0x58] sm:$0xff] }
 0x37e   : > { %v4752_v11 = vadd.f32 %v6667_v2, %v4720_v45  ;;  %v4669_v58 = vmul.f32 %v6585_v34, %v8444_v19  ;;  %v4477_v28 = vmin.f32 %v8519_v63, 20.0  ;;  %v8533_v5 = vadd.f32 %v6103_v53, %v8302_v10  ;;  %v8535_v42 = vpop.f32.mrb[30].mxu1 }
 0x37f   : > { %v4755_v23 = vadd.f32 %v6668_v1, %v4723_v35  ;;  %v8538_v22 = vmul.f32 %v6583_v47, %v4569_v44  ;;  %v4524_v3 = vmul.f32 1.442695, %v4474_v41  ;;  %v8541_v30 = vadd.f32 %v6104_v39, %v8302_v10  ;;  %v8543_v43 = vpop.f32.mrb[31].mxu1  ;;  %v6670_v41 = vld [vmem:[%s7009_s7 + $0x68] sm:$0xff] }
 0x380   : > { %4784 = vst.msk [vmem:[%s8427_s29 + $0x40] sm:$0xff] %vm299_vm0, %v4752_v11  ;;  %v4722_v19 = vmul.f32 %v4669_v58, %v8357_v21  ;;  %v4530_v36 = vmul.f32 1.442695, %v4477_v28  ;;  %v4476_v16 = vmin.f32 %v8533_v5, 20.0  ;;  %v6105_v12 = vadd.f32 %v8446_v37, %v8281_v54  ;;  %v6669_v21 = vld [vmem:[%s7009_s7 + $0x50] sm:$0xff]  ;;  %v6671_v58 = vld [vmem:[%s7009_s7 + $0x60] sm:$0xff] }
 0x381   : > { %v6587_v14 = vpop.eup %6586  ;;  %4787 = vst.msk [vmem:[%s8427_s29 + $0x58] sm:$0xff] %vm299_vm0, %v4755_v23  ;;  %v4633_v49 = vadd.f32 2.0, %v8538_v22  ;;  %6598 = vpow2.f32 %v4524_v3  ;;  %v4479_v32 = vmin.f32 %v8541_v30, 20.0  ;;  %v6106_v25 = vadd.f32 %v8463_v46, %v8283_v13 }
 0x382   : > { %v6589_v33 = vpop.eup %6588  ;;  %v4754_v4 = vadd.f32 %v6669_v21, %v4722_v19  ;;  %v4675_v24 = vmul.f32 %v6587_v14, %v8467_v20  ;;  %6600 = vpow2.f32 %v4530_v36  ;;  %v4528_v18 = vmul.f32 1.442695, %v4476_v16  ;;  %v6672_v14 = vld [vmem:[%s7009_s7 + $0x78] sm:$0xff] }
 0x383   : > { %v6591_v54 = vpop.eup %6590  ;;  %v4673_v37 = vmul.f32 %v6589_v33, %v8473_v26  ;;  %6602 = vrcp.f32 %v4633_v49  ;;  %v4534_v59 = vmul.f32 1.442695, %v4479_v32  ;;  %v8561_v47 = vadd.f32 %v6105_v12, %v8302_v10  ;;  %v6673_v32 = vld [vmem:[%s7009_s7 + $0x70] sm:$0xff] }
 0x384   : > { %v6593_v45 = vpop.eup %6592  ;;  %4786 = vst.msk [vmem:[%s8427_s29 + $0x50] sm:$0xff] %vm299_vm0, %v4754_v4  ;;  %v4725_v13 = vmul.f32 %v4675_v24, %v8371_v60  ;;  %v4568_v46 = vadd.f32 2.0, %v6591_v54  ;;  %6604 = vpow2.f32 %v4528_v18  ;;  %v8567_v20 = vadd.f32 %v6106_v25, %v8302_v10 }
 0x385   : > { %v6595_v53 = vpop.eup %6594  ;;  %v4724_v26 = vmul.f32 %v4673_v37, %v8376_v27  ;;  %v4571_v34 = vadd.f32 2.0, %v6593_v45  ;;  %6606 = vpow2.f32 %v4534_v59  ;;  %v4478_v35 = vmin.f32 %v8561_v47, 20.0 }
 0x386   : > { %v6597_v44 = vpop.eup %6596  ;;  %v4757_v39 = vadd.f32 %v6670_v41, %v4725_v13  ;;  %v4679_v2 = vmul.f32 %v6595_v53, %v8489_v50  ;;  %v8573_v60 = vmul.f32 %v6591_v54, %v4568_v46  ;;  %v4481_v11 = vmin.f32 %v8567_v20, 20.0 }
 0x387   : > { %v4756_v28 = vadd.f32 %v6671_v58, %v4724_v26  ;;  %v4677_v1 = vmul.f32 %v6597_v44, %v8494_v48  ;;  %v8578_v27 = vmul.f32 %v6593_v45, %v4571_v34  ;;  %v4532_v23 = vmul.f32 1.442695, %v4478_v35 }
 0x388   : > { %4789 = vst.msk [vmem:[%s8427_s29 + $0x68] sm:$0xff] %vm299_vm0, %v4757_v39  ;;  %v4727_v3 = vmul.f32 %v4679_v2, %v8387_v31  ;;  %v4632_v19 = vadd.f32 2.0, %v8573_v60  ;;  %v4538_v50 = vmul.f32 1.442695, %v4481_v11  ;;  %v6107_v36 = vadd.f32 %v8469_v52, %v8285_v17  ;;  %v6674_v39 = vld [vmem:[%s7009_s7 + $0x88] sm:$0xff] }
 0x389   : > { %4788 = vst.msk [vmem:[%s8427_s29 + $0x60] sm:$0xff] %vm299_vm0, %v4756_v28  ;;  %v4726_v16 = vmul.f32 %v4677_v1, %v8392_v55  ;;  %v4635_v48 = vadd.f32 2.0, %v8578_v27  ;;  %6608 = vpow2.f32 %v4532_v23  ;;  %v6108_v12 = vadd.f32 %v8485_v57, %v8287_v0 }
 0x38a   : > { %v4759_v49 = vadd.f32 %v6672_v14, %v4727_v3  ;;  %6610 = vrcp.f32 %v4632_v19  ;;  %v8594_v31 = vadd.f32 %v6107_v36, %v8302_v10  ;;  %v6109_v17 = vadd.f32 %v8491_v8, %v8289_v7 }
 0x38b   : > { %v6599_v52 = vpop.eup %6598  ;;  %v4758_v55 = vadd.f32 %v6673_v32, %v4726_v16  ;;  %6612 = vrcp.f32 %v4635_v48  ;;  %v8600_v25 = vadd.f32 %v6108_v12, %v8302_v10  ;;  %v6110_v0 = vadd.f32 %v8508_v29, %v8291_v40 }
 0x38c   : > { %v6601_v57 = vpop.eup %6600  ;;  %4791 = vst.msk [vmem:[%s8427_s29 + $0x78] sm:$0xff] %vm299_vm0, %v4759_v49  ;;  %v4570_v33 = vadd.f32 2.0, %v6599_v52  ;;  %6614 = vpow2.f32 %v4538_v50  ;;  %v4480_v21 = vmin.f32 %v8594_v31, 20.0  ;;  %v8608_v4 = vadd.f32 %v6109_v17, %v8302_v10 }
 0x38d   : > { %v6603_v7 = vpop.eup %6602  ;;  %4790 = vst.msk [vmem:[%s8427_s29 + $0x70] sm:$0xff] %vm299_vm0, %v4758_v55  ;;  %v4573_v8 = vadd.f32 2.0, %v6601_v57  ;;  %v4483_v24 = vmin.f32 %v8600_v25, 20.0  ;;  %v8614_v18 = vadd.f32 %v6110_v0, %v8302_v10  ;;  %v6111_v40 = vadd.f32 %v8515_v9, %v8293_v62  ;;  %v6675_v0 = vld [vmem:[%s7009_s7 + $0x80] sm:$0xff] }
 0x38e   : > { %v6605_v29 = vpop.eup %6604  ;;  %v4683_v54 = vmul.f32 %v6603_v7, %v8538_v22  ;;  %v8619_v37 = vmul.f32 %v6599_v52, %v4570_v33  ;;  %v4536_v59 = vmul.f32 1.442695, %v4480_v21  ;;  %v4482_v45 = vmin.f32 %v8608_v4, 20.0 }
 0x38f   : > { %v6607_v13 = vpop.eup %6606  ;;  %v8622_v46 = vmul.f32 %v6601_v57, %v4573_v8  ;;  %v4572_v53 = vadd.f32 2.0, %v6605_v29  ;;  %v4542_v26 = vmul.f32 1.442695, %v4483_v24  ;;  %v4485_v34 = vmin.f32 %v8614_v18, 20.0 }
 0x390   : > { %v4729_v35 = vmul.f32 %v4683_v54, %v8409_v15  ;;  %v4634_v62 = vadd.f32 2.0, %v8619_v37  ;;  %v4575_v9 = vadd.f32 2.0, %v6607_v13  ;;  %6616 = vpow2.f32 %v4536_v59 }
 0x391   : > { %v4637_v22 = vadd.f32 2.0, %v8622_v46  ;;  %v8628_v44 = vmul.f32 %v6605_v29, %v4572_v53  ;;  %6618 = vpow2.f32 %v4542_v26  ;;  %v4540_v41 = vmul.f32 1.442695, %v4482_v45 }
 0x392   : > { %v4761_v2 = vadd.f32 %v6674_v39, %v4729_v35  ;;  %6620 = vrcp.f32 %v4634_v62  ;;  %v8631_v11 = vmul.f32 %v6607_v13, %v4575_v9  ;;  %v4546_v58 = vmul.f32 1.442695, %v4485_v34 }
 0x393   : > { %v6609_v28 = vpop.eup %6608  ;;  %6622 = vrcp.f32 %v4637_v22  ;;  %v4636_v15 = vadd.f32 2.0, %v8628_v44  ;;  %v8635_v1 = vadd.f32 %v6111_v40, %v8302_v10  ;;  %v6112_v23 = vadd.f32 %v8535_v42, %v8295_v51 }
 0x394   : > { %v6611_v3 = vpop.eup %6610  ;;  %4793 = vst.msk [vmem:[%s8427_s29 + $0x88] sm:$0xff] %vm299_vm0, %v4761_v2  ;;  %v4639_v19 = vadd.f32 2.0, %v8631_v11  ;;  %v4574_v50 = vadd.f32 2.0, %v6609_v28  ;;  %6624 = vpow2.f32 %v4540_v41  ;;  %v6113_v36 = vadd.f32 %v8543_v43, %v8297_v61 }
 0x395   : > { %v6613_v16 = vpop.eup %6612  ;;  %v4681_v48 = vmul.f32 %v6611_v3, %v8573_v60  ;;  %6626 = vrcp.f32 %v4636_v15  ;;  %v4484_v12 = vmin.f32 %v8635_v1, 20.0  ;;  %v8647_v14 = vadd.f32 %v6112_v23, %v8302_v10 }
 0x396   : > { %v6615_v51 = vpop.eup %6614  ;;  %v4687_v42 = vmul.f32 %v6613_v16, %v8578_v27  ;;  %6628 = vrcp.f32 %v4639_v19  ;;  %v8650_v49 = vmul.f32 %v6609_v28, %v4574_v50  ;;  %v8653_v17 = vadd.f32 %v6113_v36, %v8302_v10  ;;  %v6677_v28 = vld [vmem:[%s7009_s7 + $0x90] sm:$0xff] }
 0x397   : > { %v4728_v61 = vmul.f32 %v4681_v48, %v8455_v38  ;;  %v4577_v43 = vadd.f32 2.0, %v6615_v51  ;;  %6630 = vpow2.f32 %v4546_v58  ;;  %v4544_v60 = vmul.f32 1.442695, %v4484_v12  ;;  %v6676_v38 = vld [vmem:[%s7009_s7 + $0x98] sm:$0xff] }
 0x398   : > { %v4731_v52 = vmul.f32 %v4687_v42, %v8461_v6  ;;  %v4638_v32 = vadd.f32 2.0, %v8650_v49  ;;  %v4487_v55 = vmin.f32 %v8647_v14, 20.0  ;;  %v4486_v27 = vmin.f32 %v8653_v17, 20.0  ;;  %v6680_v42 = vld [vmem:[%s7009_s7 + $0xb8] sm:$0xff] }
 0x399   : > { %v4760_v57 = vadd.f32 %v6675_v0, %v4728_v61  ;;  %v8661_v33 = vmul.f32 %v6615_v51, %v4577_v43  ;;  %6632 = vpow2.f32 %v4544_v60 }
 0x39a   : > { %v6617_v10 = vpop.eup %6616  ;;  %v4763_v21 = vadd.f32 %v6676_v38, %v4731_v52  ;;  %6634 = vrcp.f32 %v4638_v32  ;;  %v4550_v7 = vmul.f32 1.442695, %v4487_v55  ;;  %v4548_v8 = vmul.f32 1.442695, %v4486_v27 }
 0x39b   : > { %v6619_v24 = vpop.eup %6618  ;;  %4792 = vst.msk [vmem:[%s8427_s29 + $0x80] sm:$0xff] %vm299_vm0, %v4760_v57  ;;  %v4641_v6 = vadd.f32 2.0, %v8661_v33  ;;  %v4576_v40 = vadd.f32 2.0, %v6617_v10 }
 0x39c   : > { %v6621_v29 = vpop.eup %6620  ;;  %4795 = vst.msk [vmem:[%s8427_s29 + $0x98] sm:$0xff] %vm299_vm0, %v4763_v21  ;;  %v4579_v54 = vadd.f32 2.0, %v6619_v24  ;;  %6636 = vpow2.f32 %v4550_v7 }
 0x39d   : > { %v6623_v59 = vpop.eup %6622  ;;  %v4685_v45 = vmul.f32 %v6621_v29, %v8619_v37  ;;  %6638 = vrcp.f32 %v4641_v6  ;;  %v8670_v13 = vmul.f32 %v6617_v10, %v4576_v40  ;;  %v6682_v40 = vld [vmem:[%s7009_s7 + $0xc8] sm:$0xff] }
 0x39e   : > { %v6625_v53 = vpop.eup %6624  ;;  %v4691_v26 = vmul.f32 %v6623_v59, %v8622_v46  ;;  %v4611_v34 = vmul.f32 %v6619_v24, %v4579_v54  ;;  %6640 = vpow2.f32 %v4548_v8 }
 0x39f   : > { %v6627_v35 = vpop.eup %6626  ;;  %v4730_v62 = vmul.f32 %v4685_v45, %v8513_v56  ;;  %v4640_v9 = vadd.f32 2.0, %v8670_v13  ;;  %v4578_v22 = vadd.f32 2.0, %v6625_v53  ;;  %v6678_v56 = vld [vmem:[%s7009_s7 + $0xa8] sm:$0xff] }
 0x3a0   : > { %v6629_v41 = vpop.eup %6628  ;;  %v4733_v37 = vmul.f32 %v4691_v26, %v8519_v63  ;;  %v4689_v39 = vmul.f32 %v6627_v35, %v8628_v44  ;;  %v4643_v2 = vadd.f32 2.0, %v4611_v34  ;;  %v6683_v26 = vld [vmem:[%s7009_s7 + $0xc0] sm:$0xff] }
 0x3a1   : > { %v6631_v58 = vpop.eup %6630  ;;  %v4762_v46 = vadd.f32 %v6677_v28, %v4730_v62  ;;  %v4695_v15 = vmul.f32 %v6629_v41, %v8631_v11  ;;  %6642 = vrcp.f32 %v4640_v9  ;;  %v4610_v23 = vmul.f32 %v6625_v53, %v4578_v22  ;;  %v6679_v11 = vld [vmem:[%s7009_s7 + $0xa0] sm:$0xff]  ;;  %v6684_v9 = vld [vmem:[%s7009_s7 + $0xd8] sm:$0xff]  ;;  %v6686_v28 = vld [vmem:[%s7009_s7 + $0xe8] sm:$0xff] }
 0x3a2   : > { %v4765_v3 = vadd.f32 %v6678_v56, %v4733_v37  ;;  %v4732_v19 = vmul.f32 %v4689_v39, %v8533_v5  ;;  %6644 = vrcp.f32 %v4643_v2  ;;  %v4581_v50 = vadd.f32 2.0, %v6631_v58  ;;  %v6687_v56 = vld [vmem:[%s7009_s7 + $0xe0] sm:$0xff] }
 0x3a3   : > { %v6633_v63 = vpop.eup %6632  ;;  %4794 = vst.msk [vmem:[%s8427_s29 + $0x90] sm:$0xff] %vm299_vm0, %v4762_v46  ;;  %v4735_v44 = vmul.f32 %v4695_v15, %v8541_v30  ;;  %v4642_v36 = vadd.f32 2.0, %v4610_v23 }
 0x3a4   : > { %v6635_v16 = vpop.eup %6634  ;;  %4797 = vst.msk [vmem:[%s8427_s29 + $0xa8] sm:$0xff] %vm299_vm0, %v4765_v3  ;;  %v4764_v48 = vadd.f32 %v6679_v11, %v4732_v19  ;;  %v4613_v12 = vmul.f32 %v6631_v58, %v4581_v50  ;;  %v4580_v51 = vadd.f32 2.0, %v6633_v63  ;;  %v6688_v50 = vld [vmem:[%s7009_s7 + $0xf8] sm:$0xff] }
 0x3a5   : > { %v4767_v5 = vadd.f32 %v6680_v42, %v4735_v44  ;;  %v4693_v61 = vmul.f32 %v6635_v16, %v8650_v49  ;;  %6646 = vrcp.f32 %v4642_v36  ;;  %v6681_v49 = vld [vmem:[%s7009_s7 + $0xb0] sm:$0xff] }
 0x3a6   : > { %v6637_v43 = vpop.eup %6636  ;;  %4796 = vst.msk [vmem:[%s8427_s29 + $0xa0] sm:$0xff] %vm299_vm0, %v4764_v48  ;;  %v4645_v60 = vadd.f32 2.0, %v4613_v12  ;;  %v4612_v30 = vmul.f32 %v6633_v63, %v4580_v51 }
 0x3a7   : > { %v6639_v52 = vpop.eup %6638  ;;  %4799 = vst.msk [vmem:[%s8427_s29 + $0xb8] sm:$0xff] %vm299_vm0, %v4767_v5  ;;  %v4734_v32 = vmul.f32 %v4693_v61, %v8561_v47  ;;  %v4583_v55 = vadd.f32 2.0, %v6637_v43 }
 0x3a8   : > { %v6641_v27 = vpop.eup %6640  ;;  %v4699_v0 = vmul.f32 %v6639_v52, %v8661_v33  ;;  %6648 = vrcp.f32 %v4645_v60  ;;  %v4644_v57 = vadd.f32 2.0, %v4612_v30 }
 0x3a9   : > { %v4766_v10 = vadd.f32 %v6681_v49, %v4734_v32  ;;  %v4615_v38 = vmul.f32 %v6637_v43, %v4583_v55  ;;  %v4582_v21 = vadd.f32 2.0, %v6641_v27 }
 0x3aa   : > { %v4737_v7 = vmul.f32 %v4699_v0, %v8567_v20  ;;  %6650 = vrcp.f32 %v4644_v57 }
 0x3ab   : > { %v6643_v8 = vpop.eup %6642  ;;  %4798 = vst.msk [vmem:[%s8427_s29 + $0xb0] sm:$0xff] %vm299_vm0, %v4766_v10  ;;  %v4647_v47 = vadd.f32 2.0, %v4615_v38  ;;  %v4614_v24 = vmul.f32 %v6641_v27, %v4582_v21 }
 0x3ac   : > { %v6645_v6 = vpop.eup %6644  ;;  %v4769_v33 = vadd.f32 %v6682_v40, %v4737_v7  ;;  %v4697_v29 = vmul.f32 %v6643_v8, %v8670_v13 }
 0x3ad   : > { %v4703_v54 = vmul.f32 %v6645_v6, %v4611_v34  ;;  %6652 = vrcp.f32 %v4647_v47  ;;  %v4646_v59 = vadd.f32 2.0, %v4614_v24 }
 0x3ae   : > { %4801 = vst.msk [vmem:[%s8427_s29 + $0xc8] sm:$0xff] %vm299_vm0, %v4769_v33  ;;  %v4736_v20 = vmul.f32 %v4697_v29, %v8594_v31 }
 0x3af   : > { %v6647_v45 = vpop.eup %6646  ;;  %v4739_v53 = vmul.f32 %v4703_v54, %v8600_v25  ;;  %6654 = vrcp.f32 %v4646_v59  ;;  %v6685_v25 = vld [vmem:[%s7009_s7 + $0xd0] sm:$0xff] }
 0x3b0   : > { %v4768_v35 = vadd.f32 %v6683_v26, %v4736_v20  ;;  %v4701_v62 = vmul.f32 %v6647_v45, %v4610_v23 }
 0x3b1   : > { %v4771_v13 = vadd.f32 %v6684_v9, %v4739_v53 }
 0x3b2   : > { %v6649_v34 = vpop.eup %6648  ;;  %4800 = vst.msk [vmem:[%s8427_s29 + $0xc0] sm:$0xff] %vm299_vm0, %v4768_v35  ;;  %v4738_v22 = vmul.f32 %v4701_v62, %v8608_v4 }
 0x3b3   : > { %4803 = vst.msk [vmem:[%s8427_s29 + $0xd8] sm:$0xff] %vm299_vm0, %v4771_v13  ;;  %v4707_v31 = vmul.f32 %v6649_v34, %v4613_v12 }
 0x3b4   : > { %v6651_v41 = vpop.eup %6650  ;;  %v4770_v37 = vadd.f32 %v6685_v25, %v4738_v22 }
 0x3b5   : > { %v4741_v39 = vmul.f32 %v4707_v31, %v8614_v18  ;;  %v4705_v2 = vmul.f32 %v6651_v41, %v4612_v30 }
 0x3b6   : > { %4802 = vst.msk [vmem:[%s8427_s29 + $0xd0] sm:$0xff] %vm299_vm0, %v4770_v37 }
 0x3b7   : > { %v6653_v58 = vpop.eup %6652  ;;  %v4773_v46 = vadd.f32 %v6686_v28, %v4741_v39  ;;  %v4740_v4 = vmul.f32 %v4705_v2, %v8635_v1 }
 0x3b8   : > { %v4711_v15 = vmul.f32 %v6653_v58, %v4615_v38 }
 0x3b9   : > { %v6655_v23 = vpop.eup %6654  ;;  %4805 = vst.msk [vmem:[%s8427_s29 + $0xe8] sm:$0xff] %vm299_vm0, %v4773_v46  ;;  %v4772_v18 = vadd.f32 %v6687_v56, %v4740_v4 }
 0x3ba   : > { %v4743_v3 = vmul.f32 %v4711_v15, %v8647_v14  ;;  %v4709_v19 = vmul.f32 %v6655_v23, %v4614_v24  ;;  %v6689_v14 = vld [vmem:[%s7009_s7 + $0xf0] sm:$0xff] }
 0x3bb   : > { %4804 = vst.msk [vmem:[%s8427_s29 + $0xe0] sm:$0xff] %vm299_vm0, %v4772_v18 }
 0x3bc   : > { %v4775_v1 = vadd.f32 %v6688_v50, %v4743_v3  ;;  %v4742_v63 = vmul.f32 %v4709_v19, %v8653_v17 }
 0x3be   : > { %4807 = vst.msk [vmem:[%s8427_s29 + $0xf8] sm:$0xff] %vm299_vm0, %v4775_v1  ;;  %v4774_v44 = vadd.f32 %v6689_v14, %v4742_v63 }
 0x3c0   : > { %4806 = vst.msk [vmem:[%s8427_s29 + $0xf0] sm:$0xff] %vm299_vm0, %v4774_v44 }
 0x3c1   : > { %6761 = shalt.err (!%p6758_p7)
}
 0x3c2   : > { %s6762_s7 = scalar_lea.hbm %s8731_s12, 4096  ;;  %s6766_s15 = scalar_lea.hbm %s8787_s5, 8192 }
 0x3c3   : > { %p6763_p9 = scmp.ne.s32.totalorder %s8731_s12, %s6762_s7  ;;  %p6767_p5 = scmp.lt.u32.totalorder %s8731_s12, %s8787_s5 }
 0x3c4   : > { %p6768_p11 = scmp.lt.u32.totalorder %s6766_s15, %s6762_s7  ;;  %p6770_p4 = scmp.lt.u32.totalorder %s6762_s7, %s8731_s12 }
 0x3c5   : > { %p6764_p1 = pnand %p6763_p9, %p6952_p12 }
 0x3c6   : > { %p6769_p2 = por %p6768_p11, %p6767_p5 }
 0x3c7   : > { %p6765_p0 = pneg %p6764_p1 }
 0x3c8   : > { %p6771_p6 = por %p6770_p4, %p6769_p2 }
 0x3ca   : > { %p6772_p8 = pnand %p6771_p6, %p6765_p0 }
 0x3cc   : > { %6775 = shalt.err (!%p6772_p8)
}
 0x3cd   : > { %s6826_s28 = smov 128   ;;  %s6827_s10 = smov 8  }
 0x3ce   : > { %6344 = dma.vmem_to_hbm [thread:$0]  (%p6952_p12), %s8733_s27, 4096, %s8731_s12, %s4809_s22, %s6826_s28, %s6826_s28, %s6827_s10  }
 0x3cf PF: > { %s4837_s11 = sand.u32 1, %s6806_s18   ;;  %p8901_p10 = scmp.ne.s32.totalorder %s8825_s25, 0 }
 0x3d0   : > { %p8902_p13 = scmp.ge.s32.totalorder %s6818_s21, 2  ;;  %s4838_s26 = scalar_lea.sflag [#allocation5], %s4837_s11 }
 0x3d2   : > { %p6355_p3 = pnand %p8902_p13, %p8901_p10 }
 0x3d4   : > { %6801 = dma.done.wait (!%p6355_p3), %s4838_s26, 4096  }
 0x3d5   : > { %6803 = vsyncadd (!%p6355_p3), %s4838_s26, 4294963200  ;;  %p19_p7 = scmp.ge.s32.totalorder %s6914_s30, 4   ;;  %s8903_s18 = smov %s6810_s19 }
 0x3d6   : > { %s8904_s19 = smov %s6814_s20  ;;  %s8905_s20 = smov %s6948_s8 }
 0x3d7   : > { %s8906_s21 = smov %s6914_s30  ;;  %21 = sbr.rel (!%p19_p7) target bundleno = 6 (0x6), region = 99 }
 0x3de   :  { %4843 = vsyncpa [#allocation4], 1 }
 0x3df   :  { %4845 = vsyncpa [#allocation4 + $0x1], 1 }
 0x3e0   :  { %4846 = vsyncpa [#allocation7], 1 }
 0x3e1   :  { %4847 = vsyncpa [#allocation5], 1 }
 0x3e2   :  { %4849 = vsyncpa [#allocation5 + $0x1], 1 }

</bundles_post_ra>
